<compile_context>
chip_gen: v7x
topology: tpu7x:2x2x1
jax: 0.10.0
libtpu: 0.0.40
codegen_flags: <defaults>
</compile_context>

<pallas_src>
import jax
import jax.numpy as jnp
from jax.experimental import pallas as pl
from jax.experimental.pallas import tpu as pltpu

IN_DIM = 7 * 129   # 903
H1 = 3 * 129       # 387
H2 = 129
H3 = 40
LATENT_DIM = 16    # config['latent_dim']


def _round_up(x, m):
    return ((x + m - 1) // m) * m


def _gelu(x):
    # exact (erf-based) GELU — matches torch.nn.GELU() default (approximate='none')
    inv_sqrt2 = jnp.float32(0.7071067811865476)
    return 0.5 * x * (1.0 + jax.lax.erf(x * inv_sqrt2))


def _mlp_vae_kernel(x_ref, eps_ref,
                    w1, b1, w2, b2, w3, b3,
                    wms, bms,                    # fused + lane-padded [mu | log_var] head
                    w4, b4, wd1, bd1, wd2, bd2, wd3, bd3,
                    xhat_ref, lat_ref):
    L = eps_ref.shape[-1]

    def dense(a_bf16, w_ref, b_ref):
        # bf16 operands on the MXU, f32 accumulation, f32 bias add.
        return (jnp.dot(a_bf16, w_ref[...], preferred_element_type=jnp.float32)
                + b_ref[...])

    def gelu_bf16(y_f32):
        # GELU evaluated in f32, then narrowed to bf16 for the next MXU matmul.
        return _gelu(y_f32).astype(jnp.bfloat16)

    x = x_ref[...]                                   # bf16 (tile, 903)

    # encoder: 903 -> 387 -> 129 -> 40  (GELU after each)
    h = gelu_bf16(dense(x, w1, b1))
    h = gelu_bf16(dense(h, w2, b2))
    h = gelu_bf16(dense(h, w3, b3))

    # fused, lane-dense latent head: (40, 128) -> [ mu | log_var | 0-pad ]
    ms = dense(h, wms, bms)                          # f32 (tile, LAT_OUT)
    mu = ms[:, :L]
    log_var = ms[:, L:2 * L]

    # reparameterization: z = mu + exp(0.5 * log_var) * eps
    z = mu + jnp.exp(0.5 * log_var) * eps_ref[...]   # f32 (tile, L)

    # linear2 + decoder: L -> 40 -> 129 -> 387 -> 903 (no act on last layer)
    g = gelu_bf16(dense(z.astype(jnp.bfloat16), w4, b4))
    g = gelu_bf16(dense(g, wd1, bd1))
    g = gelu_bf16(dense(g, wd2, bd2))
    xh = dense(g, wd3, bd3)                          # f32 (tile, 903)

    xhat_ref[...] = xh.astype(jnp.bfloat16)

    # latent slab is already lane-dense from the padded head matmul;
    # write it whole, then drop z into its 16 lanes.
    lat_ref[...] = ms
    lat_ref[:, 2 * L:3 * L] = z


# order in which weight/bias params are fed to the kernel (after head fusion)
_PARAM_ORDER = ('w1', 'b1', 'w2', 'b2', 'w3', 'b3',
                'wms', 'bms',
                'w4', 'b4', 'wd1', 'bd1', 'wd2', 'bd2', 'wd3', 'bd3')


def init_params(key, latent_dim=LATENT_DIM):
    """Deterministic synthetic init (PyTorch-Linear-like uniform(-1/sqrt(in), 1/sqrt(in)))."""
    dims = {
        'w1': (IN_DIM, H1), 'w2': (H1, H2), 'w3': (H2, H3),
        'wm': (H3, latent_dim), 'ws': (H3, latent_dim),
        'w4': (latent_dim, H3),
        'wd1': (H3, H2), 'wd2': (H2, H1), 'wd3': (H1, IN_DIM),
    }
    params = {}
    keys = jax.random.split(key, 2 * len(dims))
    for i, (name, (fin, fout)) in enumerate(sorted(dims.items())):
        bound = 1.0 / jnp.sqrt(jnp.float32(fin))
        params[name] = jax.random.uniform(
            keys[2 * i], (fin, fout), jnp.float32, minval=-bound, maxval=bound)
        bname = 'b' + name[1:]
        params[bname] = jax.random.uniform(
            keys[2 * i + 1], (1, fout), jnp.float32, minval=-bound, maxval=bound)
    return params


def mlp_vae_forward(X, eps, params, *, batch_tile=256):
    """Run the fused MLPVAE forward. Returns (X_hat, z, mu, log_var), all f32."""
    B = X.shape[0]
    assert X.shape[1:] == (7, 129)
    L = params['wm'].shape[1]
    LAT_OUT = max(128, _round_up(3 * L, 128))   # lane-dense packed latent slab

    # fat I/O slabs in bf16 (halves HBM traffic); eps / latents stay f32.
    x_flat = X.reshape(B, IN_DIM).astype(jnp.bfloat16)
    eps = eps.astype(jnp.float32)

    # Tile choice: never over-pad tiny batches; for batches > 128 rows make
    # sure the grid has >= 2 steps so ("parallel",) can shard across the two
    # v7x TensorCores; cap at batch_tile (v6e can pass batch_tile=512).
    B8 = _round_up(B, 8)
    if B8 <= 128:
        tile = B8
    else:
        tile = min(batch_tile, _round_up((B8 + 1) // 2, 16))
    B_pad = _round_up(B8, tile)
    if B_pad != B:
        x_flat = jnp.pad(x_flat, ((0, B_pad - B), (0, 0)))
        eps = jnp.pad(eps, ((0, B_pad - B), (0, 0)))
    grid = (B_pad // tile,)

    # Kernel-side params: bf16 weights, f32 biases, fused + lane-padded head.
    kparams = {}
    for name in ('w1', 'w2', 'w3', 'w4', 'wd1', 'wd2', 'wd3'):
        kparams[name] = params[name].astype(jnp.bfloat16)
    for name in ('b1', 'b2', 'b3', 'b4', 'bd1', 'bd2', 'bd3'):
        kparams[name] = params[name].astype(jnp.float32)
    wms = jnp.concatenate([params['wm'], params['ws']], axis=1)          # (40, 2L)
    bms = jnp.concatenate([params['bm'], params['bs']], axis=1)          # (1, 2L)
    kparams['wms'] = jnp.pad(wms, ((0, 0), (0, LAT_OUT - 2 * L))).astype(jnp.bfloat16)
    kparams['bms'] = jnp.pad(bms, ((0, 0), (0, LAT_OUT - 2 * L))).astype(jnp.float32)

    args = [x_flat, eps] + [kparams[n] for n in _PARAM_ORDER]

    weight_bytes = sum(int(kparams[n].size) * kparams[n].dtype.itemsize
                       for n in _PARAM_ORDER)
    io_bytes = (B_pad * IN_DIM * 2      # x (bf16)
                + B_pad * L * 4         # eps (f32)
                + B_pad * IN_DIM * 2    # xhat (bf16)
                + B_pad * LAT_OUT * 4)  # lat (f32)
    matmul_terms = (IN_DIM * H1 + H1 * H2 + H2 * H3 + H3 * LAT_OUT
                    + L * H3 + H3 * H2 + H2 * H1 + H1 * IN_DIM)
    cost = pl.CostEstimate(
        flops=2 * B_pad * matmul_terms,
        transcendentals=B_pad * (2 * (H1 + H2 + H3) + L),
        bytes_accessed=io_bytes + weight_bytes,
    )

    def run(use_pipeline_modes):
        def spec(shape, index_map, bufs=None):
            if use_pipeline_modes and bufs is not None and hasattr(pl, "Buffered"):
                return pl.BlockSpec(shape, index_map, pipeline_mode=pl.Buffered(bufs))
            return pl.BlockSpec(shape, index_map)

        in_specs = [spec((tile, IN_DIM), lambda i: (i, 0), bufs=3),   # streamed x
                    spec((tile, L), lambda i: (i, 0))]                # eps
        for name in _PARAM_ORDER:                                     # grid-invariant
            in_specs.append(spec(kparams[name].shape, lambda i: (0, 0), bufs=1))
        out_specs = [pl.BlockSpec((tile, IN_DIM), lambda i: (i, 0)),
                     pl.BlockSpec((tile, LAT_OUT), lambda i: (i, 0))]
        out_shape = [jax.ShapeDtypeStruct((B_pad, IN_DIM), jnp.bfloat16),
                     jax.ShapeDtypeStruct((B_pad, LAT_OUT), jnp.float32)]
        return pl.pallas_call(
            _mlp_vae_kernel,
            out_shape=out_shape,
            grid_spec=pltpu.PrefetchScalarGridSpec(
                num_scalar_prefetch=0,
                grid=grid,
                in_specs=in_specs,
                out_specs=out_specs),
            compiler_params=pltpu.CompilerParams(
                dimension_semantics=("parallel",)),
            cost_estimate=cost,
        )(*args)

    try:
        xhat_flat, lat = run(True)
    except Exception:
        # Fallback for Pallas versions that reject pipeline_mode / Buffered(1);
        # identical math, just default double-buffering.
        xhat_flat, lat = run(False)

    X_hat = xhat_flat[:B].astype(jnp.float32).reshape(B, 7, 129)
    mu = lat[:B, 0:L]
    log_var = lat[:B, L:2 * L]
    z = lat[:B, 2 * L:3 * L]
    return X_hat, z, mu, log_var


def mlp_vae_reference_f32(X, eps, params):
    """Pure-JAX f32 reference matching the PyTorch forward semantics."""
    B = X.shape[0]
    x = X.reshape(B, IN_DIM)
    h = _gelu(x @ params['w1'] + params['b1'])
    h = _gelu(h @ params['w2'] + params['b2'])
    h = _gelu(h @ params['w3'] + params['b3'])
    mu = h @ params['wm'] + params['bm']
    log_var = h @ params['ws'] + params['bs']
    z = mu + jnp.exp(0.5 * log_var) * eps
    g = _gelu(z @ params['w4'] + params['b4'])
    g = _gelu(g @ params['wd1'] + params['bd1'])
    g = _gelu(g @ params['wd2'] + params['bd2'])
    xh = g @ params['wd3'] + params['bd3']
    return xh.reshape(B, 7, 129), z, mu, log_var


def mlp_vae_reference_bf16(X, eps, params):
    """Pure-JAX reference reproducing the kernel's bf16-MXU / f32-accumulate numerics."""
    B = X.shape[0]
    bf = jnp.bfloat16
    x = X.reshape(B, IN_DIM).astype(bf)

    def dense(a, w, b):
        return jnp.dot(a, w.astype(bf), preferred_element_type=jnp.float32) + b

    def gelu_bf16(y):
        return _gelu(y).astype(bf)

    h = gelu_bf16(dense(x, params['w1'], params['b1']))
    h = gelu_bf16(dense(h, params['w2'], params['b2']))
    h = gelu_bf16(dense(h, params['w3'], params['b3']))
    mu = dense(h, params['wm'], params['bm'])
    log_var = dense(h, params['ws'], params['bs'])
    z = mu + jnp.exp(0.5 * log_var) * eps
    g = gelu_bf16(dense(z.astype(bf), params['w4'], params['b4']))
    g = gelu_bf16(dense(g, params['wd1'], params['bd1']))
    g = gelu_bf16(dense(g, params['wd2'], params['bd2']))
    xh = dense(g, params['wd3'], params['bd3'])
    # kernel emits X_hat through a bf16 output slab — mirror that rounding
    xh = xh.astype(bf).astype(jnp.float32)
    return xh.reshape(B, 7, 129), z, mu, log_var


if __name__ == "__main__":
    key = jax.random.PRNGKey(0)
    k_param, k_x, k_eps = jax.random.split(key, 3)

    B = 8
    params = init_params(k_param, LATENT_DIM)
    X = jax.random.normal(k_x, (B, 7, 129), dtype=jnp.float32)
    # eps is the N(0,1) draw of self.sample(); generated here (deterministic key)
    # instead of inside the kernel so the forward is reproducible.
    # TODO(synk): could be drawn in-kernel with pltpu.prng_seed/prng_random_bits.
    eps = jax.random.normal(k_eps, (B, LATENT_DIM), dtype=jnp.float32)

    X_hat, code, mu, log_var = mlp_vae_forward(X, eps, params)
    jax.block_until_ready((X_hat, code, mu, log_var))

    assert X_hat.shape == (B, 7, 129)
    assert code.shape == (B, LATENT_DIM)

    # 1) tight check against a bf16-matched reference (kernel implements exactly
    #    this arithmetic: bf16 MXU operands, f32 accumulation, f32 GELU/exp).
    refs_bf16 = mlp_vae_reference_bf16(X, eps, params)
    for a, b in zip((X_hat, code, mu, log_var), refs_bf16):
        assert jnp.allclose(a, b, rtol=1e-3, atol=1e-3), "mismatch vs bf16-matched reference"

    # 2) loose check against the pure-f32 PyTorch-semantics reference
    #    (bf16 MXU trades ~1e-4 parity for 2-3x speed, per perf review).
    refs_f32 = mlp_vae_reference_f32(X, eps, params)
    for a, b in zip((X_hat, code, mu, log_var), refs_f32):
        assert jnp.allclose(a, b, rtol=5e-2, atol=5e-2), "mismatch vs f32 reference"

    print("KERNEL_OK")
</pallas_src>

<mosaic_0001>
module attributes {stable_mosaic.version = 11 : i64} {
  func.func @_mlp_vae_kernel(%arg0: i32, %arg1: memref<8x903xbf16, #tpu.memory_space<vmem>>, %arg2: memref<8x16xf32, #tpu.memory_space<vmem>>, %arg3: memref<903x387xbf16, #tpu.memory_space<vmem>>, %arg4: memref<1x387xf32, #tpu.memory_space<vmem>>, %arg5: memref<387x129xbf16, #tpu.memory_space<vmem>>, %arg6: memref<1x129xf32, #tpu.memory_space<vmem>>, %arg7: memref<129x40xbf16, #tpu.memory_space<vmem>>, %arg8: memref<1x40xf32, #tpu.memory_space<vmem>>, %arg9: memref<40x128xbf16, #tpu.memory_space<vmem>>, %arg10: memref<1x128xf32, #tpu.memory_space<vmem>>, %arg11: memref<16x40xbf16, #tpu.memory_space<vmem>>, %arg12: memref<1x40xf32, #tpu.memory_space<vmem>>, %arg13: memref<40x129xbf16, #tpu.memory_space<vmem>>, %arg14: memref<1x129xf32, #tpu.memory_space<vmem>>, %arg15: memref<129x387xbf16, #tpu.memory_space<vmem>>, %arg16: memref<1x387xf32, #tpu.memory_space<vmem>>, %arg17: memref<387x903xbf16, #tpu.memory_space<vmem>>, %arg18: memref<1x903xf32, #tpu.memory_space<vmem>>, %arg19: memref<8x903xbf16, #tpu.memory_space<vmem>>, %arg20: memref<8x128xf32, #tpu.memory_space<vmem>>) attributes {dimension_semantics = [#tpu.dimension_semantics<parallel>], iteration_bounds = array<i64: 1>, scalar_prefetch = 0 : i64, scratch_operands = 0 : i64, tpu.core_type = #tpu.core_type<tc>, window_params = [{transform_indices = @transform_0, window_bounds = array<i64: 8, 903>}, {transform_indices = @transform_1, window_bounds = array<i64: 8, 16>}, {pipeline_mode = #tpu.pipeline_mode<synchronous>, transform_indices = @transform_2, window_bounds = array<i64: 903, 387>}, {pipeline_mode = #tpu.pipeline_mode<synchronous>, transform_indices = @transform_3, window_bounds = array<i64: 1, 387>}, {pipeline_mode = #tpu.pipeline_mode<synchronous>, transform_indices = @transform_4, window_bounds = array<i64: 387, 129>}, {pipeline_mode = #tpu.pipeline_mode<synchronous>, transform_indices = @transform_5, window_bounds = array<i64: 1, 129>}, {pipeline_mode = #tpu.pipeline_mode<synchronous>, transform_indices = @transform_6, window_bounds = array<i64: 129, 40>}, {pipeline_mode = #tpu.pipeline_mode<synchronous>, transform_indices = @transform_7, window_bounds = array<i64: 1, 40>}, {pipeline_mode = #tpu.pipeline_mode<synchronous>, transform_indices = @transform_8, window_bounds = array<i64: 40, 128>}, {pipeline_mode = #tpu.pipeline_mode<synchronous>, transform_indices = @transform_9, window_bounds = array<i64: 1, 128>}, {pipeline_mode = #tpu.pipeline_mode<synchronous>, transform_indices = @transform_10, window_bounds = array<i64: 16, 40>}, {pipeline_mode = #tpu.pipeline_mode<synchronous>, transform_indices = @transform_11, window_bounds = array<i64: 1, 40>}, {pipeline_mode = #tpu.pipeline_mode<synchronous>, transform_indices = @transform_12, window_bounds = array<i64: 40, 129>}, {pipeline_mode = #tpu.pipeline_mode<synchronous>, transform_indices = @transform_13, window_bounds = array<i64: 1, 129>}, {pipeline_mode = #tpu.pipeline_mode<synchronous>, transform_indices = @transform_14, window_bounds = array<i64: 129, 387>}, {pipeline_mode = #tpu.pipeline_mode<synchronous>, transform_indices = @transform_15, window_bounds = array<i64: 1, 387>}, {pipeline_mode = #tpu.pipeline_mode<synchronous>, transform_indices = @transform_16, window_bounds = array<i64: 387, 903>}, {pipeline_mode = #tpu.pipeline_mode<synchronous>, transform_indices = @transform_17, window_bounds = array<i64: 1, 903>}, {transform_indices = @transform_18, window_bounds = array<i64: 8, 903>}, {transform_indices = @transform_19, window_bounds = array<i64: 8, 128>}]} {
    %c0 = arith.constant 0 : index
    %c0_0 = arith.constant 0 : index
    %0 = vector.load %arg1[%c0, %c0_0] : memref<8x903xbf16, #tpu.memory_space<vmem>>, vector<8x903xbf16>
    %c0_1 = arith.constant 0 : index
    %c0_2 = arith.constant 0 : index
    %1 = vector.load %arg3[%c0_1, %c0_2] : memref<903x387xbf16, #tpu.memory_space<vmem>>, vector<903x387xbf16>
    %cst = arith.constant dense<0.000000e+00> : vector<8x387xf32>
    %2 = tpu.matmul %0, %1, %cst {dimension_numbers = #tpu.dot_dimension_numbers<[1], [0], [0], [1], [0, 0, 1, 1], [], []>} : vector<8x903xbf16>, vector<903x387xbf16>, vector<8x387xf32> -> vector<8x387xf32>
    %c0_3 = arith.constant 0 : index
    %c0_4 = arith.constant 0 : index
    %3 = vector.load %arg4[%c0_3, %c0_4] : memref<1x387xf32, #tpu.memory_space<vmem>>, vector<1x387xf32>
    %4 = vector.broadcast %3 : vector<1x387xf32> to vector<8x387xf32>
    %5 = arith.addf %2, %4 : vector<8x387xf32>
    %cst_5 = arith.constant 5.000000e-01 : f32
    %6 = vector.broadcast %cst_5 : f32 to vector<8x387xf32>
    %7 = arith.mulf %6, %5 : vector<8x387xf32>
    %cst_6 = arith.constant 0.707106769 : f32
    %8 = vector.broadcast %cst_6 : f32 to vector<8x387xf32>
    %9 = arith.mulf %5, %8 : vector<8x387xf32>
    %10 = math.erf %9 : vector<8x387xf32>
    %cst_7 = arith.constant 1.000000e+00 : f32
    %11 = vector.broadcast %cst_7 : f32 to vector<8x387xf32>
    %12 = arith.addf %11, %10 : vector<8x387xf32>
    %13 = arith.mulf %7, %12 : vector<8x387xf32>
    %14 = arith.truncf %13 : vector<8x387xf32> to vector<8x387xbf16>
    %c0_8 = arith.constant 0 : index
    %c0_9 = arith.constant 0 : index
    %15 = vector.load %arg5[%c0_8, %c0_9] : memref<387x129xbf16, #tpu.memory_space<vmem>>, vector<387x129xbf16>
    %cst_10 = arith.constant dense<0.000000e+00> : vector<8x129xf32>
    %16 = tpu.matmul %14, %15, %cst_10 {dimension_numbers = #tpu.dot_dimension_numbers<[1], [0], [0], [1], [0, 0, 1, 1], [], []>} : vector<8x387xbf16>, vector<387x129xbf16>, vector<8x129xf32> -> vector<8x129xf32>
    %c0_11 = arith.constant 0 : index
    %c0_12 = arith.constant 0 : index
    %17 = vector.load %arg6[%c0_11, %c0_12] : memref<1x129xf32, #tpu.memory_space<vmem>>, vector<1x129xf32>
    %18 = vector.broadcast %17 : vector<1x129xf32> to vector<8x129xf32>
    %19 = arith.addf %16, %18 : vector<8x129xf32>
    %cst_13 = arith.constant 5.000000e-01 : f32
    %20 = vector.broadcast %cst_13 : f32 to vector<8x129xf32>
    %21 = arith.mulf %20, %19 : vector<8x129xf32>
    %cst_14 = arith.constant 0.707106769 : f32
    %22 = vector.broadcast %cst_14 : f32 to vector<8x129xf32>
    %23 = arith.mulf %19, %22 : vector<8x129xf32>
    %24 = math.erf %23 : vector<8x129xf32>
    %cst_15 = arith.constant 1.000000e+00 : f32
    %25 = vector.broadcast %cst_15 : f32 to vector<8x129xf32>
    %26 = arith.addf %25, %24 : vector<8x129xf32>
    %27 = arith.mulf %21, %26 : vector<8x129xf32>
    %28 = arith.truncf %27 : vector<8x129xf32> to vector<8x129xbf16>
    %c0_16 = arith.constant 0 : index
    %c0_17 = arith.constant 0 : index
    %29 = vector.load %arg7[%c0_16, %c0_17] : memref<129x40xbf16, #tpu.memory_space<vmem>>, vector<129x40xbf16>
    %cst_18 = arith.constant dense<0.000000e+00> : vector<8x40xf32>
    %30 = tpu.matmul %28, %29, %cst_18 {dimension_numbers = #tpu.dot_dimension_numbers<[1], [0], [0], [1], [0, 0, 1, 1], [], []>} : vector<8x129xbf16>, vector<129x40xbf16>, vector<8x40xf32> -> vector<8x40xf32>
    %c0_19 = arith.constant 0 : index
    %c0_20 = arith.constant 0 : index
    %31 = vector.load %arg8[%c0_19, %c0_20] : memref<1x40xf32, #tpu.memory_space<vmem>>, vector<1x40xf32>
    %32 = vector.broadcast %31 : vector<1x40xf32> to vector<8x40xf32>
    %33 = arith.addf %30, %32 : vector<8x40xf32>
    %cst_21 = arith.constant 5.000000e-01 : f32
    %34 = vector.broadcast %cst_21 : f32 to vector<8x40xf32>
    %35 = arith.mulf %34, %33 : vector<8x40xf32>
    %cst_22 = arith.constant 0.707106769 : f32
    %36 = vector.broadcast %cst_22 : f32 to vector<8x40xf32>
    %37 = arith.mulf %33, %36 : vector<8x40xf32>
    %38 = math.erf %37 : vector<8x40xf32>
    %cst_23 = arith.constant 1.000000e+00 : f32
    %39 = vector.broadcast %cst_23 : f32 to vector<8x40xf32>
    %40 = arith.addf %39, %38 : vector<8x40xf32>
    %41 = arith.mulf %35, %40 : vector<8x40xf32>
    %42 = arith.truncf %41 : vector<8x40xf32> to vector<8x40xbf16>
    %c0_24 = arith.constant 0 : index
    %c0_25 = arith.constant 0 : index
    %43 = vector.load %arg9[%c0_24, %c0_25] : memref<40x128xbf16, #tpu.memory_space<vmem>>, vector<40x128xbf16>
    %cst_26 = arith.constant dense<0.000000e+00> : vector<8x128xf32>
    %44 = tpu.matmul %42, %43, %cst_26 {dimension_numbers = #tpu.dot_dimension_numbers<[1], [0], [0], [1], [0, 0, 1, 1], [], []>} : vector<8x40xbf16>, vector<40x128xbf16>, vector<8x128xf32> -> vector<8x128xf32>
    %c0_27 = arith.constant 0 : index
    %c0_28 = arith.constant 0 : index
    %45 = vector.load %arg10[%c0_27, %c0_28] : memref<1x128xf32, #tpu.memory_space<vmem>>, vector<1x128xf32>
    %46 = vector.broadcast %45 : vector<1x128xf32> to vector<8x128xf32>
    %47 = arith.addf %44, %46 : vector<8x128xf32>
    %48 = vector.extract_strided_slice %47 {offsets = [0, 0], sizes = [8, 16], strides = [1, 1]} : vector<8x128xf32> to vector<8x16xf32>
    %49 = vector.extract_strided_slice %47 {offsets = [0, 16], sizes = [8, 16], strides = [1, 1]} : vector<8x128xf32> to vector<8x16xf32>
    %cst_29 = arith.constant 5.000000e-01 : f32
    %50 = vector.broadcast %cst_29 : f32 to vector<8x16xf32>
    %51 = arith.mulf %50, %49 : vector<8x16xf32>
    %52 = math.exp %51 : vector<8x16xf32>
    %c0_30 = arith.constant 0 : index
    %c0_31 = arith.constant 0 : index
    %53 = vector.load %arg2[%c0_30, %c0_31] : memref<8x16xf32, #tpu.memory_space<vmem>>, vector<8x16xf32>
    %54 = arith.mulf %52, %53 : vector<8x16xf32>
    %55 = arith.addf %48, %54 : vector<8x16xf32>
    %56 = arith.truncf %55 : vector<8x16xf32> to vector<8x16xbf16>
    %c0_32 = arith.constant 0 : index
    %c0_33 = arith.constant 0 : index
    %57 = vector.load %arg11[%c0_32, %c0_33] : memref<16x40xbf16, #tpu.memory_space<vmem>>, vector<16x40xbf16>
    %cst_34 = arith.constant dense<0.000000e+00> : vector<8x40xf32>
    %58 = tpu.matmul %56, %57, %cst_34 {dimension_numbers = #tpu.dot_dimension_numbers<[1], [0], [0], [1], [0, 0, 1, 1], [], []>} : vector<8x16xbf16>, vector<16x40xbf16>, vector<8x40xf32> -> vector<8x40xf32>
    %c0_35 = arith.constant 0 : index
    %c0_36 = arith.constant 0 : index
    %59 = vector.load %arg12[%c0_35, %c0_36] : memref<1x40xf32, #tpu.memory_space<vmem>>, vector<1x40xf32>
    %60 = vector.broadcast %59 : vector<1x40xf32> to vector<8x40xf32>
    %61 = arith.addf %58, %60 : vector<8x40xf32>
    %cst_37 = arith.constant 5.000000e-01 : f32
    %62 = vector.broadcast %cst_37 : f32 to vector<8x40xf32>
    %63 = arith.mulf %62, %61 : vector<8x40xf32>
    %cst_38 = arith.constant 0.707106769 : f32
    %64 = vector.broadcast %cst_38 : f32 to vector<8x40xf32>
    %65 = arith.mulf %61, %64 : vector<8x40xf32>
    %66 = math.erf %65 : vector<8x40xf32>
    %cst_39 = arith.constant 1.000000e+00 : f32
    %67 = vector.broadcast %cst_39 : f32 to vector<8x40xf32>
    %68 = arith.addf %67, %66 : vector<8x40xf32>
    %69 = arith.mulf %63, %68 : vector<8x40xf32>
    %70 = arith.truncf %69 : vector<8x40xf32> to vector<8x40xbf16>
    %c0_40 = arith.constant 0 : index
    %c0_41 = arith.constant 0 : index
    %71 = vector.load %arg13[%c0_40, %c0_41] : memref<40x129xbf16, #tpu.memory_space<vmem>>, vector<40x129xbf16>
    %cst_42 = arith.constant dense<0.000000e+00> : vector<8x129xf32>
    %72 = tpu.matmul %70, %71, %cst_42 {dimension_numbers = #tpu.dot_dimension_numbers<[1], [0], [0], [1], [0, 0, 1, 1], [], []>} : vector<8x40xbf16>, vector<40x129xbf16>, vector<8x129xf32> -> vector<8x129xf32>
    %c0_43 = arith.constant 0 : index
    %c0_44 = arith.constant 0 : index
    %73 = vector.load %arg14[%c0_43, %c0_44] : memref<1x129xf32, #tpu.memory_space<vmem>>, vector<1x129xf32>
    %74 = vector.broadcast %73 : vector<1x129xf32> to vector<8x129xf32>
    %75 = arith.addf %72, %74 : vector<8x129xf32>
    %cst_45 = arith.constant 5.000000e-01 : f32
    %76 = vector.broadcast %cst_45 : f32 to vector<8x129xf32>
    %77 = arith.mulf %76, %75 : vector<8x129xf32>
    %cst_46 = arith.constant 0.707106769 : f32
    %78 = vector.broadcast %cst_46 : f32 to vector<8x129xf32>
    %79 = arith.mulf %75, %78 : vector<8x129xf32>
    %80 = math.erf %79 : vector<8x129xf32>
    %cst_47 = arith.constant 1.000000e+00 : f32
    %81 = vector.broadcast %cst_47 : f32 to vector<8x129xf32>
    %82 = arith.addf %81, %80 : vector<8x129xf32>
    %83 = arith.mulf %77, %82 : vector<8x129xf32>
    %84 = arith.truncf %83 : vector<8x129xf32> to vector<8x129xbf16>
    %c0_48 = arith.constant 0 : index
    %c0_49 = arith.constant 0 : index
    %85 = vector.load %arg15[%c0_48, %c0_49] : memref<129x387xbf16, #tpu.memory_space<vmem>>, vector<129x387xbf16>
    %cst_50 = arith.constant dense<0.000000e+00> : vector<8x387xf32>
    %86 = tpu.matmul %84, %85, %cst_50 {dimension_numbers = #tpu.dot_dimension_numbers<[1], [0], [0], [1], [0, 0, 1, 1], [], []>} : vector<8x129xbf16>, vector<129x387xbf16>, vector<8x387xf32> -> vector<8x387xf32>
    %c0_51 = arith.constant 0 : index
    %c0_52 = arith.constant 0 : index
    %87 = vector.load %arg16[%c0_51, %c0_52] : memref<1x387xf32, #tpu.memory_space<vmem>>, vector<1x387xf32>
    %88 = vector.broadcast %87 : vector<1x387xf32> to vector<8x387xf32>
    %89 = arith.addf %86, %88 : vector<8x387xf32>
    %cst_53 = arith.constant 5.000000e-01 : f32
    %90 = vector.broadcast %cst_53 : f32 to vector<8x387xf32>
    %91 = arith.mulf %90, %89 : vector<8x387xf32>
    %cst_54 = arith.constant 0.707106769 : f32
    %92 = vector.broadcast %cst_54 : f32 to vector<8x387xf32>
    %93 = arith.mulf %89, %92 : vector<8x387xf32>
    %94 = math.erf %93 : vector<8x387xf32>
    %cst_55 = arith.constant 1.000000e+00 : f32
    %95 = vector.broadcast %cst_55 : f32 to vector<8x387xf32>
    %96 = arith.addf %95, %94 : vector<8x387xf32>
    %97 = arith.mulf %91, %96 : vector<8x387xf32>
    %98 = arith.truncf %97 : vector<8x387xf32> to vector<8x387xbf16>
    %c0_56 = arith.constant 0 : index
    %c0_57 = arith.constant 0 : index
    %99 = vector.load %arg17[%c0_56, %c0_57] : memref<387x903xbf16, #tpu.memory_space<vmem>>, vector<387x903xbf16>
    %cst_58 = arith.constant dense<0.000000e+00> : vector<8x903xf32>
    %100 = tpu.matmul %98, %99, %cst_58 {dimension_numbers = #tpu.dot_dimension_numbers<[1], [0], [0], [1], [0, 0, 1, 1], [], []>} : vector<8x387xbf16>, vector<387x903xbf16>, vector<8x903xf32> -> vector<8x903xf32>
    %c0_59 = arith.constant 0 : index
    %c0_60 = arith.constant 0 : index
    %101 = vector.load %arg18[%c0_59, %c0_60] : memref<1x903xf32, #tpu.memory_space<vmem>>, vector<1x903xf32>
    %102 = vector.broadcast %101 : vector<1x903xf32> to vector<8x903xf32>
    %103 = arith.addf %100, %102 : vector<8x903xf32>
    %104 = arith.truncf %103 : vector<8x903xf32> to vector<8x903xbf16>
    %c0_61 = arith.constant 0 : index
    %c0_62 = arith.constant 0 : index
    %105 = vector.load %arg19[%c0_61, %c0_62] : memref<8x903xbf16, #tpu.memory_space<vmem>>, vector<8x903xbf16>
    tpu.vector_store %arg19[%c0_61, %c0_62], %104 {strides = array<i32>} : memref<8x903xbf16, #tpu.memory_space<vmem>>, vector<8x903xbf16>,
    %c0_63 = arith.constant 0 : index
    %c0_64 = arith.constant 0 : index
    %106 = vector.load %arg20[%c0_63, %c0_64] : memref<8x128xf32, #tpu.memory_space<vmem>>, vector<8x128xf32>
    tpu.vector_store %arg20[%c0_63, %c0_64], %47 {strides = array<i32>} : memref<8x128xf32, #tpu.memory_space<vmem>>, vector<8x128xf32>,
    %c0_65 = arith.constant 0 : index
    %c32 = arith.constant 32 : index
    %107 = vector.load %arg20[%c0_65, %c32] : memref<8x128xf32, #tpu.memory_space<vmem>>, vector<8x16xf32>
    tpu.vector_store %arg20[%c0_65, %c32], %55 {strides = array<i32>} : memref<8x128xf32, #tpu.memory_space<vmem>>, vector<8x16xf32>,
    return
  }
  func.func @transform_0(%arg0: i32) -> (i32, i32) {
    %c0_i32 = arith.constant 0 : i32
    %c0_i32_0 = arith.constant 0 : i32
    return %arg0, %c0_i32 : i32, i32
  }
  func.func @transform_1(%arg0: i32) -> (i32, i32) {
    %c0_i32 = arith.constant 0 : i32
    %c0_i32_0 = arith.constant 0 : i32
    return %arg0, %c0_i32 : i32, i32
  }
  func.func @transform_2(%arg0: i32) -> (i32, i32) {
    %c0_i32 = arith.constant 0 : i32
    %c0_i32_0 = arith.constant 0 : i32
    %c0_i32_1 = arith.constant 0 : i32
    return %c0_i32, %c0_i32_0 : i32, i32
  }
  func.func @transform_3(%arg0: i32) -> (i32, i32) {
    %c0_i32 = arith.constant 0 : i32
    %c0_i32_0 = arith.constant 0 : i32
    %c0_i32_1 = arith.constant 0 : i32
    return %c0_i32, %c0_i32_0 : i32, i32
  }
  func.func @transform_4(%arg0: i32) -> (i32, i32) {
    %c0_i32 = arith.constant 0 : i32
    %c0_i32_0 = arith.constant 0 : i32
    %c0_i32_1 = arith.constant 0 : i32
    return %c0_i32, %c0_i32_0 : i32, i32
  }
  func.func @transform_5(%arg0: i32) -> (i32, i32) {
    %c0_i32 = arith.constant 0 : i32
    %c0_i32_0 = arith.constant 0 : i32
    %c0_i32_1 = arith.constant 0 : i32
    return %c0_i32, %c0_i32_0 : i32, i32
  }
  func.func @transform_6(%arg0: i32) -> (i32, i32) {
    %c0_i32 = arith.constant 0 : i32
    %c0_i32_0 = arith.constant 0 : i32
    %c0_i32_1 = arith.constant 0 : i32
    return %c0_i32, %c0_i32_0 : i32, i32
  }
  func.func @transform_7(%arg0: i32) -> (i32, i32) {
    %c0_i32 = arith.constant 0 : i32
    %c0_i32_0 = arith.constant 0 : i32
    %c0_i32_1 = arith.constant 0 : i32
    return %c0_i32, %c0_i32_0 : i32, i32
  }
  func.func @transform_8(%arg0: i32) -> (i32, i32) {
    %c0_i32 = arith.constant 0 : i32
    %c0_i32_0 = arith.constant 0 : i32
    %c0_i32_1 = arith.constant 0 : i32
    return %c0_i32, %c0_i32_0 : i32, i32
  }
  func.func @transform_9(%arg0: i32) -> (i32, i32) {
    %c0_i32 = arith.constant 0 : i32
    %c0_i32_0 = arith.constant 0 : i32
    %c0_i32_1 = arith.constant 0 : i32
    return %c0_i32, %c0_i32_0 : i32, i32
  }
  func.func @transform_10(%arg0: i32) -> (i32, i32) {
    %c0_i32 = arith.constant 0 : i32
    %c0_i32_0 = arith.constant 0 : i32
    %c0_i32_1 = arith.constant 0 : i32
    return %c0_i32, %c0_i32_0 : i32, i32
  }
  func.func @transform_11(%arg0: i32) -> (i32, i32) {
    %c0_i32 = arith.constant 0 : i32
    %c0_i32_0 = arith.constant 0 : i32
    %c0_i32_1 = arith.constant 0 : i32
    return %c0_i32, %c0_i32_0 : i32, i32
  }
  func.func @transform_12(%arg0: i32) -> (i32, i32) {
    %c0_i32 = arith.constant 0 : i32
    %c0_i32_0 = arith.constant 0 : i32
    %c0_i32_1 = arith.constant 0 : i32
    return %c0_i32, %c0_i32_0 : i32, i32
  }
  func.func @transform_13(%arg0: i32) -> (i32, i32) {
    %c0_i32 = arith.constant 0 : i32
    %c0_i32_0 = arith.constant 0 : i32
    %c0_i32_1 = arith.constant 0 : i32
    return %c0_i32, %c0_i32_0 : i32, i32
  }
  func.func @transform_14(%arg0: i32) -> (i32, i32) {
    %c0_i32 = arith.constant 0 : i32
    %c0_i32_0 = arith.constant 0 : i32
    %c0_i32_1 = arith.constant 0 : i32
    return %c0_i32, %c0_i32_0 : i32, i32
  }
  func.func @transform_15(%arg0: i32) -> (i32, i32) {
    %c0_i32 = arith.constant 0 : i32
    %c0_i32_0 = arith.constant 0 : i32
    %c0_i32_1 = arith.constant 0 : i32
    return %c0_i32, %c0_i32_0 : i32, i32
  }
  func.func @transform_16(%arg0: i32) -> (i32, i32) {
    %c0_i32 = arith.constant 0 : i32
    %c0_i32_0 = arith.constant 0 : i32
    %c0_i32_1 = arith.constant 0 : i32
    return %c0_i32, %c0_i32_0 : i32, i32
  }
  func.func @transform_17(%arg0: i32) -> (i32, i32) {
    %c0_i32 = arith.constant 0 : i32
    %c0_i32_0 = arith.constant 0 : i32
    %c0_i32_1 = arith.constant 0 : i32
    return %c0_i32, %c0_i32_0 : i32, i32
  }
  func.func @transform_18(%arg0: i32) -> (i32, i32) {
    %c0_i32 = arith.constant 0 : i32
    %c0_i32_0 = arith.constant 0 : i32
    return %arg0, %c0_i32 : i32, i32
  }
  func.func @transform_19(%arg0: i32) -> (i32, i32) {
    %c0_i32 = arith.constant 0 : i32
    %c0_i32_0 = arith.constant 0 : i32
    return %arg0, %c0_i32 : i32, i32
  }
}

</mosaic_0001>

<bundles_post_ra>
// kernel: tpu_custom_call.1
= control target key start
LH: loop header
LB: loop body
LE: loop exit
PB: predicated region body
PF: predicated region fallthrough
CT: control target
= control target key end

     0   :  { %s7754_s0 = inlined_call_operand.vmem [shape: bf16[8,903], index: 0, kind: input, shape index: {}]   ;;  %s7755_s1 = inlined_call_operand.vmem [shape: f32[8,16], index: 1, kind: input, shape index: {}]   ;;  %s7756_s2 = inlined_call_operand.vmem [shape: bf16[903,387], index: 2, kind: input, shape index: {}]   ;;  %s7757_s3 = inlined_call_operand.vmem [shape: f32[1,387], index: 3, kind: input, shape index: {}]   ;;  %s7758_s4 = inlined_call_operand.vmem [shape: bf16[387,129], index: 4, kind: input, shape index: {}]   ;;  %s7759_s5 = inlined_call_operand.vmem [shape: f32[1,129], index: 5, kind: input, shape index: {}]   ;;  %s7760_s6 = inlined_call_operand.vmem [shape: bf16[129,40], index: 6, kind: input, shape index: {}]   ;;  %s7761_s7 = inlined_call_operand.vmem [shape: f32[1,40], index: 7, kind: input, shape index: {}]   ;;  %s7762_s8 = inlined_call_operand.vmem [shape: bf16[40,128], index: 8, kind: input, shape index: {}]   ;;  %s7763_s9 = inlined_call_operand.vmem [shape: f32[1,128], index: 9, kind: input, shape index: {}]   ;;  %s7764_s10 = inlined_call_operand.vmem [shape: bf16[16,40], index: 10, kind: input, shape index: {}]   ;;  %s7765_s11 = inlined_call_operand.vmem [shape: f32[1,40], index: 11, kind: input, shape index: {}]   ;;  %s7766_s12 = inlined_call_operand.vmem [shape: bf16[40,129], index: 12, kind: input, shape index: {}]   ;;  %s7767_s13 = inlined_call_operand.vmem [shape: f32[1,129], index: 13, kind: input, shape index: {}]   ;;  %s7768_s14 = inlined_call_operand.vmem [shape: bf16[129,387], index: 14, kind: input, shape index: {}]   ;;  %s7769_s15 = inlined_call_operand.vmem [shape: f32[1,387], index: 15, kind: input, shape index: {}]   ;;  %s7770_s16 = inlined_call_operand.vmem [shape: bf16[387,903], index: 16, kind: input, shape index: {}]   ;;  %s7771_s17 = inlined_call_operand.vmem [shape: f32[1,903], index: 17, kind: input, shape index: {}]   ;;  %s7772_s18 = inlined_call_operand.hbm [shape: bf16[8,903], index: 18, kind: output, shape index: {0}]   ;;  %s7773_s19 = inlined_call_operand.hbm [shape: f32[8,128], index: 19, kind: output, shape index: {1}]  }
   0x1   :  { %7776 = sst [smem:[#allocation8_spill]] %s7754_s0 }
   0x2   :  { %7777 = sst [smem:[#allocation9_spill]] %s7755_s1 }
   0x3   :  { %7778 = sst [smem:[#allocation10_spill]] %s7756_s2 }
   0x4   :  { %7779 = sst [smem:[#allocation11_spill]] %s7757_s3 }
   0x5   :  { %25 = vsyncpa [#allocation3], 0  ;;  %s7780_s20 = sld [smem:[#allocation10_spill]]  ;;  %s7781_s26 = sld [smem:[#allocation8_spill]]  ;;  %vm1473_vm0 = vcmask 56320  }
   0xb   :  { %v5295_v0 = vld [vmem:[%s7780_s20 + $0x4] ss:$16 sps:$4 sm:$0xff]   ;;  %v5297_v1 = vld [vmem:[%s7780_s20 + $0xc] ss:$16 sps:$4 sm:$0xff]   ;;  %v5299_v2 = vld [vmem:[%s7780_s20] ss:$16 sps:$4 sm:$0xff]  }
   0xc   :  { %1493 = vmatprep.subr.bf16.mxu0 %v5295_v0  ;;  %v5300_v3 = vld [vmem:[%s7780_s20 + $0x8] ss:$16 sps:$4 sm:$0xff]   ;;  %1657 = vmatprep.subr.bf16.mxu1 %v5297_v1  ;;  %v5301_v4 = vld [vmem:[%s7780_s20 + $0x24] ss:$16 sps:$4 sm:$0xff]   ;;  %v5303_v5 = vld [vmem:[%s7780_s20 + $0x2c] ss:$16 sps:$4 sm:$0xff]  }
   0xd   :  { %1494 = vmatpush1.bf16.msra.mxu0 %v5299_v2  ;;  %1658 = vmatpush1.bf16.msra.mxu1 %v5300_v3  ;;  %v5305_v6 = vld [vmem:[%s7780_s20 + $0x20] ss:$16 sps:$4 sm:$0xff]   ;;  %v5306_v7 = vld [vmem:[%s7780_s20 + $0x28] ss:$16 sps:$4 sm:$0xff]   ;;  %v5307_v8 = vld [vmem:[%s7780_s20 + $0x44] ss:$16 sps:$4 sm:$0xff]  }
   0xe   :  { %1495 = vmatprep.subr.bf16.mxu0 %v5301_v4  ;;  %1659 = vmatprep.subr.bf16.mxu1 %v5303_v5  ;;  %v5309_v9 = vld [vmem:[%s7780_s20 + $0x4c] ss:$16 sps:$4 sm:$0xff]   ;;  %v5311_v10 = vld [vmem:[%s7780_s20 + $0x40] ss:$16 sps:$4 sm:$0xff]   ;;  %v5312_v11 = vld [vmem:[%s7780_s20 + $0x48] ss:$16 sps:$4 sm:$0xff]  }
   0xf   :  { %v5313_v12 = vld [vmem:[%s7780_s20 + $0x64] ss:$16 sps:$4 sm:$0xff]   ;;  %v5315_v13 = vld [vmem:[%s7780_s20 + $0x6c] ss:$16 sps:$4 sm:$0xff]   ;;  %v5317_v14 = vld [vmem:[%s7780_s20 + $0x60] ss:$16 sps:$4 sm:$0xff]  }
  0x10   :  { %v5318_v15 = vld [vmem:[%s7780_s20 + $0x68] ss:$16 sps:$4 sm:$0xff]   ;;  %v5319_v16 = vld [vmem:[%s7780_s20 + $0x84] ss:$16 sps:$4 sm:$0xff]   ;;  %v5321_v17 = vld [vmem:[%s7780_s20 + $0x8c] ss:$16 sps:$4 sm:$0xff]  }
  0x11   :  { %1496 = vmatpush1.bf16.msra.mxu0 %v5305_v6  ;;  %1660 = vmatpush1.bf16.msra.mxu1 %v5306_v7  ;;  %v5323_v18 = vld [vmem:[%s7780_s20 + $0x80] ss:$16 sps:$4 sm:$0xff]   ;;  %v5324_v19 = vld [vmem:[%s7780_s20 + $0x88] ss:$16 sps:$4 sm:$0xff]   ;;  %v5325_v20 = vld [vmem:[%s7780_s20 + $0xa4] ss:$16 sps:$4 sm:$0xff]  }
  0x12   :  { %1497 = vmatprep.subr.bf16.mxu0 %v5307_v8  ;;  %1661 = vmatprep.subr.bf16.mxu1 %v5309_v9  ;;  %v5327_v21 = vld [vmem:[%s7780_s20 + $0xac] ss:$16 sps:$4 sm:$0xff]   ;;  %v5329_v22 = vld [vmem:[%s7780_s20 + $0xa0] ss:$16 sps:$4 sm:$0xff]   ;;  %v5330_v23 = vld [vmem:[%s7780_s20 + $0xa8] ss:$16 sps:$4 sm:$0xff]  }
  0x13   :  { %v5331_v24 = vld [vmem:[%s7780_s20 + $0xc4] ss:$16 sps:$4 sm:$0xff]   ;;  %v5333_v25 = vld [vmem:[%s7780_s20 + $0xcc] ss:$16 sps:$4 sm:$0xff]   ;;  %v5335_v26 = vld [vmem:[%s7780_s20 + $0xc0] ss:$16 sps:$4 sm:$0xff]  }
  0x14   :  { %v5336_v27 = vld [vmem:[%s7780_s20 + $0xc8] ss:$16 sps:$4 sm:$0xff]   ;;  %v5337_v28 = vld [vmem:[%s7780_s20 + $0xe4] ss:$16 sps:$4 sm:$0xff]   ;;  %v5339_v29 = vld [vmem:[%s7780_s20 + $0xec] ss:$16 sps:$4 sm:$0xff]  }
  0x15   :  { %1498 = vmatpush1.bf16.msra.mxu0 %v5311_v10  ;;  %1662 = vmatpush1.bf16.msra.mxu1 %v5312_v11  ;;  %v5341_v30 = vld [vmem:[%s7780_s20 + $0xe0] ss:$16 sps:$4 sm:$0xff]   ;;  %v5342_v31 = vld [vmem:[%s7780_s20 + $0xe8] ss:$16 sps:$4 sm:$0xff]   ;;  %v5343_v32 = vld [vmem:[%s7780_s20 + $0x104] ss:$16 sps:$4 sm:$0xff]  }
  0x16   :  { %1499 = vmatprep.subr.bf16.mxu0 %v5313_v12  ;;  %1663 = vmatprep.subr.bf16.mxu1 %v5315_v13  ;;  %v5345_v33 = vld [vmem:[%s7780_s20 + $0x10c] ss:$16 sps:$4 sm:$0xff]   ;;  %v5347_v34 = vld [vmem:[%s7780_s20 + $0x100] ss:$16 sps:$4 sm:$0xff]   ;;  %v5348_v35 = vld [vmem:[%s7780_s20 + $0x108] ss:$16 sps:$4 sm:$0xff]  }
  0x17   :  { %v5349_v36 = vld [vmem:[%s7780_s20 + $0x124] ss:$16 sps:$4 sm:$0xff]   ;;  %v5351_v37 = vld [vmem:[%s7780_s20 + $0x12c] ss:$16 sps:$4 sm:$0xff]   ;;  %v5353_v38 = vld [vmem:[%s7780_s20 + $0x120] ss:$16 sps:$4 sm:$0xff]  }
  0x18   :  { %v5354_v39 = vld [vmem:[%s7780_s20 + $0x128] ss:$16 sps:$4 sm:$0xff]   ;;  %v5355_v40 = vld [vmem:[%s7780_s20 + $0x144] ss:$16 sps:$4 sm:$0xff]   ;;  %v5357_v41 = vld [vmem:[%s7780_s20 + $0x14c] ss:$16 sps:$4 sm:$0xff]  }
  0x19   :  { %1500 = vmatpush1.bf16.msra.mxu0 %v5317_v14  ;;  %1664 = vmatpush1.bf16.msra.mxu1 %v5318_v15  ;;  %v5359_v42 = vld [vmem:[%s7780_s20 + $0x140] ss:$16 sps:$4 sm:$0xff]   ;;  %v5360_v43 = vld [vmem:[%s7780_s20 + $0x148] ss:$16 sps:$4 sm:$0xff]   ;;  %v5361_v44 = vld [vmem:[%s7780_s20 + $0x164] ss:$16 sps:$4 sm:$0xff]  }
  0x1a   :  { %1501 = vmatprep.subr.bf16.mxu0 %v5319_v16  ;;  %1665 = vmatprep.subr.bf16.mxu1 %v5321_v17  ;;  %v5363_v45 = vld [vmem:[%s7780_s20 + $0x16c] ss:$16 sps:$4 sm:$0xff]   ;;  %v64_v46 = vld [vmem:[%s7781_s26] sm:$0xff]  ;;  %v5366_v49 = vld [vmem:[%s7780_s20 + $0x168] ss:$16 sps:$4 sm:$0xff]  }
  0x1b   :  { %v5365_v47 = vld [vmem:[%s7780_s20 + $0x160] ss:$16 sps:$4 sm:$0xff]   ;;  %v4641_v48 = vcombine.high %v64_v46, %v64_v46  ;;  %v5367_v50 = vld [vmem:[%s7780_s20 + $0x184] ss:$16 sps:$4 sm:$0xff]   ;;  %v5369_v51 = vld [vmem:[%s7780_s20 + $0x18c] ss:$16 sps:$4 sm:$0xff]   ;;  %v4640_v4 = vcombine.low %v64_v46, %v64_v46 }
  0x1c   :  { %v5371_v52 = vld [vmem:[%s7780_s20 + $0x180] ss:$16 sps:$4 sm:$0xff]   ;;  %v5372_v53 = vld [vmem:[%s7780_s20 + $0x188] ss:$16 sps:$4 sm:$0xff]   ;;  %v5373_v54 = vld [vmem:[%s7780_s20 + $0x1a4] ss:$16 sps:$4 sm:$0xff]  }
  0x1d   :  { %1502 = vmatpush1.bf16.msra.mxu0 %v5323_v18  ;;  %1666 = vmatpush1.bf16.msra.mxu1 %v5324_v19  ;;  %v5375_v55 = vld [vmem:[%s7780_s20 + $0x1ac] ss:$16 sps:$4 sm:$0xff]   ;;  %v5377_v56 = vld [vmem:[%s7780_s20 + $0x1a0] ss:$16 sps:$4 sm:$0xff]   ;;  %v5378_v57 = vld [vmem:[%s7780_s20 + $0x1a8] ss:$16 sps:$4 sm:$0xff]  }
  0x1e   :  { %1503 = vmatprep.subr.bf16.mxu0 %v5325_v20  ;;  %1667 = vmatprep.subr.bf16.mxu1 %v5327_v21  ;;  %v5379_v58 = vld [vmem:[%s7780_s20 + $0x1c4] ss:$16 sps:$4 sm:$0xff]   ;;  %v5381_v59 = vld [vmem:[%s7780_s20 + $0x1cc] ss:$16 sps:$4 sm:$0xff]   ;;  %v5383_v60 = vld [vmem:[%s7780_s20 + $0x1c0] ss:$16 sps:$4 sm:$0xff]  }
  0x1f   :  { %1525 = vmatprep.mubr.bf16.mxu0 %v4641_v48  ;;  %1689 = vmatprep.mubr.bf16.mxu1 %v4641_v48  ;;  %v5384_v61 = vld [vmem:[%s7780_s20 + $0x1c8] ss:$16 sps:$4 sm:$0xff]   ;;  %v5385_v62 = vld [vmem:[%s7780_s20 + $0x1e4] ss:$16 sps:$4 sm:$0xff]   ;;  %v5387_v63 = vld [vmem:[%s7780_s20 + $0x1ec] ss:$16 sps:$4 sm:$0xff]  }
  0x20   :  { %v5389_v0 = vld [vmem:[%s7780_s20 + $0x1e0] ss:$16 sps:$4 sm:$0xff]   ;;  %v5390_v1 = vld [vmem:[%s7780_s20 + $0x1e8] ss:$16 sps:$4 sm:$0xff]   ;;  %v5395_v2 = vld [vmem:[%s7780_s20 + $0x204] ss:$16 sps:$4 sm:$0xff]  }
  0x21   :  { %1504 = vmatpush1.bf16.msra.mxu0 %v5329_v22  ;;  %1668 = vmatpush1.bf16.msra.mxu1 %v5330_v23  ;;  %v5398_v3 = vld [vmem:[%s7780_s20 + $0x20c] ss:$16 sps:$4 sm:$0xff]   ;;  %v5393_v5 = vld [vmem:[%s7780_s20 + $0x200] ss:$16 sps:$4 sm:$0xff]   ;;  %v5396_v6 = vld [vmem:[%s7780_s20 + $0x208] ss:$16 sps:$4 sm:$0xff]  }
  0x22   :  { %1505 = vmatprep.subr.bf16.mxu0 %v5331_v24  ;;  %1669 = vmatprep.subr.bf16.mxu1 %v5333_v25  ;;  %v5401_v7 = vld [vmem:[%s7780_s20 + $0x224] ss:$16 sps:$4 sm:$0xff]   ;;  %v5404_v8 = vld [vmem:[%s7780_s20 + $0x22c] ss:$16 sps:$4 sm:$0xff]   ;;  %v5399_v9 = vld [vmem:[%s7780_s20 + $0x220] ss:$16 sps:$4 sm:$0xff]  }
  0x23   :  { %v5402_v10 = vld [vmem:[%s7780_s20 + $0x228] ss:$16 sps:$4 sm:$0xff]   ;;  %v5407_v11 = vld [vmem:[%s7780_s20 + $0x244] ss:$16 sps:$4 sm:$0xff]   ;;  %v5410_v12 = vld [vmem:[%s7780_s20 + $0x24c] ss:$16 sps:$4 sm:$0xff]  }
  0x24   :  { %v5405_v13 = vld [vmem:[%s7780_s20 + $0x240] ss:$16 sps:$4 sm:$0xff]   ;;  %v5408_v14 = vld [vmem:[%s7780_s20 + $0x248] ss:$16 sps:$4 sm:$0xff]   ;;  %v5413_v15 = vld [vmem:[%s7780_s20 + $0x264] ss:$16 sps:$4 sm:$0xff]  }
  0x25   :  { %1506 = vmatpush1.bf16.msra.mxu0 %v5335_v26  ;;  %1670 = vmatpush1.bf16.msra.mxu1 %v5336_v27  ;;  %v5416_v16 = vld [vmem:[%s7780_s20 + $0x26c] ss:$16 sps:$4 sm:$0xff]   ;;  %v5411_v17 = vld [vmem:[%s7780_s20 + $0x260] ss:$16 sps:$4 sm:$0xff]   ;;  %v5414_v18 = vld [vmem:[%s7780_s20 + $0x268] ss:$16 sps:$4 sm:$0xff]  }
  0x26   :  { %1507 = vmatprep.subr.bf16.mxu0 %v5337_v28  ;;  %1671 = vmatprep.subr.bf16.mxu1 %v5339_v29  ;;  %v5419_v19 = vld [vmem:[%s7780_s20 + $0x284] ss:$16 sps:$4 sm:$0xff]   ;;  %v5422_v20 = vld [vmem:[%s7780_s20 + $0x28c] ss:$16 sps:$4 sm:$0xff]   ;;  %v5417_v21 = vld [vmem:[%s7780_s20 + $0x280] ss:$16 sps:$4 sm:$0xff]  }
  0x27   :  { %v5420_v22 = vld [vmem:[%s7780_s20 + $0x288] ss:$16 sps:$4 sm:$0xff]   ;;  %v5425_v23 = vld [vmem:[%s7780_s20 + $0x2a4] ss:$16 sps:$4 sm:$0xff]   ;;  %v5428_v24 = vld [vmem:[%s7780_s20 + $0x2ac] ss:$16 sps:$4 sm:$0xff]  }
  0x28   :  { %v5423_v25 = vld [vmem:[%s7780_s20 + $0x2a0] ss:$16 sps:$4 sm:$0xff]   ;;  %v5426_v26 = vld [vmem:[%s7780_s20 + $0x2a8] ss:$16 sps:$4 sm:$0xff]   ;;  %v5431_v27 = vld [vmem:[%s7780_s20 + $0x2c4] ss:$16 sps:$4 sm:$0xff]  }
  0x29   :  { %1508 = vmatpush1.bf16.msra.mxu0 %v5341_v30  ;;  %1672 = vmatpush1.bf16.msra.mxu1 %v5342_v31  ;;  %v5434_v28 = vld [vmem:[%s7780_s20 + $0x2cc] ss:$16 sps:$4 sm:$0xff]   ;;  %v5429_v31 = vld [vmem:[%s7780_s20 + $0x2c0] ss:$16 sps:$4 sm:$0xff]   ;;  %v5456_v48 = vld [vmem:[%s7780_s20 + $0x348] ss:$16 sps:$4 sm:$0xff]  }
  0x2a   :  { %1509 = vmatprep.subr.bf16.mxu0 %v5343_v32  ;;  %1673 = vmatprep.subr.bf16.mxu1 %v5345_v33  ;;  %v6261_v29 = vld [vmem:[%s7781_s26 + $0x8] sm:$0xff]  ;;  %v5437_v33 = vld [vmem:[%s7780_s20 + $0x2e4] ss:$16 sps:$4 sm:$0xff]  }
  0x2b   :  { %v4643_v30 = vcombine.high %v6261_v29, %v6261_v29  ;;  %v5432_v32 = vld [vmem:[%s7780_s20 + $0x2c8] ss:$16 sps:$4 sm:$0xff]   ;;  %v5458_v46 = vld [vmem:[%s7780_s20 + $0x34c] ss:$16 sps:$4 sm:$0xff]  }
  0x2d   :  { %1510 = vmatpush1.bf16.msra.mxu0 %v5347_v34  ;;  %1674 = vmatpush1.bf16.msra.mxu1 %v5348_v35  ;;  %v5440_v34 = vld [vmem:[%s7780_s20 + $0x2ec] ss:$16 sps:$4 sm:$0xff]   ;;  %v5435_v35 = vld [vmem:[%s7780_s20 + $0x2e0] ss:$16 sps:$4 sm:$0xff]  }
  0x2e   :  { %1511 = vmatprep.subr.bf16.mxu0 %v5349_v36  ;;  %1675 = vmatprep.subr.bf16.mxu1 %v5351_v37  ;;  %v5438_v36 = vld [vmem:[%s7780_s20 + $0x2e8] ss:$16 sps:$4 sm:$0xff]   ;;  %v5443_v37 = vld [vmem:[%s7780_s20 + $0x304] ss:$16 sps:$4 sm:$0xff]  }
  0x31   :  { %1512 = vmatpush1.bf16.msra.mxu0 %v5353_v38  ;;  %1676 = vmatpush1.bf16.msra.mxu1 %v5354_v39  ;;  %v5446_v38 = vld [vmem:[%s7780_s20 + $0x30c] ss:$16 sps:$4 sm:$0xff]   ;;  %v5441_v39 = vld [vmem:[%s7780_s20 + $0x300] ss:$16 sps:$4 sm:$0xff]  }
  0x32   :  { %1513 = vmatprep.subr.bf16.mxu0 %v5355_v40  ;;  %1677 = vmatprep.subr.bf16.mxu1 %v5357_v41  ;;  %v5444_v40 = vld [vmem:[%s7780_s20 + $0x308] ss:$16 sps:$4 sm:$0xff]   ;;  %v5449_v41 = vld [vmem:[%s7780_s20 + $0x324] ss:$16 sps:$4 sm:$0xff]  }
  0x35   :  { %1514 = vmatpush1.bf16.msra.mxu0 %v5359_v42  ;;  %1678 = vmatpush1.bf16.msra.mxu1 %v5360_v43  ;;  %v5452_v42 = vld [vmem:[%s7780_s20 + $0x32c] ss:$16 sps:$4 sm:$0xff]   ;;  %v5447_v43 = vld [vmem:[%s7780_s20 + $0x320] ss:$16 sps:$4 sm:$0xff]  }
  0x36   :  { %1515 = vmatprep.subr.bf16.mxu0 %v5361_v44  ;;  %1679 = vmatprep.subr.bf16.mxu1 %v5363_v45  ;;  %v5450_v44 = vld [vmem:[%s7780_s20 + $0x328] ss:$16 sps:$4 sm:$0xff]   ;;  %v5455_v45 = vld [vmem:[%s7780_s20 + $0x344] ss:$16 sps:$4 sm:$0xff]  }
  0x39   :  { %1516 = vmatpush1.bf16.msra.mxu0 %v5365_v47  ;;  %1680 = vmatpush1.bf16.msra.mxu1 %v5366_v49  ;;  %v5453_v47 = vld [vmem:[%s7780_s20 + $0x340] ss:$16 sps:$4 sm:$0xff]   ;;  %v5461_v49 = vld [vmem:[%s7780_s20 + $0x364] ss:$16 sps:$4 sm:$0xff]  }
  0x3a   :  { %1517 = vmatprep.subr.bf16.mxu0 %v5367_v50  ;;  %1681 = vmatprep.subr.bf16.mxu1 %v5369_v51  ;;  %v5464_v50 = vld [vmem:[%s7780_s20 + $0x36c] ss:$16 sps:$4 sm:$0xff]   ;;  %v5459_v51 = vld [vmem:[%s7780_s20 + $0x360] ss:$16 sps:$4 sm:$0xff]  }
  0x3d   :  { %1518 = vmatpush1.bf16.msra.mxu0 %v5371_v52  ;;  %1682 = vmatpush1.bf16.msra.mxu1 %v5372_v53  ;;  %v5462_v52 = vld [vmem:[%s7780_s20 + $0x368] ss:$16 sps:$4 sm:$0xff]   ;;  %v5467_v53 = vld [vmem:[%s7780_s20 + $0x384] ss:$16 sps:$4 sm:$0xff]  }
  0x3e   :  { %1519 = vmatprep.subr.bf16.mxu0 %v5373_v54  ;;  %1683 = vmatprep.subr.bf16.mxu1 %v5375_v55  ;;  %v5470_v54 = vld [vmem:[%s7780_s20 + $0x38c] ss:$16 sps:$4 sm:$0xff]   ;;  %v5465_v55 = vld [vmem:[%s7780_s20 + $0x380] ss:$16 sps:$4 sm:$0xff]  }
  0x41   :  { %1520 = vmatpush1.bf16.msra.mxu0 %v5377_v56  ;;  %1684 = vmatpush1.bf16.msra.mxu1 %v5378_v57  ;;  %v5468_v56 = vld [vmem:[%s7780_s20 + $0x388] ss:$16 sps:$4 sm:$0xff]   ;;  %v5473_v57 = vld [vmem:[%s7780_s20 + $0x3a4] ss:$16 sps:$4 sm:$0xff]  }
  0x42   :  { %1521 = vmatprep.subr.bf16.mxu0 %v5379_v58  ;;  %1685 = vmatprep.subr.bf16.mxu1 %v5381_v59  ;;  %v5476_v58 = vld [vmem:[%s7780_s20 + $0x3ac] ss:$16 sps:$4 sm:$0xff]   ;;  %v5471_v59 = vld [vmem:[%s7780_s20 + $0x3a0] ss:$16 sps:$4 sm:$0xff]  }
  0x45   :  { %1522 = vmatpush1.bf16.msra.mxu0 %v5383_v60  ;;  %1686 = vmatpush1.bf16.msra.mxu1 %v5384_v61  ;;  %v5474_v60 = vld [vmem:[%s7780_s20 + $0x3a8] ss:$16 sps:$4 sm:$0xff]   ;;  %v5479_v61 = vld [vmem:[%s7780_s20 + $0x3c4] ss:$16 sps:$4 sm:$0xff]  }
  0x46   :  { %1523 = vmatprep.subr.bf16.mxu0 %v5385_v62  ;;  %1687 = vmatprep.subr.bf16.mxu1 %v5387_v63  ;;  %v5482_v62 = vld [vmem:[%s7780_s20 + $0x3cc] ss:$16 sps:$4 sm:$0xff]   ;;  %v5477_v63 = vld [vmem:[%s7780_s20 + $0x3c0] ss:$16 sps:$4 sm:$0xff]  }
  0x49   :  { %1524 = vmatpush1.bf16.msra.mxu0 %v5389_v0  ;;  %1688 = vmatpush1.bf16.msra.mxu1 %v5390_v1  ;;  %v5480_v0 = vld [vmem:[%s7780_s20 + $0x3c8] ss:$16 sps:$4 sm:$0xff]   ;;  %v5485_v1 = vld [vmem:[%s7780_s20 + $0x3e4] ss:$16 sps:$4 sm:$0xff]  }
  0x4a   :  { %1534 = vmatprep.subr.bf16.mxu0 %v5395_v2  ;;  %1698 = vmatprep.subr.bf16.mxu1 %v5398_v3  ;;  %v5488_v2 = vld [vmem:[%s7780_s20 + $0x3ec] ss:$16 sps:$4 sm:$0xff]   ;;  %v5483_v3 = vld [vmem:[%s7780_s20 + $0x3e0] ss:$16 sps:$4 sm:$0xff]  }
  0x4c   :  { %1526 = vmatmul.mubr.bf16.vlgmr.msra.gmra.mrb[0].mxu0 %v4640_v4  ;;  %1690 = vmatmul.mubr.bf16.vlgmr.msra.gmra.mrb[0].mxu1 %v4640_v4  ;;  %v5486_v4 = vld [vmem:[%s7780_s20 + $0x3e8] ss:$16 sps:$4 sm:$0xff]  }
  0x4d   :  { %1535 = vmatpush1.bf16.msra.mxu0 %v5393_v5  ;;  %1699 = vmatpush1.bf16.msra.mxu1 %v5396_v6  ;;  %v5493_v5 = vld [vmem:[%s7780_s20 + $0x404] ss:$16 sps:$4 sm:$0xff]   ;;  %v5496_v6 = vld [vmem:[%s7780_s20 + $0x40c] ss:$16 sps:$4 sm:$0xff]  }
  0x4e   :  { %1536 = vmatprep.subr.bf16.mxu0 %v5401_v7  ;;  %1700 = vmatprep.subr.bf16.mxu1 %v5404_v8  ;;  %v4642_v7 = vcombine.low %v6261_v29, %v6261_v29  ;;  %v5491_v8 = vld [vmem:[%s7780_s20 + $0x400] ss:$16 sps:$4 sm:$0xff]   ;;  %v5526_v29 = vld [vmem:[%s7780_s20 + $0x4ac] ss:$16 sps:$4 sm:$0xff]  }
  0x4f   :  { %1566 = vmatprep.mubr.bf16.mxu0 %v4643_v30  ;;  %1730 = vmatprep.mubr.bf16.mxu1 %v4643_v30  ;;  %v5521_v30 = vld [vmem:[%s7780_s20 + $0x4a0] ss:$16 sps:$4 sm:$0xff]  }
  0x51   :  { %1537 = vmatpush1.bf16.msra.mxu0 %v5399_v9  ;;  %1701 = vmatpush1.bf16.msra.mxu1 %v5402_v10  ;;  %v5494_v9 = vld [vmem:[%s7780_s20 + $0x408] ss:$16 sps:$4 sm:$0xff]   ;;  %v5499_v10 = vld [vmem:[%s7780_s20 + $0x424] ss:$16 sps:$4 sm:$0xff]  }
  0x52   :  { %1538 = vmatprep.subr.bf16.mxu0 %v5407_v11  ;;  %1702 = vmatprep.subr.bf16.mxu1 %v5410_v12  ;;  %v6399_v11 = vld [vmem:[%s7781_s26 + $0x10] sm:$0xff]  ;;  %v5502_v12 = vld [vmem:[%s7780_s20 + $0x42c] ss:$16 sps:$4 sm:$0xff]  }
  0x55   :  { %1539 = vmatpush1.bf16.msra.mxu0 %v5405_v13  ;;  %1703 = vmatpush1.bf16.msra.mxu1 %v5408_v14  ;;  %v4645_v13 = vcombine.high %v6399_v11, %v6399_v11  ;;  %v5497_v14 = vld [vmem:[%s7780_s20 + $0x420] ss:$16 sps:$4 sm:$0xff]  }
  0x56   :  { %1540 = vmatprep.subr.bf16.mxu0 %v5413_v15  ;;  %1704 = vmatprep.subr.bf16.mxu1 %v5416_v16  ;;  %v5500_v15 = vld [vmem:[%s7780_s20 + $0x428] ss:$16 sps:$4 sm:$0xff]   ;;  %v5505_v16 = vld [vmem:[%s7780_s20 + $0x444] ss:$16 sps:$4 sm:$0xff]  }
  0x59   :  { %1541 = vmatpush1.bf16.msra.mxu0 %v5411_v17  ;;  %1705 = vmatpush1.bf16.msra.mxu1 %v5414_v18  ;;  %v5508_v17 = vld [vmem:[%s7780_s20 + $0x44c] ss:$16 sps:$4 sm:$0xff]   ;;  %v5503_v18 = vld [vmem:[%s7780_s20 + $0x440] ss:$16 sps:$4 sm:$0xff]  }
  0x5a   :  { %1542 = vmatprep.subr.bf16.mxu0 %v5419_v19  ;;  %1706 = vmatprep.subr.bf16.mxu1 %v5422_v20  ;;  %v5506_v19 = vld [vmem:[%s7780_s20 + $0x448] ss:$16 sps:$4 sm:$0xff]   ;;  %v5511_v20 = vld [vmem:[%s7780_s20 + $0x464] ss:$16 sps:$4 sm:$0xff]  }
  0x5d   :  { %1543 = vmatpush1.bf16.msra.mxu0 %v5417_v21  ;;  %1707 = vmatpush1.bf16.msra.mxu1 %v5420_v22  ;;  %v5514_v21 = vld [vmem:[%s7780_s20 + $0x46c] ss:$16 sps:$4 sm:$0xff]   ;;  %v5509_v22 = vld [vmem:[%s7780_s20 + $0x460] ss:$16 sps:$4 sm:$0xff]  }
  0x5e   :  { %1544 = vmatprep.subr.bf16.mxu0 %v5425_v23  ;;  %1708 = vmatprep.subr.bf16.mxu1 %v5428_v24  ;;  %v5512_v23 = vld [vmem:[%s7780_s20 + $0x468] ss:$16 sps:$4 sm:$0xff]   ;;  %v5517_v24 = vld [vmem:[%s7780_s20 + $0x484] ss:$16 sps:$4 sm:$0xff]  }
  0x61   :  { %1545 = vmatpush1.bf16.msra.mxu0 %v5423_v25  ;;  %1709 = vmatpush1.bf16.msra.mxu1 %v5426_v26  ;;  %v5520_v25 = vld [vmem:[%s7780_s20 + $0x48c] ss:$16 sps:$4 sm:$0xff]   ;;  %v5515_v26 = vld [vmem:[%s7780_s20 + $0x480] ss:$16 sps:$4 sm:$0xff]  }
  0x62   :  { %1546 = vmatprep.subr.bf16.mxu0 %v5431_v27  ;;  %1710 = vmatprep.subr.bf16.mxu1 %v5434_v28  ;;  %v5518_v27 = vld [vmem:[%s7780_s20 + $0x488] ss:$16 sps:$4 sm:$0xff]   ;;  %v5523_v28 = vld [vmem:[%s7780_s20 + $0x4a4] ss:$16 sps:$4 sm:$0xff]  }
  0x65   :  { %1547 = vmatpush1.bf16.msra.mxu0 %v5429_v31  ;;  %1711 = vmatpush1.bf16.msra.mxu1 %v5432_v32  ;;  %v5524_v31 = vld [vmem:[%s7780_s20 + $0x4a8] ss:$16 sps:$4 sm:$0xff]   ;;  %v5529_v32 = vld [vmem:[%s7780_s20 + $0x4c4] ss:$16 sps:$4 sm:$0xff]  }
  0x66   :  { %1548 = vmatprep.subr.bf16.mxu0 %v5437_v33  ;;  %1712 = vmatprep.subr.bf16.mxu1 %v5440_v34  ;;  %v5532_v33 = vld [vmem:[%s7780_s20 + $0x4cc] ss:$16 sps:$4 sm:$0xff]   ;;  %v5527_v34 = vld [vmem:[%s7780_s20 + $0x4c0] ss:$16 sps:$4 sm:$0xff]  }
  0x69   :  { %1549 = vmatpush1.bf16.msra.mxu0 %v5435_v35  ;;  %1713 = vmatpush1.bf16.msra.mxu1 %v5438_v36  ;;  %v5530_v35 = vld [vmem:[%s7780_s20 + $0x4c8] ss:$16 sps:$4 sm:$0xff]   ;;  %v5535_v36 = vld [vmem:[%s7780_s20 + $0x4e4] ss:$16 sps:$4 sm:$0xff]  }
  0x6a   :  { %1550 = vmatprep.subr.bf16.mxu0 %v5443_v37  ;;  %1714 = vmatprep.subr.bf16.mxu1 %v5446_v38  ;;  %v5538_v37 = vld [vmem:[%s7780_s20 + $0x4ec] ss:$16 sps:$4 sm:$0xff]   ;;  %v5533_v38 = vld [vmem:[%s7780_s20 + $0x4e0] ss:$16 sps:$4 sm:$0xff]  }
  0x6d   :  { %1551 = vmatpush1.bf16.msra.mxu0 %v5441_v39  ;;  %1715 = vmatpush1.bf16.msra.mxu1 %v5444_v40  ;;  %v5536_v39 = vld [vmem:[%s7780_s20 + $0x4e8] ss:$16 sps:$4 sm:$0xff]   ;;  %v5541_v40 = vld [vmem:[%s7780_s20 + $0x504] ss:$16 sps:$4 sm:$0xff]  }
  0x6e   :  { %1552 = vmatprep.subr.bf16.mxu0 %v5449_v41  ;;  %1716 = vmatprep.subr.bf16.mxu1 %v5452_v42  ;;  %v5544_v41 = vld [vmem:[%s7780_s20 + $0x50c] ss:$16 sps:$4 sm:$0xff]   ;;  %v5539_v42 = vld [vmem:[%s7780_s20 + $0x500] ss:$16 sps:$4 sm:$0xff]  }
  0x71   :  { %1553 = vmatpush1.bf16.msra.mxu0 %v5447_v43  ;;  %1717 = vmatpush1.bf16.msra.mxu1 %v5450_v44  ;;  %v5542_v43 = vld [vmem:[%s7780_s20 + $0x508] ss:$16 sps:$4 sm:$0xff]   ;;  %v5547_v44 = vld [vmem:[%s7780_s20 + $0x524] ss:$16 sps:$4 sm:$0xff]  }
  0x72   :  { %1554 = vmatprep.subr.bf16.mxu0 %v5455_v45  ;;  %1718 = vmatprep.subr.bf16.mxu1 %v5458_v46  ;;  %v5550_v45 = vld [vmem:[%s7780_s20 + $0x52c] ss:$16 sps:$4 sm:$0xff]   ;;  %v5545_v46 = vld [vmem:[%s7780_s20 + $0x520] ss:$16 sps:$4 sm:$0xff]  }
  0x75   :  { %1555 = vmatpush1.bf16.msra.mxu0 %v5453_v47  ;;  %1719 = vmatpush1.bf16.msra.mxu1 %v5456_v48  ;;  %v5548_v47 = vld [vmem:[%s7780_s20 + $0x528] ss:$16 sps:$4 sm:$0xff]   ;;  %v5553_v48 = vld [vmem:[%s7780_s20 + $0x544] ss:$16 sps:$4 sm:$0xff]  }
  0x76   :  { %1556 = vmatprep.subr.bf16.mxu0 %v5461_v49  ;;  %1720 = vmatprep.subr.bf16.mxu1 %v5464_v50  ;;  %v5556_v49 = vld [vmem:[%s7780_s20 + $0x54c] ss:$16 sps:$4 sm:$0xff]   ;;  %v5551_v50 = vld [vmem:[%s7780_s20 + $0x540] ss:$16 sps:$4 sm:$0xff]  }
  0x79   :  { %1557 = vmatpush1.bf16.msra.mxu0 %v5459_v51  ;;  %1721 = vmatpush1.bf16.msra.mxu1 %v5462_v52  ;;  %v5554_v51 = vld [vmem:[%s7780_s20 + $0x548] ss:$16 sps:$4 sm:$0xff]   ;;  %v5559_v52 = vld [vmem:[%s7780_s20 + $0x564] ss:$16 sps:$4 sm:$0xff]  }
  0x7a   :  { %1558 = vmatprep.subr.bf16.mxu0 %v5467_v53  ;;  %1722 = vmatprep.subr.bf16.mxu1 %v5470_v54  ;;  %v5562_v53 = vld [vmem:[%s7780_s20 + $0x56c] ss:$16 sps:$4 sm:$0xff]   ;;  %v5557_v54 = vld [vmem:[%s7780_s20 + $0x560] ss:$16 sps:$4 sm:$0xff]  }
  0x7d   :  { %1559 = vmatpush1.bf16.msra.mxu0 %v5465_v55  ;;  %1723 = vmatpush1.bf16.msra.mxu1 %v5468_v56  ;;  %v5560_v55 = vld [vmem:[%s7780_s20 + $0x568] ss:$16 sps:$4 sm:$0xff]   ;;  %v5565_v56 = vld [vmem:[%s7780_s20 + $0x584] ss:$16 sps:$4 sm:$0xff]  }
  0x7e   :  { %1560 = vmatprep.subr.bf16.mxu0 %v5473_v57  ;;  %1724 = vmatprep.subr.bf16.mxu1 %v5476_v58  ;;  %v5568_v57 = vld [vmem:[%s7780_s20 + $0x58c] ss:$16 sps:$4 sm:$0xff]   ;;  %v5563_v58 = vld [vmem:[%s7780_s20 + $0x580] ss:$16 sps:$4 sm:$0xff]  }
  0x81   :  { %1561 = vmatpush1.bf16.msra.mxu0 %v5471_v59  ;;  %1725 = vmatpush1.bf16.msra.mxu1 %v5474_v60  ;;  %v5566_v59 = vld [vmem:[%s7780_s20 + $0x588] ss:$16 sps:$4 sm:$0xff]   ;;  %v5571_v60 = vld [vmem:[%s7780_s20 + $0x5a4] ss:$16 sps:$4 sm:$0xff]  }
  0x82   :  { %1562 = vmatprep.subr.bf16.mxu0 %v5479_v61  ;;  %1726 = vmatprep.subr.bf16.mxu1 %v5482_v62  ;;  %v5574_v61 = vld [vmem:[%s7780_s20 + $0x5ac] ss:$16 sps:$4 sm:$0xff]   ;;  %v5569_v62 = vld [vmem:[%s7780_s20 + $0x5a0] ss:$16 sps:$4 sm:$0xff]  }
  0x85   :  { %1563 = vmatpush1.bf16.msra.mxu0 %v5477_v63  ;;  %1727 = vmatpush1.bf16.msra.mxu1 %v5480_v0  ;;  %v5572_v63 = vld [vmem:[%s7780_s20 + $0x5a8] ss:$16 sps:$4 sm:$0xff]   ;;  %v5577_v0 = vld [vmem:[%s7780_s20 + $0x5c4] ss:$16 sps:$4 sm:$0xff]  }
  0x86   :  { %1564 = vmatprep.subr.bf16.mxu0 %v5485_v1  ;;  %1728 = vmatprep.subr.bf16.mxu1 %v5488_v2  ;;  %v5580_v1 = vld [vmem:[%s7780_s20 + $0x5cc] ss:$16 sps:$4 sm:$0xff]   ;;  %v5575_v2 = vld [vmem:[%s7780_s20 + $0x5c0] ss:$16 sps:$4 sm:$0xff]  }
  0x89   :  { %1565 = vmatpush1.bf16.msra.mxu0 %v5483_v3  ;;  %1729 = vmatpush1.bf16.msra.mxu1 %v5486_v4  ;;  %v5578_v3 = vld [vmem:[%s7780_s20 + $0x5c8] ss:$16 sps:$4 sm:$0xff]   ;;  %v5583_v4 = vld [vmem:[%s7780_s20 + $0x5e4] ss:$16 sps:$4 sm:$0xff]  }
  0x8a   :  { %1575 = vmatprep.subr.bf16.mxu0 %v5493_v5  ;;  %1739 = vmatprep.subr.bf16.mxu1 %v5496_v6  ;;  %v5586_v5 = vld [vmem:[%s7780_s20 + $0x5ec] ss:$16 sps:$4 sm:$0xff]   ;;  %v5581_v6 = vld [vmem:[%s7780_s20 + $0x5e0] ss:$16 sps:$4 sm:$0xff]  }
  0x8c   :  { %1567 = vmatmul.mubr.bf16.vlgmr.msra.gmra.mrb[0].mxu0 %v4642_v7  ;;  %1731 = vmatmul.mubr.bf16.vlgmr.msra.gmra.mrb[0].mxu1 %v4642_v7  ;;  %v5584_v7 = vld [vmem:[%s7780_s20 + $0x5e8] ss:$16 sps:$4 sm:$0xff]  }
  0x8d   :  { %1576 = vmatpush1.bf16.msra.mxu0 %v5491_v8  ;;  %1740 = vmatpush1.bf16.msra.mxu1 %v5494_v9  ;;  %v5591_v8 = vld [vmem:[%s7780_s20 + $0x604] ss:$16 sps:$4 sm:$0xff]   ;;  %v5594_v9 = vld [vmem:[%s7780_s20 + $0x60c] ss:$16 sps:$4 sm:$0xff]  }
  0x8e   :  { %1577 = vmatprep.subr.bf16.mxu0 %v5499_v10  ;;  %1741 = vmatprep.subr.bf16.mxu1 %v5502_v12  ;;  %v6589_v10 = vld [vmem:[%s7781_s26 + $0x18] sm:$0xff]  ;;  %v5589_v12 = vld [vmem:[%s7780_s20 + $0x600] ss:$16 sps:$4 sm:$0xff]  }
  0x8f   :  { %1607 = vmatprep.mubr.bf16.mxu0 %v4645_v13  ;;  %1771 = vmatprep.mubr.bf16.mxu1 %v4645_v13  ;;  %v5592_v13 = vld [vmem:[%s7780_s20 + $0x608] ss:$16 sps:$4 sm:$0xff]  }
  0x91   :  { %1578 = vmatpush1.bf16.msra.mxu0 %v5497_v14  ;;  %1742 = vmatpush1.bf16.msra.mxu1 %v5500_v15  ;;  %v4644_v14 = vcombine.low %v6399_v11, %v6399_v11  ;;  %v5597_v15 = vld [vmem:[%s7780_s20 + $0x624] ss:$16 sps:$4 sm:$0xff]  }
  0x92   :  { %1579 = vmatprep.subr.bf16.mxu0 %v5505_v16  ;;  %1743 = vmatprep.subr.bf16.mxu1 %v5508_v17  ;;  %v5600_v16 = vld [vmem:[%s7780_s20 + $0x62c] ss:$16 sps:$4 sm:$0xff]   ;;  %v4647_v17 = vcombine.high %v6589_v10, %v6589_v10 }
  0x95   :  { %1580 = vmatpush1.bf16.msra.mxu0 %v5503_v18  ;;  %1744 = vmatpush1.bf16.msra.mxu1 %v5506_v19 }
  0x96   :  { %1581 = vmatprep.subr.bf16.mxu0 %v5511_v20  ;;  %1745 = vmatprep.subr.bf16.mxu1 %v5514_v21 }
  0x99   :  { %1582 = vmatpush1.bf16.msra.mxu0 %v5509_v22  ;;  %1746 = vmatpush1.bf16.msra.mxu1 %v5512_v23 }
  0x9a   :  { %1583 = vmatprep.subr.bf16.mxu0 %v5517_v24  ;;  %1747 = vmatprep.subr.bf16.mxu1 %v5520_v25 }
  0x9d   :  { %1584 = vmatpush1.bf16.msra.mxu0 %v5515_v26  ;;  %1748 = vmatpush1.bf16.msra.mxu1 %v5518_v27 }
  0x9e   :  { %1585 = vmatprep.subr.bf16.mxu0 %v5523_v28  ;;  %1749 = vmatprep.subr.bf16.mxu1 %v5526_v29 }
  0xa1   :  { %1586 = vmatpush1.bf16.msra.mxu0 %v5521_v30  ;;  %1750 = vmatpush1.bf16.msra.mxu1 %v5524_v31 }
  0xa2   :  { %1587 = vmatprep.subr.bf16.mxu0 %v5529_v32  ;;  %1751 = vmatprep.subr.bf16.mxu1 %v5532_v33 }
  0xa5   :  { %1588 = vmatpush1.bf16.msra.mxu0 %v5527_v34  ;;  %1752 = vmatpush1.bf16.msra.mxu1 %v5530_v35 }
  0xa6   :  { %1589 = vmatprep.subr.bf16.mxu0 %v5535_v36  ;;  %1753 = vmatprep.subr.bf16.mxu1 %v5538_v37 }
  0xa9   :  { %1590 = vmatpush1.bf16.msra.mxu0 %v5533_v38  ;;  %1754 = vmatpush1.bf16.msra.mxu1 %v5536_v39 }
  0xaa   :  { %1591 = vmatprep.subr.bf16.mxu0 %v5541_v40  ;;  %1755 = vmatprep.subr.bf16.mxu1 %v5544_v41 }
  0xad   :  { %1592 = vmatpush1.bf16.msra.mxu0 %v5539_v42  ;;  %1756 = vmatpush1.bf16.msra.mxu1 %v5542_v43 }
  0xae   :  { %1593 = vmatprep.subr.bf16.mxu0 %v5547_v44  ;;  %1757 = vmatprep.subr.bf16.mxu1 %v5550_v45 }
  0xb1   :  { %1594 = vmatpush1.bf16.msra.mxu0 %v5545_v46  ;;  %1758 = vmatpush1.bf16.msra.mxu1 %v5548_v47 }
  0xb2   :  { %1595 = vmatprep.subr.bf16.mxu0 %v5553_v48  ;;  %1759 = vmatprep.subr.bf16.mxu1 %v5556_v49 }
  0xb5   :  { %1596 = vmatpush1.bf16.msra.mxu0 %v5551_v50  ;;  %1760 = vmatpush1.bf16.msra.mxu1 %v5554_v51 }
  0xb6   :  { %1597 = vmatprep.subr.bf16.mxu0 %v5559_v52  ;;  %1761 = vmatprep.subr.bf16.mxu1 %v5562_v53 }
  0xb9   :  { %1598 = vmatpush1.bf16.msra.mxu0 %v5557_v54  ;;  %1762 = vmatpush1.bf16.msra.mxu1 %v5560_v55 }
  0xba   :  { %1599 = vmatprep.subr.bf16.mxu0 %v5565_v56  ;;  %1763 = vmatprep.subr.bf16.mxu1 %v5568_v57 }
  0xbd   :  { %1600 = vmatpush1.bf16.msra.mxu0 %v5563_v58  ;;  %1764 = vmatpush1.bf16.msra.mxu1 %v5566_v59 }
  0xbe   :  { %1601 = vmatprep.subr.bf16.mxu0 %v5571_v60  ;;  %1765 = vmatprep.subr.bf16.mxu1 %v5574_v61 }
  0xc1   :  { %1602 = vmatpush1.bf16.msra.mxu0 %v5569_v62  ;;  %1766 = vmatpush1.bf16.msra.mxu1 %v5572_v63 }
  0xc2   :  { %1603 = vmatprep.subr.bf16.mxu0 %v5577_v0  ;;  %1767 = vmatprep.subr.bf16.mxu1 %v5580_v1 }
  0xc5   :  { %1604 = vmatpush1.bf16.msra.mxu0 %v5575_v2  ;;  %1768 = vmatpush1.bf16.msra.mxu1 %v5578_v3 }
  0xc6   :  { %1605 = vmatprep.subr.bf16.mxu0 %v5583_v4  ;;  %1769 = vmatprep.subr.bf16.mxu1 %v5586_v5 }
  0xc9   :  { %1606 = vmatpush1.bf16.msra.mxu0 %v5581_v6  ;;  %1770 = vmatpush1.bf16.msra.mxu1 %v5584_v7 }
  0xca   :  { %1616 = vmatprep.subr.bf16.mxu0 %v5591_v8  ;;  %1780 = vmatprep.subr.bf16.mxu1 %v5594_v9 }
  0xcc   :  { %1608 = vmatmul.mubr.bf16.vlgmr.msra.gmra.mrb[0].mxu0 %v4644_v14  ;;  %1772 = vmatmul.mubr.bf16.vlgmr.msra.gmra.mrb[0].mxu1 %v4644_v14 }
  0xcd   :  { %26 = vsyncpa [#allocation5], 0  ;;  %1617 = vmatpush1.bf16.msra.mxu0 %v5589_v12  ;;  %1781 = vmatpush1.bf16.msra.mxu1 %v5592_v13  ;;  %v5595_v11 = vld [vmem:[%s7780_s20 + $0x620] ss:$16 sps:$4 sm:$0xff]   ;;  %v5598_v18 = vld [vmem:[%s7780_s20 + $0x628] ss:$16 sps:$4 sm:$0xff]   ;;  %v4646_v57 = vcombine.low %v6589_v10, %v6589_v10 }
  0xce   :  { %1618 = vmatprep.subr.bf16.mxu0 %v5597_v15  ;;  %1782 = vmatprep.subr.bf16.mxu1 %v5600_v16  ;;  %v5603_v19 = vld [vmem:[%s7780_s20 + $0x644] ss:$16 sps:$4 sm:$0xff]   ;;  %v5606_v20 = vld [vmem:[%s7780_s20 + $0x64c] ss:$16 sps:$4 sm:$0xff]   ;;  %v5601_v21 = vld [vmem:[%s7780_s20 + $0x640] ss:$16 sps:$4 sm:$0xff]  }
  0xcf   :  { %4876 = vmatprep.mubr.msk.bf16.mxu0 %vm1473_vm0, %v4647_v17  ;;  %4877 = vmatprep.mubr.msk.bf16.mxu1 %vm1473_vm0, %v4647_v17  ;;  %v5604_v22 = vld [vmem:[%s7780_s20 + $0x648] ss:$16 sps:$4 sm:$0xff]   ;;  %v5609_v23 = vld [vmem:[%s7780_s20 + $0x664] ss:$16 sps:$4 sm:$0xff]   ;;  %v5612_v24 = vld [vmem:[%s7780_s20 + $0x66c] ss:$16 sps:$4 sm:$0xff]  }
  0xd0   :  { %v5607_v25 = vld [vmem:[%s7780_s20 + $0x660] ss:$16 sps:$4 sm:$0xff]   ;;  %v5610_v26 = vld [vmem:[%s7780_s20 + $0x668] ss:$16 sps:$4 sm:$0xff]   ;;  %v5615_v27 = vld [vmem:[%s7780_s20 + $0x684] ss:$16 sps:$4 sm:$0xff]  }
  0xd1   :  { %1619 = vmatpush1.bf16.msra.mxu0 %v5595_v11  ;;  %1783 = vmatpush1.bf16.msra.mxu1 %v5598_v18  ;;  %v5618_v28 = vld [vmem:[%s7780_s20 + $0x68c] ss:$16 sps:$4 sm:$0xff]   ;;  %v5613_v29 = vld [vmem:[%s7780_s20 + $0x680] ss:$16 sps:$4 sm:$0xff]   ;;  %v5616_v30 = vld [vmem:[%s7780_s20 + $0x688] ss:$16 sps:$4 sm:$0xff]  }
  0xd2   :  { %1620 = vmatprep.subr.bf16.mxu0 %v5603_v19  ;;  %1784 = vmatprep.subr.bf16.mxu1 %v5606_v20  ;;  %v5621_v31 = vld [vmem:[%s7780_s20 + $0x6a4] ss:$16 sps:$4 sm:$0xff]   ;;  %v5624_v32 = vld [vmem:[%s7780_s20 + $0x6ac] ss:$16 sps:$4 sm:$0xff]   ;;  %v5619_v33 = vld [vmem:[%s7780_s20 + $0x6a0] ss:$16 sps:$4 sm:$0xff]  }
  0xd3   :  { %v5622_v34 = vld [vmem:[%s7780_s20 + $0x6a8] ss:$16 sps:$4 sm:$0xff]   ;;  %vm1477_vm1 = vcmask 1042432   ;;  %v5627_v35 = vld [vmem:[%s7780_s20 + $0x6c4] ss:$16 sps:$4 sm:$0xff]   ;;  %vm1478_vm2 = vcmask 1043456  }
  0xd4   :  { %v5630_v36 = vld [vmem:[%s7780_s20 + $0x6cc] ss:$16 sps:$4 sm:$0xff]   ;;  %v292_v37 = vld [vmem:[%s7780_s20 + $0x700] sm:$0xff]  ;;  %v5876_v39 = vmov 65535   ;;  %v5628_v42 = vld [vmem:[%s7780_s20 + $0x6c8] ss:$16 sps:$4 sm:$0xff]  }
  0xd5   :  { %1621 = vmatpush1.bf16.msra.mxu0 %v5601_v21  ;;  %1785 = vmatpush1.bf16.msra.mxu1 %v5604_v22  ;;  %v293_v38 = vld [vmem:[%s7780_s20 + $0x708] sm:$0xff]  ;;  %v1479_v40 = vsel %vm1477_vm1, 4294967295, %v5876_v39  ;;  %v5625_v41 = vld [vmem:[%s7780_s20 + $0x6c0] ss:$16 sps:$4 sm:$0xff]   ;;  %v5633_v43 = vld [vmem:[%s7780_s20 + $0x6e4] ss:$16 sps:$4 sm:$0xff]   ;;  %v4873_v45 = vcombine.high %v292_v37, %v292_v37  ;;  %v4872_v50 = vcombine.low %v292_v37, %v292_v37 }
  0xd6   :  { %1622 = vmatprep.subr.bf16.mxu0 %v5609_v23  ;;  %1786 = vmatprep.subr.bf16.mxu1 %v5612_v24  ;;  %v5636_v44 = vld [vmem:[%s7780_s20 + $0x6ec] ss:$16 sps:$4 sm:$0xff]   ;;  %v4875_v46 = vcombine.high %v293_v38, %v293_v38  ;;  %v1480_v47 = vsel %vm1478_vm2, %v1479_v40, 0  ;;  %v5631_v48 = vld [vmem:[%s7780_s20 + $0x6e0] ss:$16 sps:$4 sm:$0xff]   ;;  %v4874_v51 = vcombine.low %v293_v38, %v293_v38  ;;  %v5877_v60 = vmov 0  }
  0xd7   :  { %v5634_v49 = vld [vmem:[%s7780_s20 + $0x6e8] ss:$16 sps:$4 sm:$0xff]   ;;  %v1485_v52 = vand.u32 %v4873_v45, %v1480_v47  ;;  %v1482_v54 = vand.u32 %v4872_v50, %v1480_v47  ;;  %v5645_v56 = vld [vmem:[%s7758_s4 + $0x4] ss:$8 sps:$4 sm:$0xff]   ;;  %v5648_v59 = vld [vmem:[%s7758_s4 + $0x14] ss:$8 sps:$4 sm:$0xff]  }
  0xd8   :  { %v1491_v53 = vand.u32 %v4875_v46, %v1480_v47  ;;  %v1488_v55 = vand.u32 %v4874_v51, %v1480_v47  ;;  %v5643_v58 = vld [vmem:[%s7758_s4] ss:$8 sps:$4 sm:$0xff]   ;;  %v5646_v61 = vld [vmem:[%s7758_s4 + $0x10] ss:$8 sps:$4 sm:$0xff]   ;;  %v5651_v62 = vld [vmem:[%s7758_s4 + $0x24] ss:$8 sps:$4 sm:$0xff]  }
  0xd9   :  { %1623 = vmatpush1.bf16.msra.mxu0 %v5607_v25  ;;  %1787 = vmatpush1.bf16.msra.mxu1 %v5610_v26  ;;  %v5649_v63 = vld [vmem:[%s7758_s4 + $0x20] ss:$8 sps:$4 sm:$0xff]   ;;  %v5654_v0 = vld [vmem:[%s7758_s4 + $0x34] ss:$8 sps:$4 sm:$0xff]   ;;  %v5652_v1 = vld [vmem:[%s7758_s4 + $0x30] ss:$8 sps:$4 sm:$0xff]  }
  0xda   :  { %1624 = vmatprep.subr.bf16.mxu0 %v5615_v27  ;;  %1788 = vmatprep.subr.bf16.mxu1 %v5618_v28  ;;  %v5657_v2 = vld [vmem:[%s7758_s4 + $0x44] ss:$8 sps:$4 sm:$0xff]   ;;  %v5655_v3 = vld [vmem:[%s7758_s4 + $0x40] ss:$8 sps:$4 sm:$0xff]   ;;  %v5660_v4 = vld [vmem:[%s7758_s4 + $0x54] ss:$8 sps:$4 sm:$0xff]  }
  0xdb   :  { %v5658_v5 = vld [vmem:[%s7758_s4 + $0x50] ss:$8 sps:$4 sm:$0xff]   ;;  %v5663_v6 = vld [vmem:[%s7758_s4 + $0x64] ss:$8 sps:$4 sm:$0xff]   ;;  %v5661_v7 = vld [vmem:[%s7758_s4 + $0x60] ss:$8 sps:$4 sm:$0xff]  }
  0xdc   :  { %v5666_v8 = vld [vmem:[%s7758_s4 + $0x74] ss:$8 sps:$4 sm:$0xff]   ;;  %v5664_v9 = vld [vmem:[%s7758_s4 + $0x70] ss:$8 sps:$4 sm:$0xff]   ;;  %v5669_v10 = vld [vmem:[%s7758_s4 + $0x84] ss:$8 sps:$4 sm:$0xff]  }
  0xdd   :  { %1625 = vmatpush1.bf16.msra.mxu0 %v5613_v29  ;;  %1789 = vmatpush1.bf16.msra.mxu1 %v5616_v30  ;;  %v5667_v12 = vld [vmem:[%s7758_s4 + $0x80] ss:$8 sps:$4 sm:$0xff]   ;;  %v5672_v13 = vld [vmem:[%s7758_s4 + $0x94] ss:$8 sps:$4 sm:$0xff]   ;;  %v5670_v14 = vld [vmem:[%s7758_s4 + $0x90] ss:$8 sps:$4 sm:$0xff]   ;;  %v296_v30 = vlaneseq }
  0xde   :  { %1626 = vmatprep.subr.bf16.mxu0 %v5621_v31  ;;  %1790 = vmatprep.subr.bf16.mxu1 %v5624_v32  ;;  %v5675_v15 = vld [vmem:[%s7758_s4 + $0xa4] ss:$8 sps:$4 sm:$0xff]   ;;  %v5673_v16 = vld [vmem:[%s7758_s4 + $0xa0] ss:$8 sps:$4 sm:$0xff]   ;;  %v5678_v17 = vld [vmem:[%s7758_s4 + $0xb4] ss:$8 sps:$4 sm:$0xff]  }
  0xdf   :  { %v5676_v11 = vld [vmem:[%s7758_s4 + $0xb0] ss:$8 sps:$4 sm:$0xff]   ;;  %v5681_v18 = vld [vmem:[%s7758_s4 + $0xc4] ss:$8 sps:$4 sm:$0xff]   ;;  %v5679_v19 = vld [vmem:[%s7758_s4 + $0xc0] ss:$8 sps:$4 sm:$0xff]  }
  0xe0   :  { %v5684_v20 = vld [vmem:[%s7758_s4 + $0xd4] ss:$8 sps:$4 sm:$0xff]   ;;  %v5682_v21 = vld [vmem:[%s7758_s4 + $0xd0] ss:$8 sps:$4 sm:$0xff]   ;;  %v5687_v22 = vld [vmem:[%s7758_s4 + $0xe4] ss:$8 sps:$4 sm:$0xff]  }
  0xe1   :  { %1627 = vmatpush1.bf16.msra.mxu0 %v5619_v33  ;;  %1791 = vmatpush1.bf16.msra.mxu1 %v5622_v34  ;;  %v5685_v23 = vld [vmem:[%s7758_s4 + $0xe0] ss:$8 sps:$4 sm:$0xff]   ;;  %v5690_v24 = vld [vmem:[%s7758_s4 + $0xf4] ss:$8 sps:$4 sm:$0xff]   ;;  %v5688_v25 = vld [vmem:[%s7758_s4 + $0xf0] ss:$8 sps:$4 sm:$0xff]  }
  0xe2   :  { %1628 = vmatprep.subr.bf16.mxu0 %v5627_v35  ;;  %1792 = vmatprep.subr.bf16.mxu1 %v5630_v36  ;;  %v5693_v26 = vld [vmem:[%s7758_s4 + $0x104] ss:$8 sps:$4 sm:$0xff]   ;;  %v5719_v29 = vld [vmem:[%s7760_s6 + $0x10] sm:$0xff]   ;;  %v6807_v31 = vshrl.u32 %v296_v30, 7  ;;  %s7782_s24 = sld [smem:[#allocation11_spill]]  ;;  %vm2151_vm3 = vcmask 23552  }
  0xe3   :  { %v5717_v27 = vld [vmem:[%s7760_s6] sm:$0xff]   ;;  %v5718_v28 = vld [vmem:[%s7760_s6 + $0x8] sm:$0xff]   ;;  %vm2155_vm4 = vcmask 1040384   ;;  %vm2156_vm5 = vcmask 1041408   ;;  %vm2334_vm6 = vcmask 7168   ;;  %vm5879_vm7 = vmmov 0  }
  0xe4   :  { %v6810_v32 = vsub.s32 0, %v6807_v31  ;;  %v6816_v34 = vsub.s32 1, %v6807_v31  ;;  %v6819_v35 = vsub.s32 3, %v6807_v31  ;;  %s7783_s28 = sld [smem:[#allocation9_spill]]  ;;  %s5880_s29 = smov 16   ;;  %vm2416_vm8 = vcmask 326656  }
  0xe5   :  { %1629 = vmatpush1.bf16.msra.mxu0 %v5625_v41  ;;  %1793 = vmatpush1.bf16.msra.mxu1 %v5628_v42  ;;  %s5881_s22 = smov 112   ;;  %vm2493_vm9 = vcmask 130048   ;;  %vm4610_vm10 = vcmask 392448  }
  0xe6   :  { %1630 = vmatprep.subr.bf16.mxu0 %v5633_v43  ;;  %1794 = vmatprep.subr.bf16.mxu1 %v5636_v44 }
  0xe8   :  { %v294_v33 = vld [vmem:[%s7782_s24] sm:$0xf] }
  0xe9   :  { %1631 = vmatpush1.bf16.msra.mxu0 %v5631_v48  ;;  %1795 = vmatpush1.bf16.msra.mxu1 %v5634_v49  ;;  %v299_v36 = vrot.slane %v294_v33, %v6810_v32  ;;  %v303_v37 = vrot.slane %v294_v33, %v6816_v34  ;;  %v311_v38 = vrot.slane %v294_v33, %v6819_v35 }
  0xea   :  { %1632 = vmatprep.subr.bf16.mxu0 %v1485_v52  ;;  %1796 = vmatprep.subr.bf16.mxu1 %v1491_v53 }
  0xed   :  { %1633 = vmatpush1.bf16.msra.mxu0 %v1482_v54  ;;  %1797 = vmatpush1.bf16.msra.mxu1 %v1488_v55 }
  0xee   :  { %2165 = vmatprep.subr.bf16.mxu0 %v5645_v56  ;;  %2343 = vmatprep.subr.bf16.mxu1 %v5877_v60 }
  0xf0   :  { %1649 = vmatmul.mubr.bf16.vlgmr.msra.gmra.mrb[0].mxu0 %v4646_v57  ;;  %1813 = vmatmul.mubr.bf16.vlgmr.msra.gmra.mrb[0].mxu1 %v4646_v57 }
  0xf1   :  { %2166 = vmatpush1.bf16.msra.mxu0 %v5643_v58  ;;  %2344 = vmatpush1.bf16.msra.mxu1 %v5717_v27 }
  0xf2   :  { %2167 = vmatprep.subr.bf16.mxu0 %v5648_v59  ;;  %2345 = vmatprep.subr.bf16.mxu1 %v5877_v60 }
  0xf5   :  { %2168 = vmatpush1.bf16.msra.mxu0 %v5646_v61  ;;  %2346 = vmatpush1.bf16.msra.mxu1 %v5718_v28 }
  0xf6   :  { %2169 = vmatprep.subr.bf16.mxu0 %v5651_v62  ;;  %2347 = vmatprep.subr.bf16.mxu1 %v5877_v60 }
  0xf9   :  { %2170 = vmatpush1.bf16.msra.mxu0 %v5649_v63  ;;  %2348 = vmatpush1.bf16.msra.mxu1 %v5719_v29  ;;  %v5712_v29 = vld [vmem:[%s7758_s4 + $0x170] ss:$8 sps:$4 sm:$0xff]  }
  0xfa   :  { %2171 = vmatprep.subr.bf16.mxu0 %v5654_v0  ;;  %2349 = vmatprep.subr.bf16.mxu1 %v5877_v60 }
  0xfd   :  { %2172 = vmatpush1.bf16.msra.mxu0 %v5652_v1 }
  0xfe   :  { %2173 = vmatprep.subr.bf16.mxu0 %v5657_v2 }
 0x101   :  { %2174 = vmatpush1.bf16.msra.mxu0 %v5655_v3  ;;  %v6825_v3 = vsub.s32 2, %v6807_v31 }
 0x102   :  { %2175 = vmatprep.subr.bf16.mxu0 %v5660_v4 }
 0x105   :  { %2176 = vmatpush1.bf16.msra.mxu0 %v5658_v5  ;;  %v5691_v5 = vld [vmem:[%s7758_s4 + $0x100] ss:$8 sps:$4 sm:$0xff]  }
 0x106   :  { %2177 = vmatprep.subr.bf16.mxu0 %v5663_v6 }
 0x109   :  { %2178 = vmatpush1.bf16.msra.mxu0 %v5661_v7  ;;  %v5696_v7 = vld [vmem:[%s7758_s4 + $0x114] ss:$8 sps:$4 sm:$0xff]  }
 0x10a   :  { %2179 = vmatprep.subr.bf16.mxu0 %v5666_v8 }
 0x10d   :  { %2180 = vmatpush1.bf16.msra.mxu0 %v5664_v9  ;;  %v307_v9 = vrot.slane %v294_v33, %v6825_v3 }
 0x10e   :  { %2181 = vmatprep.subr.bf16.mxu0 %v5669_v10  ;;  %v5694_v10 = vld [vmem:[%s7758_s4 + $0x110] ss:$8 sps:$4 sm:$0xff]  }
 0x111   :  { %2182 = vmatpush1.bf16.msra.mxu0 %v5667_v12  ;;  %v5699_v12 = vld [vmem:[%s7758_s4 + $0x124] ss:$8 sps:$4 sm:$0xff]  }
 0x112   :  { %2183 = vmatprep.subr.bf16.mxu0 %v5672_v13 }
 0x115   :  { %2184 = vmatpush1.bf16.msra.mxu0 %v5670_v14  ;;  %v5697_v14 = vld [vmem:[%s7758_s4 + $0x120] ss:$8 sps:$4 sm:$0xff]  }
 0x116   :  { %2185 = vmatprep.subr.bf16.mxu0 %v5675_v15  ;;  %v5702_v15 = vld [vmem:[%s7758_s4 + $0x134] ss:$8 sps:$4 sm:$0xff]  }
 0x119   :  { %2186 = vmatpush1.bf16.msra.mxu0 %v5673_v16 }
 0x11a   :  { %2187 = vmatprep.subr.bf16.mxu0 %v5678_v17  ;;  %v5700_v17 = vld [vmem:[%s7758_s4 + $0x130] ss:$8 sps:$4 sm:$0xff]  }
 0x11d   :  { %2188 = vmatpush1.bf16.msra.mxu0 %v5676_v11  ;;  %v5705_v11 = vld [vmem:[%s7758_s4 + $0x144] ss:$8 sps:$4 sm:$0xff]  }
 0x11e   :  { %2189 = vmatprep.subr.bf16.mxu0 %v5681_v18  ;;  %v5703_v18 = vld [vmem:[%s7758_s4 + $0x140] ss:$8 sps:$4 sm:$0xff]  }
 0x121   :  { %2190 = vmatpush1.bf16.msra.mxu0 %v5679_v19  ;;  %v5708_v19 = vld [vmem:[%s7758_s4 + $0x154] ss:$8 sps:$4 sm:$0xff]  }
 0x122   :  { %2191 = vmatprep.subr.bf16.mxu0 %v5684_v20  ;;  %v5706_v20 = vld [vmem:[%s7758_s4 + $0x150] ss:$8 sps:$4 sm:$0xff]  }
 0x125   :  { %2192 = vmatpush1.bf16.msra.mxu0 %v5682_v21  ;;  %v5711_v21 = vld [vmem:[%s7758_s4 + $0x164] ss:$8 sps:$4 sm:$0xff]  }
 0x126   :  { %2193 = vmatprep.subr.bf16.mxu0 %v5687_v22  ;;  %v1893_v22 = vld [vmem:[%s7758_s4 + $0x180] sm:$0x33] }
 0x129   :  { %2194 = vmatpush1.bf16.msra.mxu0 %v5685_v23  ;;  %v2157_v23 = vsel %vm2155_vm4, 4294967295, %v5876_v39  ;;  %v4926_v39 = vcombine.low %v1893_v22, %v1893_v22 }
 0x12a   :  { %2195 = vmatprep.subr.bf16.mxu0 %v5690_v24  ;;  %v5709_v24 = vld [vmem:[%s7758_s4 + $0x160] ss:$8 sps:$4 sm:$0xff]   ;;  %v6876_v28 = vsel %vm2156_vm5, %v2157_v23, 0 }
 0x12d   :  { %2196 = vmatpush1.bf16.msra.mxu0 %v5688_v25  ;;  %v5714_v25 = vld [vmem:[%s7758_s4 + $0x174] ss:$8 sps:$4 sm:$0xff]  }
 0x12e   :  { %2206 = vmatprep.subr.bf16.mxu0 %v5693_v26  ;;  %v4927_v26 = vcombine.high %v1893_v22, %v1893_v22 }
 0x130   :  { %v2163_v33 = vand.u32 %v4927_v26, %v6876_v28  ;;  %v5729_v26 = vld [vmem:[%s7764_s10] sm:$0xff]   ;;  %s5882_s10 = smov 32  }
 0x1c3   :  { %v1650_v40 = vpop.f32.mrb[0].mxu0  ;;  %v1814_v41 = vpop.f32.mrb[0].mxu1 }
 0x1c4   :  { %v5228_v42 = vadd.f32 %v1650_v40, %v299_v36  ;;  %v1652_v43 = vpop.f32.mrb[1].mxu0  ;;  %v1816_v44 = vpop.f32.mrb[1].mxu1  ;;  %v5230_v13 = vadd.f32 %v1814_v41, %v307_v9  ;;  %v5720_v41 = vld [vmem:[%s7760_s6 + $0x18] sm:$0xff]   ;;  %v5878_v9 = vmov 0.0  }
 0x1c5   :  { %v5229_v45 = vadd.f32 %v1652_v43, %v303_v37  ;;  %v5231_v46 = vadd.f32 %v1816_v44, %v311_v38  ;;  %v1654_v47 = vpop.f32.mrb[2].mxu0  ;;  %v1818_v48 = vpop.f32.mrb[2].mxu1  ;;  %v2160_v37 = vand.u32 %v4926_v39, %v6876_v28  ;;  %2350 = vmatpush1.bf16.msra.mxu1 %v5720_v41  ;;  %v5722_v43 = vld [vmem:[%s7760_s6 + $0x28] sm:$0xff]   ;;  %v5723_v44 = vld [vmem:[%s7760_s6 + $0x30] sm:$0xff]  }
 0x1c6   :  { %v1825_v49 = vmul.f32 0.70710677, %v5228_v42  ;;  %v1655_v52 = vpop.f32.mrb[3].mxu0  ;;  %v1819_v53 = vpop.f32.mrb[3].mxu1  ;;  %v1821_v57 = vmul.f32 0.5, %v5228_v42  ;;  %v1823_v36 = vmul.f32 0.5, %v5230_v13  ;;  %2351 = vmatprep.subr.bf16.mxu1 %v5877_v60 }
 0x1c7   :  { %v1826_v50 = vmul.f32 0.70710677, %v5229_v45  ;;  %v1828_v51 = vmul.f32 0.70710677, %v5231_v46  ;;  %v1822_v59 = vmul.f32 0.5, %v5229_v45  ;;  %v1824_v63 = vmul.f32 0.5, %v5231_v46 }
 0x1c8   :  { %5798 = verf.f32 %v1825_v49  ;;  %v1827_v16 = vmul.f32 0.70710677, %v5230_v13  ;;  %v5721_v42 = vld [vmem:[%s7760_s6 + $0x20] sm:$0xff]   ;;  %v5724_v45 = vld [vmem:[%s7760_s6 + $0x38] sm:$0xff]   ;;  %v6904_v46 = vsel %vm2155_vm4, 65535, %v5877_v60 }
 0x1c9   :  { %5800 = verf.f32 %v1826_v50  ;;  %2352 = vmatpush1.bf16.msra.mxu1 %v5721_v42  ;;  %v5725_v47 = vld [vmem:[%s7760_s6 + $0x40] ss:$0 sps:$4 sm:$0x11]  }
 0x1ca   :  { %5802 = verf.f32 %v1828_v51  ;;  %2353 = vmatprep.subr.bf16.mxu1 %v5877_v60  ;;  %v2341_v48 = vand.u32 %v5725_v47, %v6904_v46  ;;  %v1894_v49 = vld [vmem:[%s7759_s5] sm:$0x3]  ;;  %v5732_v47 = vld [vmem:[%s7766_s12 + $0x4] ss:$8 sps:$4 sm:$0xff]  }
 0x1cb   :  { %5804 = verf.f32 %v1827_v16  ;;  %v1899_v50 = vrot.slane %v1894_v49, %v6810_v32  ;;  %v1903_v51 = vrot.slane %v1894_v49, %v6816_v34  ;;  %v5735_v49 = vld [vmem:[%s7766_s12 + $0x14] ss:$8 sps:$4 sm:$0xff]  }
 0x1cd   :  { %2354 = vmatpush1.bf16.msra.mxu1 %v5722_v43 }
 0x1ce   :  { %2355 = vmatprep.subr.bf16.mxu1 %v5877_v60 }
 0x1d1   :  { %2356 = vmatpush1.bf16.msra.mxu1 %v5723_v44 }
 0x1d2   :  { %v5799_v54 = vpop.eup %5798  ;;  %2357 = vmatprep.subr.bf16.mxu1 %v5877_v60 }
 0x1d3   :  { %v1833_v55 = vadd.f32 1.0, %v5799_v54  ;;  %v5801_v56 = vpop.eup %5800 }
 0x1d4   :  { %v5803_v58 = vpop.eup %5802  ;;  %v1834_v61 = vadd.f32 1.0, %v5801_v56 }
 0x1d5   :  { %v1837_v62 = vmul.f32 %v1833_v55, %v1821_v57  ;;  %v1836_v0 = vadd.f32 1.0, %v5803_v58  ;;  %v5805_v27 = vpop.eup %5804  ;;  %2358 = vmatpush1.bf16.msra.mxu1 %v5724_v45 }
 0x1d6   :  { %v1838_v1 = vmul.f32 %v1834_v61, %v1822_v59  ;;  %v1835_v30 = vadd.f32 1.0, %v5805_v27  ;;  %2359 = vmatprep.subr.bf16.mxu1 %v5877_v60  ;;  %v4940_v27 = vld [vmem:[%s7763_s9] ss:$0 sm:$0xff] }
 0x1d7   :  { %v1840_v2 = vmul.f32 %v1836_v0, %v1824_v63  ;;  %v1841_v6 = vpack.c.bf16 %v1837_v62, %v1837_v62 }
 0x1d8   :  { %v1842_v4 = vpack.c.bf16 %v1838_v1, %v1838_v1  ;;  %v1839_v38 = vmul.f32 %v1835_v30, %v1823_v36 }
 0x1d9   :  { %v1844_v8 = vpack.c.bf16 %v1840_v2, %v1840_v2  ;;  %2360 = vmatpush1.bf16.msra.mxu1 %v2341_v48  ;;  %v5730_v48 = vld [vmem:[%s7766_s12] ss:$8 sps:$4 sm:$0xff]  }
 0x1da   :  { %2197 = vmatprep.mubr.bf16.mxu0 %v1842_v4  ;;  %v1843_v40 = vpack.c.bf16 %v1839_v38, %v1839_v38  ;;  %5212 = vmatprep.subr.bf16.mxu1 %v5878_v9 }
 0x1db   :  { %2198 = vmatmul.mubr.bf16.vlgmr.msra.gmra.mrb[4].mxu0 %v1841_v6 }
 0x1dc   :  { %2207 = vmatpush1.bf16.msra.mxu0 %v5691_v5  ;;  %4928 = vmatprep.mubr.msk.bf16.mxu0 %vm2151_vm3, %v1844_v8  ;;  %v5726_v8 = vld [vmem:[%s7762_s8] sm:$0xff]  }
 0x1dd   :  { %2208 = vmatprep.subr.bf16.mxu0 %v5696_v7 }
 0x1e0   :  { %2209 = vmatpush1.bf16.msra.mxu0 %v5694_v10  ;;  %v5727_v10 = vld [vmem:[%s7762_s8 + $0x8] sm:$0xff]  }
 0x1e1   :  { %2210 = vmatprep.subr.bf16.mxu0 %v5699_v12  ;;  %v5728_v12 = vld [vmem:[%s7762_s8 + $0x10] ss:$0 sps:$4 sm:$0xff]  }
 0x1e2   :  { %v2421_v13 = vsel %vm1478_vm2, %v5728_v12, 0  ;;  %v5738_v12 = vld [vmem:[%s7768_s14] ss:$16 sps:$4 sm:$0xff]  }
 0x1e4   :  { %2211 = vmatpush1.bf16.msra.mxu0 %v5697_v14  ;;  %v2466_v14 = vld [vmem:[%s7783_s28] sm:$0xff] }
 0x1e5   :  { %2212 = vmatprep.subr.bf16.mxu0 %v5702_v15  ;;  %2468 = vrot.lane.b32.xlu0 %v2466_v14, %s5880_s29  ;;  %v4929_v15 = vld [vmem:[%s7761_s7] ss:$0 sm:$0xff]  ;;  %v5746_v14 = vld [vmem:[%s7768_s14 + $0x24] ss:$16 sps:$4 sm:$0xff]  }
 0x1e8   :  { %2213 = vmatpush1.bf16.msra.mxu0 %v5700_v17 }
 0x1e9   :  { %2214 = vmatprep.subr.bf16.mxu0 %v5705_v11 }
 0x1ec   :  { %2215 = vmatpush1.bf16.msra.mxu0 %v5703_v18 }
 0x1ed   :  { %2216 = vmatprep.subr.bf16.mxu0 %v5708_v19 }
 0x1f0   :  { %2217 = vmatpush1.bf16.msra.mxu0 %v5706_v20 }
 0x1f1   :  { %2218 = vmatprep.subr.bf16.mxu0 %v5711_v21 }
 0x1f4   :  { %2219 = vmatpush1.bf16.msra.mxu0 %v5709_v24 }
 0x1f5   :  { %2220 = vmatprep.subr.bf16.mxu0 %v5714_v25 }
 0x1f8   :  { %2221 = vmatpush1.bf16.msra.mxu0 %v5712_v29 }
 0x1f9   :  { %2222 = vmatprep.subr.bf16.mxu0 %v2163_v33 }
 0x1fc   :  { %2223 = vmatpush1.bf16.msra.mxu0 %v2160_v37 }
 0x1ff   :  { %2239 = vmatmul.mubr.bf16.vlgmr.msra.gmra.mrb[4].mxu0 %v1843_v40 }
 0x257   :  { %v2469_v40 = vpop.permute.xlu0 %2468 }
 0x2d2   :  { %v2240_v52 = vpop.f32.mrb[4].mxu0 }
 0x2d3   :  { %v5232_v53 = vadd.f32 %v2240_v52, %v1899_v50  ;;  %v2242_v54 = vpop.f32.mrb[5].mxu0  ;;  %v5733_v50 = vld [vmem:[%s7766_s12 + $0x10] ss:$8 sps:$4 sm:$0xff]  }
 0x2d4   :  { %v5233_v55 = vadd.f32 %v2242_v54, %v1903_v51  ;;  %v2244_v56 = vpop.f32.mrb[6].mxu0  ;;  %v5740_v54 = vld [vmem:[%s7768_s14 + $0x4] ss:$16 sps:$4 sm:$0xff]  }
 0x2d5   :  { %v2249_v57 = vmul.f32 0.70710677, %v5232_v53  ;;  %v2245_v58 = vpop.f32.mrb[7].mxu0  ;;  %v2247_v63 = vmul.f32 0.5, %v5232_v53  ;;  %v5743_v56 = vld [vmem:[%s7768_s14 + $0xc] ss:$16 sps:$4 sm:$0xff]  }
 0x2d6   :  { %v2250_v59 = vmul.f32 0.70710677, %v5233_v55  ;;  %v2248_v1 = vmul.f32 0.5, %v5233_v55  ;;  %v5741_v55 = vld [vmem:[%s7768_s14 + $0x8] ss:$16 sps:$4 sm:$0xff]   ;;  %2929 = vmatprep.subr.bf16.mxu0 %v5743_v56 }
 0x2d7   :  { %5806 = verf.f32 %v2249_v57  ;;  %v5749_v57 = vld [vmem:[%s7768_s14 + $0x2c] ss:$16 sps:$4 sm:$0xff]   ;;  %2930 = vmatpush1.bf16.msra.mxu0 %v5741_v55  ;;  %v5747_v58 = vld [vmem:[%s7768_s14 + $0x28] ss:$16 sps:$4 sm:$0xff]  }
 0x2d8   :  { %5808 = verf.f32 %v2250_v59  ;;  %2931 = vmatprep.subr.bf16.mxu0 %v5749_v57  ;;  %v5755_v59 = vld [vmem:[%s7768_s14 + $0x4c] ss:$16 sps:$4 sm:$0xff]  }
 0x2db   :  { %2932 = vmatpush1.bf16.msra.mxu0 %v5747_v58 }
 0x2dc   :  { %2933 = vmatprep.subr.bf16.mxu0 %v5755_v59  ;;  %v2548_v59 = vld [vmem:[%s7767_s13] sm:$0x3] }
 0x2e1   :  { %v5807_v61 = vpop.eup %5806 }
 0x2e2   :  { %v5809_v62 = vpop.eup %5808  ;;  %v2253_v0 = vadd.f32 1.0, %v5807_v61 }
 0x2e3   :  { %v2254_v2 = vadd.f32 1.0, %v5809_v62  ;;  %v5753_v62 = vld [vmem:[%s7768_s14 + $0x48] ss:$16 sps:$4 sm:$0xff]  }
 0x2e4   :  { %v2255_v4 = vmul.f32 %v2253_v0, %v2247_v63  ;;  %2934 = vmatpush1.bf16.msra.mxu0 %v5753_v62  ;;  %v4945_v63 = vld [vmem:[%s7765_s11] ss:$0 sm:$0xff]  ;;  %v2557_v62 = vrot.slane %v2548_v59, %v6816_v34 }
 0x2e5   :  { %v2256_v5 = vmul.f32 %v2254_v2, %v2248_v1 }
 0x2e6   :  { %v2257_v7 = vpack.c.bf16 %v2255_v4, %v2255_v4 }
 0x2e7   :  { %v2258_v6 = vpack.c.bf16 %v2256_v5, %v2256_v5 }
 0x2e9   :  { %4939 = vmatprep.mubr.msk.bf16.mxu1 %vm2334_vm6, %v2258_v6 }
 0x2ea   :  { %2376 = vmatmul.mubr.bf16.vlgmr.msra.gmra.mrb[4].mxu1 %v2257_v7 }
 0x2eb   :  { %5213 = vmatpush3.bf16.msra.mxu1 %v5726_v8  ;;  %5218 = vmatprep.mubr.msk.bf16.mxu1 %vm5879_vm7, %v5878_v9 }
 0x2ec   :  { %5214 = vmatprep.subr.bf16.mxu1 %v5878_v9 }
 0x2ef   :  { %5215 = vmatpush3.bf16.msra.mxu1 %v5727_v10 }
 0x2f0   :  { %5216 = vmatprep.subr.bf16.mxu1 %v5878_v9 }
 0x2f3   :  { %5217 = vmatpush3.bf16.msra.mxu1 %v2421_v13 }
 0x2f4   :  { %5222 = vmatprep.subr.bf16.mxu1 %v5878_v9 }
 0x3bd   :  { %v2377_v16 = vpop.f32.mrb[4].mxu1 }
 0x3be   :  { %v2378_v17 = vadd.f32 %v4929_v15, %v2377_v16  ;;  %v2379_v11 = vpop.f32.mrb[5].mxu1  ;;  %v5744_v15 = vld [vmem:[%s7768_s14 + $0x20] ss:$16 sps:$4 sm:$0xff]   ;;  %v5752_v16 = vld [vmem:[%s7768_s14 + $0x44] ss:$16 sps:$4 sm:$0xff]  }
 0x3bf   :  { %v2380_v18 = vpop.f32.mrb[6].mxu1  ;;  %v5758_v11 = vld [vmem:[%s7768_s14 + $0x64] ss:$16 sps:$4 sm:$0xff]  }
 0x3c0   :  { %v2384_v19 = vmul.f32 0.70710677, %v2378_v17  ;;  %v2381_v20 = vpop.f32.mrb[7].mxu1  ;;  %v2383_v22 = vmul.f32 0.5, %v2378_v17  ;;  %v5750_v17 = vld [vmem:[%s7768_s14 + $0x40] ss:$16 sps:$4 sm:$0xff]  }
 0x3c1   :  { %v5761_v18 = vld [vmem:[%s7768_s14 + $0x6c] ss:$16 sps:$4 sm:$0xff]   ;;  %v5759_v20 = vld [vmem:[%s7768_s14 + $0x68] ss:$16 sps:$4 sm:$0xff]  }
 0x3c2   :  { %5810 = verf.f32 %v2384_v19  ;;  %v5756_v19 = vld [vmem:[%s7768_s14 + $0x60] ss:$16 sps:$4 sm:$0xff]   ;;  %2935 = vmatprep.subr.bf16.mxu0 %v5761_v18  ;;  %v3003_v18 = vld [vmem:[%s7770_s16 + $0x48] sm:$0xff] }
 0x3c3   :  { %2936 = vmatpush1.bf16.msra.mxu0 %v5759_v20 }
 0x3cc   :  { %v5811_v21 = vpop.eup %5810 }
 0x3cd   :  { %v2386_v23 = vadd.f32 1.0, %v5811_v21  ;;  %v5764_v21 = vld [vmem:[%s7768_s14 + $0x84] ss:$16 sps:$4 sm:$0xff]  }
 0x3cf   :  { %v2387_v24 = vmul.f32 %v2386_v23, %v2383_v22  ;;  %v5767_v22 = vld [vmem:[%s7768_s14 + $0x8c] ss:$16 sps:$4 sm:$0xff]   ;;  %v5762_v23 = vld [vmem:[%s7768_s14 + $0x80] ss:$16 sps:$4 sm:$0xff]  }
 0x3d0   :  { %2937 = vmatprep.subr.bf16.mxu0 %v5767_v22 }
 0x3d1   :  { %v2388_v25 = vpack.c.bf16 %v2387_v24, %v2387_v24  ;;  %v5765_v24 = vld [vmem:[%s7768_s14 + $0x88] ss:$16 sps:$4 sm:$0xff]  }
 0x3d2   :  { %2938 = vmatpush1.bf16.msra.mxu0 %v5765_v24  ;;  %v3010_v24 = vld [vmem:[%s7770_s16 + $0x80] sm:$0xff] }
 0x3d3   :  { %5219 = vmatmul.mubr.msk.bf16.vlgmr.msra.gmra.mrb[8].mxu1 %vm2416_vm8, %v2388_v25  ;;  %v5770_v25 = vld [vmem:[%s7768_s14 + $0xa4] ss:$16 sps:$4 sm:$0xff]  }
 0x3d4   :  { %5224 = vmatprep.mubr.msk.bf16.mxu1 %vm5879_vm7, %v5878_v9  ;;  %5223 = vmatpush3.bf16.msra.mxu1 %v5729_v26  ;;  %v5773_v26 = vld [vmem:[%s7768_s14 + $0xac] ss:$16 sps:$4 sm:$0xff]  }
 0x3d5   :  { %2594 = vmatprep.subr.bf16.mxu1 %v5732_v47  ;;  %2939 = vmatprep.subr.bf16.mxu0 %v5773_v26  ;;  %v3011_v26 = vld [vmem:[%s7770_s16 + $0x88] sm:$0xff] }
 0x4a6   :  { %v2457_v29 = vpop.f32.mrb[8].mxu1 }
 0x4a7   :  { %v2458_v39 = vadd.f32 %v4940_v27, %v2457_v29  ;;  %v5220_v30 = vpop.f32.mrb[9].mxu1  ;;  %v5768_v27 = vld [vmem:[%s7768_s14 + $0xa0] ss:$16 sps:$4 sm:$0xff]   ;;  %v5771_v29 = vld [vmem:[%s7768_s14 + $0xa8] ss:$16 sps:$4 sm:$0xff]  }
 0x4a8   :  { %v2460_v33 = vpop.f32.mrb[10].mxu1  ;;  %2940 = vmatpush1.bf16.msra.mxu0 %v5771_v29  ;;  %v5779_v30 = vld [vmem:[%s7768_s14 + $0xcc] ss:$16 sps:$4 sm:$0xff]  }
 0x4a9   :  { %v2463_v36 = vmul.f32 0.5, %v2458_v39  ;;  %4605 = vst [vmem:[#allocation4] sm:$0xff] %v2458_v39  ;;  %v5221_v37 = vpop.f32.mrb[11].mxu1  ;;  %v5774_v33 = vld [vmem:[%s7768_s14 + $0xc0] ss:$16 sps:$4 sm:$0xff]   ;;  %2941 = vmatprep.subr.bf16.mxu0 %v5779_v30 }
 0x4aa   :  { %v5782_v37 = vld [vmem:[%s7768_s14 + $0xe4] ss:$16 sps:$4 sm:$0xff]  }
 0x4ab   :  { %v2464_v38 = vmul.f32 1.442695, %v2463_v36  ;;  %v5777_v36 = vld [vmem:[%s7768_s14 + $0xc8] ss:$16 sps:$4 sm:$0xff]  }
 0x4ac   :  { %2942 = vmatpush1.bf16.msra.mxu0 %v5777_v36  ;;  %v3018_v36 = vld [vmem:[%s7770_s16 + $0xc0] sm:$0xff] }
 0x4ad   :  { %5812 = vpow2.f32 %v2464_v38  ;;  %v5785_v38 = vld [vmem:[%s7768_s14 + $0xec] ss:$16 sps:$4 sm:$0xff]  }
 0x4ae   :  { %2943 = vmatprep.subr.bf16.mxu0 %v5785_v38  ;;  %v3019_v38 = vld [vmem:[%s7770_s16 + $0xc8] sm:$0xff] }
 0x4b7   :  { %v5813_v41 = vpop.eup %5812 }
 0x4b8   :  { %v2471_v42 = vmul.f32 %v5813_v41, %v2469_v40  ;;  %v5780_v40 = vld [vmem:[%s7768_s14 + $0xe0] ss:$16 sps:$4 sm:$0xff]   ;;  %v5783_v41 = vld [vmem:[%s7768_s14 + $0xe8] ss:$16 sps:$4 sm:$0xff]  }
 0x4b9   :  { %2944 = vmatpush1.bf16.msra.mxu0 %v5783_v41 }
 0x4ba   :  { %2473 = vrot.lane.b32.xlu0 %v2471_v42, %s5881_s22  ;;  %v2679_v42 = vld [vmem:[%s7768_s14 + $0x100] sm:$0x11] }
 0x52c   :  { %v2474_v43 = vpop.permute.xlu0 %2473 }
 0x52d   :  { %v2476_v44 = vadd.f32 %v2474_v43, %v2458_v39  ;;  %v5776_v39 = vld [vmem:[%s7768_s14 + $0xc4] ss:$16 sps:$4 sm:$0xff]   ;;  %v4989_v43 = vcombine.high %v2679_v42, %v2679_v42 }
 0x52f   :  { %v2477_v45 = vpack.c.bf16 %v2476_v44, %v2476_v44  ;;  %4607 = vrot.lane.b32.xlu1 %v2476_v44, %s5882_s10  ;;  %v2680_v44 = vld [vmem:[%s7768_s14 + $0x108] sm:$0x11] }
 0x530   :  { %v4990_v47 = vcombine.low %v2680_v44, %v2680_v44 }
 0x531   :  { %5225 = vmatmul.mubr.msk.bf16.vlgmr.msra.gmra.mrb[12].mxu1 %vm2493_vm9, %v2477_v45  ;;  %v4988_v45 = vcombine.low %v2679_v42, %v2679_v42 }
 0x532   :  { %2626 = vmatprep.mubr.bf16.mxu1 %v5877_v60  ;;  %2595 = vmatpush1.bf16.msra.mxu1 %v5730_v48  ;;  %v2547_v60 = vld [vmem:[%s7766_s12 + $0x20] sm:$0xff]  ;;  %v4991_v48 = vcombine.high %v2680_v44, %v2680_v44 }
 0x533   :  { %2596 = vmatprep.subr.bf16.mxu1 %v5735_v49  ;;  %v4953_v51 = vcombine.high %v2547_v60, %v2547_v60  ;;  %v4952_v52 = vcombine.low %v2547_v60, %v2547_v60  ;;  %v2880_v49 = vand.u32 %v4989_v43, %v6904_v46  ;;  %v2877_v60 = vand.u32 %v4988_v45, %v6904_v46  ;;  %v3026_v45 = vld [vmem:[%s7770_s16 + $0x100] sm:$0xff] }
 0x535   :  { %v2589_v53 = vsel %vm1478_vm2, %v4952_v52, 0  ;;  %v2994_v52 = vld [vmem:[%s7770_s16] sm:$0xff] }
 0x536   :  { %2597 = vmatpush1.bf16.msra.mxu1 %v5733_v50  ;;  %v2886_v50 = vand.u32 %v4991_v48, %v6904_v46  ;;  %v3027_v48 = vld [vmem:[%s7770_s16 + $0x108] sm:$0xff] }
 0x537   :  { %4954 = vmatprep.subr.msk.bf16.mxu1 %vm1478_vm2, %v4953_v51  ;;  %v2883_v51 = vand.u32 %v4990_v47, %v6904_v46  ;;  %v2999_v46 = vld [vmem:[%s7770_s16 + $0x28] sm:$0xff]  ;;  %v3030_v47 = vld [vmem:[%s7770_s16 + $0x120] sm:$0xff] }
 0x538   :  { %2945 = vmatprep.subr.bf16.mxu0 %v2886_v50 }
 0x539   :  { %2946 = vmatpush1.bf16.msra.mxu0 %v2883_v51  ;;  %v5027_v51 = vcombine.high %v3026_v45, %v3030_v47 }
 0x53a   :  { %2599 = vmatpush1.bf16.msra.mxu1 %v2589_v53  ;;  %v2998_v53 = vld [vmem:[%s7770_s16 + $0x20] sm:$0xff] }
 0x53b   :  { %2888 = vmatprep.subr.bf16.mxu1 %v5740_v54  ;;  %v2995_v54 = vld [vmem:[%s7770_s16 + $0x8] sm:$0xff]  ;;  %v4994_v55 = vcombine.low %v2994_v52, %v2998_v53  ;;  %v4995_v56 = vcombine.high %v2994_v52, %v2998_v53  ;;  %v3034_v53 = vld [vmem:[%s7770_s16 + $0x140] sm:$0xff] }
 0x53c   :  { %v4996_v57 = vcombine.low %v2995_v54, %v2999_v46  ;;  %v4997_v58 = vcombine.high %v2995_v54, %v2999_v46  ;;  %v3038_v54 = vld [vmem:[%s7770_s16 + $0x160] sm:$0xff]  ;;  %v5026_v46 = vcombine.low %v3026_v45, %v3030_v47 }
 0x53d   :  { %v3082_v45 = vld [vmem:[%s7770_s16 + $0x2c0] sm:$0xff] }
 0x53e   :  { %4321 = vmatprep.subr.bf16.mxu0 %v4997_v58  ;;  %v5035_v58 = vcombine.high %v3034_v53, %v3038_v54  ;;  %v3086_v47 = vld [vmem:[%s7770_s16 + $0x2e0] sm:$0xff] }
 0x5a1   :  { %v4608_v61 = vpop.permute.xlu1 %4607 }
 0x5a2   :  { %4611 = vst.msk [vmem:[#allocation4] sm:$0xff] %vm4610_vm10, %v4608_v61  ;;  %v2553_v61 = vrot.slane %v2548_v59, %v6810_v32 }
 0x604   :  { %v2531_v0 = vpop.f32.mrb[12].mxu1 }
 0x605   :  { %v2532_v1 = vadd.f32 %v4945_v63, %v2531_v0  ;;  %v5226_v2 = vpop.f32.mrb[13].mxu1 }
 0x606   :  { %v2534_v4 = vpop.f32.mrb[14].mxu1 }
 0x607   :  { %v2538_v5 = vmul.f32 0.70710677, %v2532_v1  ;;  %v5227_v6 = vpop.f32.mrb[15].mxu1  ;;  %v2537_v8 = vmul.f32 0.5, %v2532_v1 }
 0x609   :  { %5814 = verf.f32 %v2538_v5 }
 0x613   :  { %v5815_v7 = vpop.eup %5814 }
 0x614   :  { %v2540_v9 = vadd.f32 1.0, %v5815_v7 }
 0x616   :  { %v2541_v10 = vmul.f32 %v2540_v9, %v2537_v8 }
 0x618   :  { %v2542_v13 = vpack.c.bf16 %v2541_v10, %v2541_v10 }
 0x61a   :  { %4955 = vmatmul.mubr.msk.bf16.vlgmr.msra.gmra.mrb[16].mxu1 %vm2416_vm8, %v2542_v13 }
 0x61b   :  { %2889 = vmatpush1.bf16.msra.mxu1 %v5738_v12 }
 0x61c   :  { %2890 = vmatprep.subr.bf16.mxu1 %v5746_v14 }
 0x61f   :  { %2891 = vmatpush1.bf16.msra.mxu1 %v5744_v15 }
 0x620   :  { %2892 = vmatprep.subr.bf16.mxu1 %v5752_v16  ;;  %v3002_v16 = vld [vmem:[%s7770_s16 + $0x40] sm:$0xff] }
 0x623   :  { %2893 = vmatpush1.bf16.msra.mxu1 %v5750_v17 }
 0x624   :  { %2894 = vmatprep.subr.bf16.mxu1 %v5758_v11  ;;  %v3006_v11 = vld [vmem:[%s7770_s16 + $0x60] sm:$0xff] }
 0x625   :  { %v5003_v22 = vcombine.high %v3002_v16, %v3006_v11  ;;  %v5002_v29 = vcombine.low %v3002_v16, %v3006_v11  ;;  %v3062_v16 = vld [vmem:[%s7770_s16 + $0x220] sm:$0xff]  ;;  %v3063_v11 = vld [vmem:[%s7770_s16 + $0x228] sm:$0xff] }
 0x627   :  { %2895 = vmatpush1.bf16.msra.mxu1 %v5756_v19  ;;  %v3007_v19 = vld [vmem:[%s7770_s16 + $0x68] sm:$0xff] }
 0x628   :  { %2896 = vmatprep.subr.bf16.mxu1 %v5764_v21 }
 0x62b   :  { %2897 = vmatpush1.bf16.msra.mxu1 %v5762_v23  ;;  %v5005_v23 = vcombine.high %v3003_v18, %v3007_v19 }
 0x62c   :  { %2898 = vmatprep.subr.bf16.mxu1 %v5770_v25  ;;  %v3014_v25 = vld [vmem:[%s7770_s16 + $0xa0] sm:$0xff] }
 0x62d   :  { %v5011_v30 = vcombine.high %v3010_v24, %v3014_v25  ;;  %v5010_v41 = vcombine.low %v3010_v24, %v3014_v25  ;;  %v3067_v24 = vld [vmem:[%s7770_s16 + $0x248] sm:$0xff] }
 0x62e   :  { %v3071_v25 = vld [vmem:[%s7770_s16 + $0x268] sm:$0xff] }
 0x62f   :  { %2899 = vmatpush1.bf16.msra.mxu1 %v5768_v27  ;;  %v3015_v27 = vld [vmem:[%s7770_s16 + $0xa8] sm:$0xff] }
 0x630   :  { %2900 = vmatprep.subr.bf16.mxu1 %v5776_v39  ;;  %v5004_v39 = vcombine.low %v3003_v18, %v3007_v19  ;;  %v5012_v42 = vcombine.low %v3011_v26, %v3015_v27 }
 0x633   :  { %2901 = vmatpush1.bf16.msra.mxu1 %v5774_v33  ;;  %v5013_v33 = vcombine.high %v3011_v26, %v3015_v27 }
 0x634   :  { %2902 = vmatprep.subr.bf16.mxu1 %v5782_v37  ;;  %v3022_v37 = vld [vmem:[%s7770_s16 + $0xe0] sm:$0xff] }
 0x635   :  { %v5019_v43 = vcombine.high %v3018_v36, %v3022_v37  ;;  %v5018_v50 = vcombine.low %v3018_v36, %v3022_v37  ;;  %v3075_v36 = vld [vmem:[%s7770_s16 + $0x288] sm:$0xff] }
 0x636   :  { %v3079_v37 = vld [vmem:[%s7770_s16 + $0x2a8] sm:$0xff] }
 0x637   :  { %2903 = vmatpush1.bf16.msra.mxu1 %v5780_v40  ;;  %v3023_v40 = vld [vmem:[%s7770_s16 + $0xe8] sm:$0xff] }
 0x638   :  { %2904 = vmatprep.subr.bf16.mxu1 %v2880_v49  ;;  %v5021_v44 = vcombine.high %v3019_v38, %v3023_v40  ;;  %v3031_v49 = vld [vmem:[%s7770_s16 + $0x128] sm:$0xff] }
 0x639   :  { %v5029_v52 = vcombine.high %v3027_v48, %v3031_v49 }
 0x63b   :  { %2905 = vmatpush1.bf16.msra.mxu1 %v2877_v60  ;;  %v5020_v60 = vcombine.low %v3019_v38, %v3023_v40  ;;  %v5068_v40 = vcombine.low %v3067_v24, %v3071_v25 }
 0x63c   :  { %4239 = vmatprep.subr.bf16.mxu1 %v4995_v56  ;;  %v3039_v56 = vld [vmem:[%s7770_s16 + $0x168] sm:$0xff] }
 0x6ed   :  { %v2628_v63 = vpop.f32.mrb[16].mxu1 }
 0x6ee   :  { %v2629_v0 = vadd.f32 %v2628_v63, %v2553_v61  ;;  %v2630_v1 = vpop.f32.mrb[17].mxu1  ;;  %v3042_v61 = vld [vmem:[%s7770_s16 + $0x180] sm:$0xff]  ;;  %v3043_v63 = vld [vmem:[%s7770_s16 + $0x188] sm:$0xff] }
 0x6ef   :  { %v2631_v2 = vadd.f32 %v2630_v1, %v2557_v62  ;;  %v2632_v4 = vpop.f32.mrb[18].mxu1  ;;  %v3046_v62 = vld [vmem:[%s7770_s16 + $0x1a0] sm:$0xff]  ;;  %v5034_v1 = vcombine.low %v3034_v53, %v3038_v54 }
 0x6f0   :  { %v2637_v5 = vmul.f32 0.70710677, %v2629_v0  ;;  %v2633_v6 = vpop.f32.mrb[19].mxu1  ;;  %v2635_v10 = vmul.f32 0.5, %v2629_v0  ;;  %v3047_v0 = vld [vmem:[%s7770_s16 + $0x1a8] sm:$0xff]  ;;  %v5043_v4 = vcombine.high %v3042_v61, %v3046_v62  ;;  %v3090_v53 = vld [vmem:[%s7770_s16 + $0x300] sm:$0xff] }
 0x6f1   :  { %v2638_v7 = vmul.f32 0.70710677, %v2631_v2  ;;  %v2636_v13 = vmul.f32 0.5, %v2631_v2  ;;  %v3050_v6 = vld [vmem:[%s7770_s16 + $0x1c0] sm:$0xff] }
 0x6f2   :  { %5816 = verf.f32 %v2637_v5  ;;  %v5045_v5 = vcombine.high %v3043_v63, %v3047_v0  ;;  %v3094_v54 = vld [vmem:[%s7770_s16 + $0x320] sm:$0xff] }
 0x6f3   :  { %5818 = verf.f32 %v2638_v7  ;;  %v3054_v7 = vld [vmem:[%s7770_s16 + $0x1e0] sm:$0xff] }
 0x6f4   :  { %v5050_v18 = vcombine.low %v3050_v6, %v3054_v7 }
 0x6fc   :  { %v5817_v8 = vpop.eup %5816 }
 0x6fd   :  { %v5819_v9 = vpop.eup %5818  ;;  %v2641_v12 = vadd.f32 1.0, %v5817_v8  ;;  %v3051_v8 = vld [vmem:[%s7770_s16 + $0x1c8] sm:$0xff] }
 0x6fe   :  { %v2642_v14 = vadd.f32 1.0, %v5819_v9  ;;  %v3055_v9 = vld [vmem:[%s7770_s16 + $0x1e8] sm:$0xff] }
 0x6ff   :  { %v2643_v15 = vmul.f32 %v2641_v12, %v2635_v10  ;;  %v5042_v10 = vcombine.low %v3042_v61, %v3046_v62  ;;  %v5044_v12 = vcombine.low %v3043_v63, %v3047_v0  ;;  %v5052_v19 = vcombine.low %v3051_v8, %v3055_v9  ;;  %v3098_v61 = vld [vmem:[%s7770_s16 + $0x340] sm:$0xff]  ;;  %v3099_v63 = vld [vmem:[%s7770_s16 + $0x348] sm:$0xff] }
 0x700   :  { %v2644_v17 = vmul.f32 %v2642_v14, %v2636_v13  ;;  %v5051_v13 = vcombine.high %v3050_v6, %v3054_v7  ;;  %v5053_v14 = vcombine.high %v3051_v8, %v3055_v9  ;;  %v3102_v62 = vld [vmem:[%s7770_s16 + $0x360] sm:$0xff]  ;;  %v3107_v8 = vld [vmem:[%s7770_s16 + $0x388] sm:$0xff] }
 0x701   :  { %v2645_v21 = vpack.c.bf16 %v2643_v15, %v2643_v15  ;;  %v3058_v15 = vld [vmem:[%s7770_s16 + $0x200] sm:$0xff]  ;;  %v5099_v0 = vcombine.high %v3098_v61, %v3102_v62 }
 0x702   :  { %v2646_v20 = vpack.c.bf16 %v2644_v17, %v2644_v17  ;;  %v3059_v17 = vld [vmem:[%s7770_s16 + $0x208] sm:$0xff]  ;;  %v5058_v26 = vcombine.low %v3058_v15, %v3062_v16  ;;  %v3106_v6 = vld [vmem:[%s7770_s16 + $0x380] sm:$0xff] }
 0x703   :  { %v5060_v27 = vcombine.low %v3059_v17, %v3063_v11  ;;  %v3110_v7 = vld [vmem:[%s7770_s16 + $0x3a0] sm:$0xff] }
 0x704   :  { %4992 = vmatprep.mubr.msk.bf16.mxu1 %vm2334_vm6, %v2646_v20  ;;  %4993 = vmatprep.mubr.msk.bf16.mxu0 %vm2334_vm6, %v2646_v20  ;;  %v5059_v20 = vcombine.high %v3058_v15, %v3062_v16  ;;  %v5107_v9 = vcombine.high %v3106_v6, %v3110_v7  ;;  %v3114_v15 = vld [vmem:[%s7770_s16 + $0x3c0] sm:$0xff] }
 0x705   :  { %2921 = vmatmul.mubr.bf16.vlgmr.msra.gmra.mrb[20].mxu1 %v2645_v21  ;;  %2962 = vmatmul.mubr.bf16.vlgmr.msra.gmra.mrb[8].mxu0 %v2645_v21  ;;  %v5061_v21 = vcombine.high %v3059_v17, %v3063_v11  ;;  %v3118_v16 = vld [vmem:[%s7770_s16 + $0x3e0] sm:$0xff]  ;;  %v3115_v17 = vld [vmem:[%s7770_s16 + $0x3c8] sm:$0xff] }
 0x706   :  { %4240 = vmatpush1.bf16.msra.mxu1 %v4994_v55  ;;  %4322 = vmatpush1.bf16.msra.mxu0 %v4996_v57  ;;  %v3035_v55 = vld [vmem:[%s7770_s16 + $0x148] sm:$0xff]  ;;  %v5028_v57 = vcombine.low %v3027_v48, %v3031_v49  ;;  %v5083_v49 = vcombine.high %v3082_v45, %v3086_v47  ;;  %v5115_v11 = vcombine.high %v3114_v15, %v3118_v16 }
 0x707   :  { %4241 = vmatprep.subr.bf16.mxu1 %v5003_v22  ;;  %4323 = vmatprep.subr.bf16.mxu0 %v5005_v23  ;;  %v5037_v59 = vcombine.high %v3035_v55, %v3039_v56  ;;  %v5036_v2 = vcombine.low %v3035_v55, %v3039_v56  ;;  %v3066_v22 = vld [vmem:[%s7770_s16 + $0x240] sm:$0xff]  ;;  %v3083_v48 = vld [vmem:[%s7770_s16 + $0x2c8] sm:$0xff]  ;;  %v5091_v56 = vcombine.high %v3090_v53, %v3094_v54 }
 0x708   :  { %v3070_v23 = vld [vmem:[%s7770_s16 + $0x260] sm:$0xff]  ;;  %v3091_v55 = vld [vmem:[%s7770_s16 + $0x308] sm:$0xff] }
 0x709   :  { %v5066_v38 = vcombine.low %v3066_v22, %v3070_v23 }
 0x70a   :  { %4242 = vmatpush1.bf16.msra.mxu1 %v5002_v29  ;;  %4324 = vmatpush1.bf16.msra.mxu0 %v5004_v39  ;;  %v5067_v29 = vcombine.high %v3066_v22, %v3070_v23  ;;  %v5069_v39 = vcombine.high %v3067_v24, %v3071_v25  ;;  %v3122_v22 = vld [vmem:[%s7770_s16 + $0x400] sm:$0xff]  ;;  %v3123_v24 = vld [vmem:[%s7770_s16 + $0x408] sm:$0xff] }
 0x70b   :  { %4243 = vmatprep.subr.bf16.mxu1 %v5011_v30  ;;  %4325 = vmatprep.subr.bf16.mxu0 %v5013_v33  ;;  %v3074_v30 = vld [vmem:[%s7770_s16 + $0x280] sm:$0xff] }
 0x70c   :  { %v3078_v33 = vld [vmem:[%s7770_s16 + $0x2a0] sm:$0xff] }
 0x70d   :  { %v3126_v23 = vld [vmem:[%s7770_s16 + $0x420] sm:$0xff] }
 0x70e   :  { %4244 = vmatpush1.bf16.msra.mxu1 %v5010_v41  ;;  %4326 = vmatpush1.bf16.msra.mxu0 %v5012_v42  ;;  %v5075_v41 = vcombine.high %v3074_v30, %v3078_v33  ;;  %v5077_v42 = vcombine.high %v3075_v36, %v3079_v37  ;;  %v5123_v25 = vcombine.high %v3122_v22, %v3126_v23 }
 0x70f   :  { %4245 = vmatprep.subr.bf16.mxu1 %v5019_v43  ;;  %4327 = vmatprep.subr.bf16.mxu0 %v5021_v44  ;;  %v5074_v43 = vcombine.low %v3074_v30, %v3078_v33  ;;  %v5076_v44 = vcombine.low %v3075_v36, %v3079_v37  ;;  %v7284_v30 = vld [vmem:[%s7769_s15] sm:$0xf] }
 0x710   :  { %v2686_v33 = vrot.slane %v7284_v30, %v6810_v32  ;;  %v2690_v36 = vrot.slane %v7284_v30, %v6816_v34  ;;  %v2698_v37 = vrot.slane %v7284_v30, %v6819_v35 }
 0x712   :  { %4246 = vmatpush1.bf16.msra.mxu1 %v5018_v50  ;;  %4328 = vmatpush1.bf16.msra.mxu0 %v5020_v60  ;;  %v3087_v50 = vld [vmem:[%s7770_s16 + $0x2e8] sm:$0xff]  ;;  %v5082_v60 = vcombine.low %v3082_v45, %v3086_v47 }
 0x713   :  { %4247 = vmatprep.subr.bf16.mxu1 %v5027_v51  ;;  %4329 = vmatprep.subr.bf16.mxu0 %v5029_v52  ;;  %v5084_v51 = vcombine.low %v3083_v48, %v3087_v50  ;;  %v5085_v52 = vcombine.high %v3083_v48, %v3087_v50 }
 0x716   :  { %4248 = vmatpush1.bf16.msra.mxu1 %v5026_v46  ;;  %4330 = vmatpush1.bf16.msra.mxu0 %v5028_v57  ;;  %v3095_v46 = vld [vmem:[%s7770_s16 + $0x328] sm:$0xff]  ;;  %v5090_v57 = vcombine.low %v3090_v53, %v3094_v54 }
 0x717   :  { %4249 = vmatprep.subr.bf16.mxu1 %v5035_v58  ;;  %4331 = vmatprep.subr.bf16.mxu0 %v5037_v59  ;;  %v5092_v58 = vcombine.low %v3091_v55, %v3095_v46  ;;  %v5093_v59 = vcombine.high %v3091_v55, %v3095_v46 }
 0x71a   :  { %4250 = vmatpush1.bf16.msra.mxu1 %v5034_v1  ;;  %4332 = vmatpush1.bf16.msra.mxu0 %v5036_v2  ;;  %v3103_v1 = vld [vmem:[%s7770_s16 + $0x368] sm:$0xff]  ;;  %v5098_v2 = vcombine.low %v3098_v61, %v3102_v62 }
 0x71b   :  { %4251 = vmatprep.subr.bf16.mxu1 %v5043_v4  ;;  %4333 = vmatprep.subr.bf16.mxu0 %v5045_v5  ;;  %v5100_v4 = vcombine.low %v3099_v63, %v3103_v1  ;;  %v5101_v5 = vcombine.high %v3099_v63, %v3103_v1 }
 0x71e   :  { %4252 = vmatpush1.bf16.msra.mxu1 %v5042_v10  ;;  %4334 = vmatpush1.bf16.msra.mxu0 %v5044_v12  ;;  %v3111_v10 = vld [vmem:[%s7770_s16 + $0x3a8] sm:$0xff]  ;;  %v5106_v12 = vcombine.low %v3106_v6, %v3110_v7 }
 0x71f   :  { %4253 = vmatprep.subr.bf16.mxu1 %v5051_v13  ;;  %4335 = vmatprep.subr.bf16.mxu0 %v5053_v14  ;;  %v5108_v13 = vcombine.low %v3107_v8, %v3111_v10  ;;  %v5109_v14 = vcombine.high %v3107_v8, %v3111_v10  ;;  %v3138_v8 = vld [vmem:[%s7770_s16 + $0x480] sm:$0xff] }
 0x722   :  { %4254 = vmatpush1.bf16.msra.mxu1 %v5050_v18  ;;  %4336 = vmatpush1.bf16.msra.mxu0 %v5052_v19  ;;  %v3119_v18 = vld [vmem:[%s7770_s16 + $0x3e8] sm:$0xff]  ;;  %v5114_v19 = vcombine.low %v3114_v15, %v3118_v16  ;;  %v2694_v16 = vrot.slane %v7284_v30, %v6825_v3  ;;  %v3158_v30 = vld [vmem:[%s7770_s16 + $0x520] sm:$0xff] }
 0x723   :  { %4255 = vmatprep.subr.bf16.mxu1 %v5059_v20  ;;  %4337 = vmatprep.subr.bf16.mxu0 %v5061_v21  ;;  %v5116_v20 = vcombine.low %v3115_v17, %v3119_v18  ;;  %v5117_v21 = vcombine.high %v3115_v17, %v3119_v18 }
 0x726   :  { %4256 = vmatpush1.bf16.msra.mxu1 %v5058_v26  ;;  %4338 = vmatpush1.bf16.msra.mxu0 %v5060_v27  ;;  %v3127_v26 = vld [vmem:[%s7770_s16 + $0x428] sm:$0xff]  ;;  %v5122_v27 = vcombine.low %v3122_v22, %v3126_v23 }
 0x727   :  { %4257 = vmatprep.subr.bf16.mxu1 %v5067_v29  ;;  %4339 = vmatprep.subr.bf16.mxu0 %v5069_v39  ;;  %v5124_v29 = vcombine.low %v3123_v24, %v3127_v26  ;;  %v5125_v39 = vcombine.high %v3123_v24, %v3127_v26  ;;  %v3147_v22 = vld [vmem:[%s7770_s16 + $0x4c8] sm:$0xff] }
 0x728   :  { %v3151_v23 = vld [vmem:[%s7770_s16 + $0x4e8] sm:$0xff] }
 0x72a   :  { %4258 = vmatpush1.bf16.msra.mxu1 %v5066_v38  ;;  %4340 = vmatpush1.bf16.msra.mxu0 %v5068_v40 }
 0x72b   :  { %4259 = vmatprep.subr.bf16.mxu1 %v5075_v41  ;;  %4341 = vmatprep.subr.bf16.mxu0 %v5077_v42 }
 0x72e   :  { %4260 = vmatpush1.bf16.msra.mxu1 %v5074_v43  ;;  %4342 = vmatpush1.bf16.msra.mxu0 %v5076_v44 }
 0x72f   :  { %4261 = vmatprep.subr.bf16.mxu1 %v5083_v49  ;;  %4343 = vmatprep.subr.bf16.mxu0 %v5085_v52 }
 0x732   :  { %4262 = vmatpush1.bf16.msra.mxu1 %v5082_v60  ;;  %4344 = vmatpush1.bf16.msra.mxu0 %v5084_v51 }
 0x733   :  { %4263 = vmatprep.subr.bf16.mxu1 %v5091_v56  ;;  %4345 = vmatprep.subr.bf16.mxu0 %v5093_v59 }
 0x736   :  { %4264 = vmatpush1.bf16.msra.mxu1 %v5090_v57  ;;  %4346 = vmatpush1.bf16.msra.mxu0 %v5092_v58 }
 0x737   :  { %4265 = vmatprep.subr.bf16.mxu1 %v5099_v0  ;;  %4347 = vmatprep.subr.bf16.mxu0 %v5101_v5  ;;  %v3130_v0 = vld [vmem:[%s7770_s16 + $0x440] sm:$0xff]  ;;  %v3135_v5 = vld [vmem:[%s7770_s16 + $0x468] sm:$0xff] }
 0x73a   :  { %4266 = vmatpush1.bf16.msra.mxu1 %v5098_v2  ;;  %4348 = vmatpush1.bf16.msra.mxu0 %v5100_v4  ;;  %v3134_v2 = vld [vmem:[%s7770_s16 + $0x460] sm:$0xff]  ;;  %v3131_v4 = vld [vmem:[%s7770_s16 + $0x448] sm:$0xff] }
 0x73b   :  { %4267 = vmatprep.subr.bf16.mxu1 %v5107_v9  ;;  %4349 = vmatprep.subr.bf16.mxu0 %v5109_v14  ;;  %v5131_v9 = vcombine.high %v3130_v0, %v3134_v2  ;;  %v5133_v10 = vcombine.high %v3131_v4, %v3135_v5  ;;  %v3143_v14 = vld [vmem:[%s7770_s16 + $0x4a8] sm:$0xff]  ;;  %v5130_v17 = vcombine.low %v3130_v0, %v3134_v2 }
 0x73c   :  { %v3187_v0 = vld [vmem:[%s7770_s16 + $0x608] sm:$0x33] }
 0x73e   :  { %4268 = vmatpush1.bf16.msra.mxu1 %v5106_v12  ;;  %4350 = vmatpush1.bf16.msra.mxu0 %v5108_v13  ;;  %v3142_v12 = vld [vmem:[%s7770_s16 + $0x4a0] sm:$0xff]  ;;  %v3139_v13 = vld [vmem:[%s7770_s16 + $0x488] sm:$0xff] }
 0x73f   :  { %4269 = vmatprep.subr.bf16.mxu1 %v5115_v11  ;;  %4351 = vmatprep.subr.bf16.mxu0 %v5117_v21  ;;  %v5132_v11 = vcombine.low %v3131_v4, %v3135_v5  ;;  %v5139_v18 = vcombine.high %v3138_v8, %v3142_v12  ;;  %v3150_v21 = vld [vmem:[%s7770_s16 + $0x4e0] sm:$0xff]  ;;  %v5140_v26 = vcombine.low %v3139_v13, %v3143_v14 }
 0x742   :  { %4270 = vmatpush1.bf16.msra.mxu1 %v5114_v19  ;;  %4352 = vmatpush1.bf16.msra.mxu0 %v5116_v20  ;;  %v5141_v19 = vcombine.high %v3139_v13, %v3143_v14  ;;  %v3146_v20 = vld [vmem:[%s7770_s16 + $0x4c0] sm:$0xff] }
 0x743   :  { %4280 = vmatprep.subr.bf16.mxu1 %v5123_v25  ;;  %4362 = vmatprep.subr.bf16.mxu0 %v5125_v39  ;;  %v5138_v25 = vcombine.low %v3138_v8, %v3142_v12  ;;  %v3154_v39 = vld [vmem:[%s7770_s16 + $0x500] sm:$0xff] }
 0x7d8   :  { %v2922_v38 = vpop.f32.mrb[20].mxu1  ;;  %v2963_v40 = vpop.f32.mrb[8].mxu0 }
 0x7d9   :  { %v2923_v41 = vadd.f32 %v2922_v38, %v2686_v33  ;;  %v2924_v42 = vpop.f32.mrb[21].mxu1  ;;  %v2965_v43 = vpop.f32.mrb[9].mxu0  ;;  %v7344_v24 = vadd.f32 %v2963_v40, %v2694_v16  ;;  %v3155_v33 = vld [vmem:[%s7770_s16 + $0x508] sm:$0xff]  ;;  %v5146_v38 = vcombine.low %v3146_v20, %v3150_v21  ;;  %v5148_v40 = vcombine.low %v3147_v22, %v3151_v23 }
 0x7da   :  { %v2925_v44 = vadd.f32 %v2924_v42, %v2690_v36  ;;  %v2966_v45 = vadd.f32 %v2965_v43, %v2698_v37  ;;  %v2926_v47 = vpop.f32.mrb[22].mxu1  ;;  %v2967_v48 = vpop.f32.mrb[10].mxu0  ;;  %v3159_v36 = vld [vmem:[%s7770_s16 + $0x528] sm:$0xff]  ;;  %v3162_v43 = vld [vmem:[%s7770_s16 + $0x540] sm:$0xff]  ;;  %v5188_v16 = vcombine.low %v3187_v0, %v3187_v0 }
 0x7db   :  { %v2974_v49 = vmul.f32 0.70710677, %v2923_v41  ;;  %v2927_v51 = vpop.f32.mrb[23].mxu1  ;;  %v2968_v52 = vpop.f32.mrb[11].mxu0  ;;  %v2970_v56 = vmul.f32 0.5, %v2923_v41  ;;  %v5155_v41 = vcombine.high %v3154_v39, %v3158_v30  ;;  %v5157_v42 = vcombine.high %v3155_v33, %v3159_v36  ;;  %v3167_v47 = vld [vmem:[%s7770_s16 + $0x568] sm:$0xff] }
 0x7dc   :  { %v2975_v50 = vmul.f32 0.70710677, %v2925_v44  ;;  %v2977_v60 = vmul.f32 0.70710677, %v2966_v45  ;;  %v2971_v57 = vmul.f32 0.5, %v2925_v44  ;;  %v2973_v61 = vmul.f32 0.5, %v2966_v45 }
 0x7dd   :  { %5820 = verf.f32 %v2974_v49  ;;  %v2976_v37 = vmul.f32 0.70710677, %v7344_v24  ;;  %v3166_v44 = vld [vmem:[%s7770_s16 + $0x560] sm:$0xff]  ;;  %v3163_v45 = vld [vmem:[%s7770_s16 + $0x548] sm:$0xff]  ;;  %v5154_v48 = vcombine.low %v3154_v39, %v3158_v30  ;;  %v5156_v49 = vcombine.low %v3155_v33, %v3159_v36  ;;  %v3004_v30 = vld [vmem:[%s7770_s16 + $0x50] sm:$0xff] }
 0x7de   :  { %5822 = verf.f32 %v2975_v50  ;;  %v5163_v50 = vcombine.high %v3162_v43, %v3166_v44  ;;  %v3170_v51 = vld [vmem:[%s7770_s16 + $0x580] sm:$0xff]  ;;  %v3008_v33 = vld [vmem:[%s7770_s16 + $0x70] sm:$0xff]  ;;  %v3009_v36 = vld [vmem:[%s7770_s16 + $0x78] sm:$0xff] }
 0x7df   :  { %5824 = verf.f32 %v2977_v60  ;;  %v5165_v60 = vcombine.high %v3163_v45, %v3167_v47  ;;  %v3174_v52 = vld [vmem:[%s7770_s16 + $0x5a0] sm:$0xff] }
 0x7e0   :  { %5826 = verf.f32 %v2976_v37 }
 0x7e7   :  { %v5821_v53 = vpop.eup %5820 }
 0x7e8   :  { %v2982_v54 = vadd.f32 1.0, %v5821_v53  ;;  %v5823_v55 = vpop.eup %5822  ;;  %v3171_v53 = vld [vmem:[%s7770_s16 + $0x588] sm:$0xff] }
 0x7e9   :  { %v5825_v46 = vpop.eup %5824  ;;  %v2983_v58 = vadd.f32 1.0, %v5823_v55  ;;  %v5162_v55 = vcombine.low %v3162_v43, %v3166_v44  ;;  %v3012_v43 = vld [vmem:[%s7770_s16 + $0x90] sm:$0xff] }
 0x7ea   :  { %v2986_v59 = vmul.f32 %v2982_v54, %v2970_v56  ;;  %v2985_v62 = vadd.f32 1.0, %v5825_v46  ;;  %v3175_v54 = vld [vmem:[%s7770_s16 + $0x5a8] sm:$0xff]  ;;  %v5164_v56 = vcombine.low %v3163_v45, %v3167_v47  ;;  %v5171_v46 = vcombine.high %v3170_v51, %v3174_v52  ;;  %v3016_v44 = vld [vmem:[%s7770_s16 + $0xb0] sm:$0xff]  ;;  %v3013_v45 = vld [vmem:[%s7770_s16 + $0x98] sm:$0xff] }
 0x7eb   :  { %v2987_v63 = vmul.f32 %v2983_v58, %v2971_v57  ;;  %v5173_v57 = vcombine.high %v3171_v53, %v3175_v54  ;;  %v3178_v58 = vld [vmem:[%s7770_s16 + $0x5c0] sm:$0xff]  ;;  %v5172_v2 = vcombine.low %v3171_v53, %v3175_v54  ;;  %v3017_v47 = vld [vmem:[%s7770_s16 + $0xb8] sm:$0xff]  ;;  %v5014_v54 = vcombine.low %v3012_v43, %v3016_v44 }
 0x7ec   :  { %v2989_v1 = vmul.f32 %v2985_v62, %v2973_v61  ;;  %v7306_v7 = vpack.c.bf16 %v2986_v59, %v2986_v59  ;;  %v3182_v59 = vld [vmem:[%s7770_s16 + $0x5e0] sm:$0xff]  ;;  %v3179_v61 = vld [vmem:[%s7770_s16 + $0x5c8] sm:$0xff]  ;;  %v3021_v53 = vld [vmem:[%s7770_s16 + $0xd8] sm:$0xff] }
 0x7ed   :  { %v7304_v6 = vpack.c.bf16 %v2987_v63, %v2987_v63  ;;  %v3183_v62 = vld [vmem:[%s7770_s16 + $0x5e8] sm:$0xff]  ;;  %v3186_v63 = vld [vmem:[%s7770_s16 + $0x600] sm:$0x33]  ;;  %v5179_v4 = vcombine.high %v3178_v58, %v3182_v59  ;;  %v5178_v12 = vcombine.low %v3178_v58, %v3182_v59  ;;  %v3032_v58 = vld [vmem:[%s7770_s16 + $0x130] sm:$0xff] }
 0x7ee   :  { %v7322_v15 = vpack.c.bf16 %v2989_v1, %v2989_v1  ;;  %v5170_v1 = vcombine.low %v3170_v51, %v3174_v52  ;;  %v5181_v5 = vcombine.high %v3179_v61, %v3183_v62  ;;  %v5187_v8 = vcombine.high %v3186_v63, %v3186_v63  ;;  %v3020_v51 = vld [vmem:[%s7770_s16 + $0xd0] sm:$0xff]  ;;  %v3029_v59 = vld [vmem:[%s7770_s16 + $0x118] sm:$0xff] }
 0x7ef   :  { %4271 = vmatprep.mubr.bf16.mxu1 %v7304_v6  ;;  %4353 = vmatprep.mubr.bf16.mxu0 %v7304_v6  ;;  %v5180_v13 = vcombine.low %v3179_v61, %v3183_v62  ;;  %v5186_v14 = vcombine.low %v3186_v63, %v3186_v63  ;;  %v3024_v52 = vld [vmem:[%s7770_s16 + $0xf0] sm:$0xff]  ;;  %v3033_v61 = vld [vmem:[%s7770_s16 + $0x138] sm:$0xff] }
 0x7f0   :  { %4272 = vmatmul.mubr.bf16.vlgmr.msra.gmra.mrb[24].mxu1 %v7306_v7  ;;  %4354 = vmatmul.mubr.bf16.vlgmr.msra.gmra.mrb[12].mxu0 %v7306_v7  ;;  %v5022_v62 = vcombine.low %v3020_v51, %v3024_v52 }
 0x7f1   :  { %4281 = vmatpush1.bf16.msra.mxu1 %v5122_v27  ;;  %4363 = vmatpush1.bf16.msra.mxu0 %v5124_v29  ;;  %v5147_v27 = vcombine.high %v3146_v20, %v3150_v21  ;;  %v5149_v29 = vcombine.high %v3147_v22, %v3151_v23  ;;  %v3000_v20 = vld [vmem:[%s7770_s16 + $0x30] sm:$0xff]  ;;  %v2997_v21 = vld [vmem:[%s7770_s16 + $0x18] sm:$0xff]  ;;  %v2972_v23 = vmul.f32 0.5, %v7344_v24 }
 0x7f2   :  { %5194 = vmatprep.mubr.msk.bf16.mxu1 %vm2151_vm3, %v7322_v15  ;;  %5195 = vmatprep.mubr.msk.bf16.mxu0 %vm2151_vm3, %v7322_v15  ;;  %v3001_v22 = vld [vmem:[%s7770_s16 + $0x38] sm:$0xff] }
 0x7f3   :  { %4282 = vmatprep.subr.bf16.mxu1 %v5131_v9  ;;  %4364 = vmatprep.subr.bf16.mxu0 %v5133_v10  ;;  %v5189_v9 = vcombine.high %v3187_v0, %v3187_v0  ;;  %v5827_v10 = vpop.eup %5826  ;;  %v5001_v39 = vcombine.high %v2997_v21, %v3001_v22  ;;  %v3005_v24 = vld [vmem:[%s7770_s16 + $0x58] sm:$0xff] }
 0x7f5   :  { %4283 = vmatpush1.bf16.msra.mxu1 %v5130_v17  ;;  %4365 = vmatpush1.bf16.msra.mxu0 %v5132_v11  ;;  %v2984_v17 = vadd.f32 1.0, %v5827_v10  ;;  %v4219_v11 = vand.u32 %v5187_v8, %v6876_v28  ;;  %v3041_v8 = vld [vmem:[%s7770_s16 + $0x178] sm:$0xff]  ;;  %v5032_v10 = vcombine.low %v3029_v59, %v3033_v61 }
 0x7f6   :  { %4284 = vmatprep.subr.bf16.mxu1 %v5139_v18  ;;  %4366 = vmatprep.subr.bf16.mxu0 %v5141_v19  ;;  %v4225_v18 = vand.u32 %v5189_v9, %v6876_v28  ;;  %v2996_v19 = vld [vmem:[%s7770_s16 + $0x10] sm:$0xff] }
 0x7f7   :  { %v4998_v37 = vcombine.low %v2996_v19, %v3000_v20 }
 0x7f9   :  { %4285 = vmatpush1.bf16.msra.mxu1 %v5138_v25  ;;  %4367 = vmatpush1.bf16.msra.mxu0 %v5140_v26  ;;  %v4216_v25 = vand.u32 %v5186_v14, %v6876_v28  ;;  %v4222_v26 = vand.u32 %v5188_v16, %v6876_v28  ;;  %v3044_v14 = vld [vmem:[%s7770_s16 + $0x190] sm:$0xff] }
 0x7fa   :  { %4286 = vmatprep.subr.bf16.mxu1 %v5147_v27  ;;  %4368 = vmatprep.subr.bf16.mxu0 %v5149_v29  ;;  %v2988_v27 = vmul.f32 %v2984_v17, %v2972_v23  ;;  %v4999_v29 = vcombine.high %v2996_v19, %v3000_v20  ;;  %v3048_v16 = vld [vmem:[%s7770_s16 + $0x1b0] sm:$0xff]  ;;  %v3045_v17 = vld [vmem:[%s7770_s16 + $0x198] sm:$0xff] }
 0x7fb   :  { %v5047_v20 = vcombine.high %v3044_v14, %v3048_v16  ;;  %v3056_v23 = vld [vmem:[%s7770_s16 + $0x1f0] sm:$0xff] }
 0x7fd   :  { %4287 = vmatpush1.bf16.msra.mxu1 %v5146_v38  ;;  %4369 = vmatpush1.bf16.msra.mxu0 %v5148_v40  ;;  %v7430_v38 = vpack.c.bf16 %v2988_v27, %v2988_v27  ;;  %v5000_v40 = vcombine.low %v2997_v21, %v3001_v22  ;;  %v3052_v22 = vld [vmem:[%s7770_s16 + $0x1d0] sm:$0xff]  ;;  %v5046_v27 = vcombine.low %v3044_v14, %v3048_v16 }
 0x7fe   :  { %4288 = vmatprep.subr.bf16.mxu1 %v5155_v41  ;;  %4370 = vmatprep.subr.bf16.mxu0 %v5157_v42  ;;  %v5007_v41 = vcombine.high %v3004_v30, %v3008_v33  ;;  %v5009_v42 = vcombine.high %v3005_v24, %v3009_v36  ;;  %v3100_v16 = vld [vmem:[%s7770_s16 + $0x350] sm:$0xff] }
 0x801   :  { %4289 = vmatpush1.bf16.msra.mxu1 %v5154_v48  ;;  %4371 = vmatpush1.bf16.msra.mxu0 %v5156_v49  ;;  %v5006_v48 = vcombine.low %v3004_v30, %v3008_v33  ;;  %v5008_v49 = vcombine.low %v3005_v24, %v3009_v36  ;;  %v3060_v33 = vld [vmem:[%s7770_s16 + $0x210] sm:$0xff]  ;;  %v3061_v36 = vld [vmem:[%s7770_s16 + $0x218] sm:$0xff] }
 0x802   :  { %4290 = vmatprep.subr.bf16.mxu1 %v5163_v50  ;;  %4372 = vmatprep.subr.bf16.mxu0 %v5165_v60  ;;  %v5015_v50 = vcombine.high %v3012_v43, %v3016_v44  ;;  %v5017_v60 = vcombine.high %v3013_v45, %v3017_v47  ;;  %v3064_v24 = vld [vmem:[%s7770_s16 + $0x230] sm:$0xff] }
 0x803   :  { %v3068_v44 = vld [vmem:[%s7770_s16 + $0x250] sm:$0xff] }
 0x805   :  { %4291 = vmatpush1.bf16.msra.mxu1 %v5162_v55  ;;  %4373 = vmatpush1.bf16.msra.mxu0 %v5164_v56  ;;  %v5016_v55 = vcombine.low %v3013_v45, %v3017_v47  ;;  %v5023_v56 = vcombine.high %v3020_v51, %v3024_v52  ;;  %v3072_v45 = vld [vmem:[%s7770_s16 + $0x270] sm:$0xff]  ;;  %v3069_v47 = vld [vmem:[%s7770_s16 + $0x258] sm:$0xff] }
 0x806   :  { %4292 = vmatprep.subr.bf16.mxu1 %v5171_v46  ;;  %4374 = vmatprep.subr.bf16.mxu0 %v5173_v57  ;;  %v3028_v57 = vld [vmem:[%s7770_s16 + $0x110] sm:$0xff] }
 0x807   :  { %v5031_v0 = vcombine.high %v3028_v57, %v3032_v58  ;;  %v5030_v9 = vcombine.low %v3028_v57, %v3032_v58  ;;  %v3076_v52 = vld [vmem:[%s7770_s16 + $0x290] sm:$0xff] }
 0x808   :  { %v3084_v58 = vld [vmem:[%s7770_s16 + $0x2d0] sm:$0xff] }
 0x809   :  { %4293 = vmatpush1.bf16.msra.mxu1 %v5170_v1  ;;  %4375 = vmatpush1.bf16.msra.mxu0 %v5172_v2  ;;  %v5033_v1 = vcombine.high %v3029_v59, %v3033_v61  ;;  %v3036_v2 = vld [vmem:[%s7770_s16 + $0x150] sm:$0xff]  ;;  %v3085_v61 = vld [vmem:[%s7770_s16 + $0x2d8] sm:$0xff] }
 0x80a   :  { %4294 = vmatprep.subr.bf16.mxu1 %v5179_v4  ;;  %4376 = vmatprep.subr.bf16.mxu0 %v5181_v5  ;;  %v3040_v4 = vld [vmem:[%s7770_s16 + $0x170] sm:$0xff]  ;;  %v3037_v5 = vld [vmem:[%s7770_s16 + $0x158] sm:$0xff] }
 0x80b   :  { %v5040_v19 = vcombine.low %v3037_v5, %v3041_v8  ;;  %v3088_v59 = vld [vmem:[%s7770_s16 + $0x2f0] sm:$0xff] }
 0x80d   :  { %4295 = vmatpush1.bf16.msra.mxu1 %v5178_v12  ;;  %4377 = vmatpush1.bf16.msra.mxu0 %v5180_v13  ;;  %v5039_v12 = vcombine.high %v3036_v2, %v3040_v4  ;;  %v5041_v13 = vcombine.high %v3037_v5, %v3041_v8  ;;  %v3096_v5 = vld [vmem:[%s7770_s16 + $0x330] sm:$0xff]  ;;  %v3093_v8 = vld [vmem:[%s7770_s16 + $0x318] sm:$0xff] }
 0x80e   :  { %4296 = vmatprep.subr.bf16.mxu1 %v4219_v11  ;;  %4378 = vmatprep.subr.bf16.mxu0 %v4225_v18  ;;  %v3049_v11 = vld [vmem:[%s7770_s16 + $0x1b8] sm:$0xff]  ;;  %v5038_v18 = vcombine.low %v3036_v2, %v3040_v4  ;;  %v3092_v4 = vld [vmem:[%s7770_s16 + $0x310] sm:$0xff] }
 0x80f   :  { %v5049_v21 = vcombine.high %v3045_v17, %v3049_v11 }
 0x811   :  { %4297 = vmatpush1.bf16.msra.mxu1 %v4216_v25  ;;  %4379 = vmatpush1.bf16.msra.mxu0 %v4222_v26  ;;  %v3053_v25 = vld [vmem:[%s7770_s16 + $0x1d8] sm:$0xff] }
 0x812   :  { %4403 = vmatprep.subr.bf16.mxu1 %v4999_v29  ;;  %4485 = vmatprep.subr.bf16.mxu0 %v5001_v39  ;;  %v3057_v26 = vld [vmem:[%s7770_s16 + $0x1f8] sm:$0xff]  ;;  %v5048_v29 = vcombine.low %v3045_v17, %v3049_v11  ;;  %v5055_v39 = vcombine.high %v3052_v22, %v3056_v23  ;;  %v3104_v17 = vld [vmem:[%s7770_s16 + $0x370] sm:$0xff] }
 0x813   :  { %v5057_v30 = vcombine.high %v3053_v25, %v3057_v26  ;;  %v3101_v11 = vld [vmem:[%s7770_s16 + $0x358] sm:$0xff] }
 0x814   :  { %4313 = vmatmul.mubr.bf16.vlgmr.msra.gmra.mrb[24].mxu1 %v7430_v38  ;;  %4395 = vmatmul.mubr.bf16.vlgmr.msra.gmra.mrb[12].mxu0 %v7430_v38 }
 0x815   :  { %4404 = vmatpush1.bf16.msra.mxu1 %v4998_v37  ;;  %4435 = vmatprep.mubr.bf16.mxu1 %v7304_v6  ;;  %v3065_v37 = vld [vmem:[%s7770_s16 + $0x238] sm:$0xff] }
 0x816   :  { %4486 = vmatpush1.bf16.msra.mxu0 %v5000_v40  ;;  %4517 = vmatprep.mubr.bf16.mxu0 %v7304_v6  ;;  %v3025_v6 = vld [vmem:[%s7770_s16 + $0xf8] sm:$0xff]  ;;  %v5054_v40 = vcombine.low %v3052_v22, %v3056_v23  ;;  %v5065_v43 = vcombine.high %v3061_v36, %v3065_v37  ;;  %v3108_v23 = vld [vmem:[%s7770_s16 + $0x390] sm:$0xff] }
 0x817   :  { %4405 = vmatprep.subr.bf16.mxu1 %v5007_v41  ;;  %4487 = vmatprep.subr.bf16.mxu0 %v5009_v42  ;;  %v5025_v46 = vcombine.high %v3021_v53, %v3025_v6  ;;  %v5024_v63 = vcombine.low %v3021_v53, %v3025_v6  ;;  %v5056_v41 = vcombine.low %v3053_v25, %v3057_v26  ;;  %v3080_v53 = vld [vmem:[%s7770_s16 + $0x2b0] sm:$0xff]  ;;  %v3077_v6 = vld [vmem:[%s7770_s16 + $0x298] sm:$0xff] }
 0x818   :  { %v5063_v42 = vcombine.high %v3060_v33, %v3064_v24  ;;  %v3112_v25 = vld [vmem:[%s7770_s16 + $0x3b0] sm:$0xff]  ;;  %v3109_v26 = vld [vmem:[%s7770_s16 + $0x398] sm:$0xff] }
 0x819   :  { %4406 = vmatpush1.bf16.msra.mxu1 %v5006_v48  ;;  %v3073_v48 = vld [vmem:[%s7770_s16 + $0x278] sm:$0xff] }
 0x81a   :  { %4488 = vmatpush1.bf16.msra.mxu0 %v5008_v49  ;;  %4407 = vmatprep.subr.bf16.mxu1 %v5015_v50  ;;  %v5062_v49 = vcombine.low %v3060_v33, %v3064_v24  ;;  %v5064_v50 = vcombine.low %v3061_v36, %v3065_v37  ;;  %v5073_v51 = vcombine.high %v3069_v47, %v3073_v48  ;;  %v3116_v24 = vld [vmem:[%s7770_s16 + $0x3d0] sm:$0xff]  ;;  %v3117_v37 = vld [vmem:[%s7770_s16 + $0x3d8] sm:$0xff] }
 0x81b   :  { %4489 = vmatprep.subr.bf16.mxu0 %v5017_v60  ;;  %v5071_v60 = vcombine.high %v3068_v44, %v3072_v45  ;;  %v3120_v36 = vld [vmem:[%s7770_s16 + $0x3f0] sm:$0xff] }
 0x81d   :  { %4408 = vmatpush1.bf16.msra.mxu1 %v5014_v54  ;;  %v3081_v54 = vld [vmem:[%s7770_s16 + $0x2b8] sm:$0xff] }
 0x81e   :  { %4490 = vmatpush1.bf16.msra.mxu0 %v5016_v55  ;;  %4409 = vmatprep.subr.bf16.mxu1 %v5023_v56  ;;  %v5070_v55 = vcombine.low %v3068_v44, %v3072_v45  ;;  %v5072_v56 = vcombine.low %v3069_v47, %v3073_v48  ;;  %v5081_v57 = vcombine.high %v3077_v6, %v3081_v54  ;;  %v3124_v45 = vld [vmem:[%s7770_s16 + $0x410] sm:$0xff]  ;;  %v3125_v48 = vld [vmem:[%s7770_s16 + $0x418] sm:$0xff] }
 0x81f   :  { %4491 = vmatprep.subr.bf16.mxu0 %v5025_v46  ;;  %v5079_v46 = vcombine.high %v3076_v52, %v3080_v53  ;;  %v3128_v47 = vld [vmem:[%s7770_s16 + $0x430] sm:$0xff] }
 0x821   :  { %4410 = vmatpush1.bf16.msra.mxu1 %v5022_v62  ;;  %v3089_v62 = vld [vmem:[%s7770_s16 + $0x2f8] sm:$0xff] }
 0x822   :  { %4492 = vmatpush1.bf16.msra.mxu0 %v5024_v63  ;;  %4411 = vmatprep.subr.bf16.mxu1 %v5031_v0  ;;  %v5078_v63 = vcombine.low %v3076_v52, %v3080_v53  ;;  %v5080_v0 = vcombine.low %v3077_v6, %v3081_v54  ;;  %v5089_v2 = vcombine.high %v3085_v61, %v3089_v62  ;;  %v3132_v53 = vld [vmem:[%s7770_s16 + $0x450] sm:$0xff] }
 0x823   :  { %4493 = vmatprep.subr.bf16.mxu0 %v5033_v1  ;;  %v5087_v1 = vcombine.high %v3084_v58, %v3088_v59  ;;  %v3136_v6 = vld [vmem:[%s7770_s16 + $0x470] sm:$0xff]  ;;  %v5126_v54 = vcombine.low %v3124_v45, %v3128_v47 }
 0x825   :  { %4412 = vmatpush1.bf16.msra.mxu1 %v5030_v9  ;;  %v3097_v9 = vld [vmem:[%s7770_s16 + $0x338] sm:$0xff] }
 0x826   :  { %4494 = vmatpush1.bf16.msra.mxu0 %v5032_v10  ;;  %4413 = vmatprep.subr.bf16.mxu1 %v5039_v12  ;;  %v5086_v10 = vcombine.low %v3084_v58, %v3088_v59  ;;  %v5088_v12 = vcombine.low %v3085_v61, %v3089_v62  ;;  %v5097_v14 = vcombine.high %v3093_v8, %v3097_v9  ;;  %v3140_v58 = vld [vmem:[%s7770_s16 + $0x490] sm:$0xff]  ;;  %v3141_v62 = vld [vmem:[%s7770_s16 + $0x498] sm:$0xff] }
 0x827   :  { %4495 = vmatprep.subr.bf16.mxu0 %v5041_v13  ;;  %v5095_v13 = vcombine.high %v3092_v4, %v3096_v5  ;;  %v3144_v59 = vld [vmem:[%s7770_s16 + $0x4b0] sm:$0xff] }
 0x829   :  { %4414 = vmatpush1.bf16.msra.mxu1 %v5038_v18  ;;  %v3105_v18 = vld [vmem:[%s7770_s16 + $0x378] sm:$0xff] }
 0x82a   :  { %4496 = vmatpush1.bf16.msra.mxu0 %v5040_v19  ;;  %4415 = vmatprep.subr.bf16.mxu1 %v5047_v20  ;;  %v5094_v19 = vcombine.low %v3092_v4, %v3096_v5  ;;  %v5096_v20 = vcombine.low %v3093_v8, %v3097_v9  ;;  %v5105_v22 = vcombine.high %v3101_v11, %v3105_v18  ;;  %v3148_v5 = vld [vmem:[%s7770_s16 + $0x4d0] sm:$0xff]  ;;  %v3149_v8 = vld [vmem:[%s7770_s16 + $0x4d8] sm:$0xff] }
 0x82b   :  { %4497 = vmatprep.subr.bf16.mxu0 %v5049_v21  ;;  %v5103_v21 = vcombine.high %v3100_v16, %v3104_v17  ;;  %v3153_v9 = vld [vmem:[%s7770_s16 + $0x4f8] sm:$0xff] }
 0x82d   :  { %4416 = vmatpush1.bf16.msra.mxu1 %v5046_v27  ;;  %v3113_v27 = vld [vmem:[%s7770_s16 + $0x3b8] sm:$0xff] }
 0x82e   :  { %4498 = vmatpush1.bf16.msra.mxu0 %v5048_v29  ;;  %4417 = vmatprep.subr.bf16.mxu1 %v5055_v39  ;;  %v5102_v29 = vcombine.low %v3100_v16, %v3104_v17  ;;  %v5104_v39 = vcombine.low %v3101_v11, %v3105_v18  ;;  %v5113_v33 = vcombine.high %v3109_v26, %v3113_v27  ;;  %v3160_v16 = vld [vmem:[%s7770_s16 + $0x530] sm:$0xff]  ;;  %v3157_v17 = vld [vmem:[%s7770_s16 + $0x518] sm:$0xff] }
 0x82f   :  { %4499 = vmatprep.subr.bf16.mxu0 %v5057_v30  ;;  %v5111_v30 = vcombine.high %v3108_v23, %v3112_v25  ;;  %v3161_v11 = vld [vmem:[%s7770_s16 + $0x538] sm:$0xff] }
 0x831   :  { %4418 = vmatpush1.bf16.msra.mxu1 %v5054_v40  ;;  %v3121_v40 = vld [vmem:[%s7770_s16 + $0x3f8] sm:$0xff] }
 0x832   :  { %4500 = vmatpush1.bf16.msra.mxu0 %v5056_v41  ;;  %4419 = vmatprep.subr.bf16.mxu1 %v5063_v42  ;;  %v5110_v41 = vcombine.low %v3108_v23, %v3112_v25  ;;  %v5112_v42 = vcombine.low %v3109_v26, %v3113_v27  ;;  %v5121_v44 = vcombine.high %v3117_v37, %v3121_v40  ;;  %v3168_v23 = vld [vmem:[%s7770_s16 + $0x570] sm:$0xff]  ;;  %v3165_v25 = vld [vmem:[%s7770_s16 + $0x558] sm:$0xff] }
 0x833   :  { %4501 = vmatprep.subr.bf16.mxu0 %v5065_v43  ;;  %v5119_v43 = vcombine.high %v3116_v24, %v3120_v36  ;;  %v3169_v26 = vld [vmem:[%s7770_s16 + $0x578] sm:$0xff] }
 0x835   :  { %4420 = vmatpush1.bf16.msra.mxu1 %v5062_v49  ;;  %v3129_v49 = vld [vmem:[%s7770_s16 + $0x438] sm:$0xff] }
 0x836   :  { %4502 = vmatpush1.bf16.msra.mxu0 %v5064_v50  ;;  %4421 = vmatprep.subr.bf16.mxu1 %v5071_v60  ;;  %v5118_v50 = vcombine.low %v3116_v24, %v3120_v36  ;;  %v5120_v60 = vcombine.low %v3117_v37, %v3121_v40  ;;  %v5129_v52 = vcombine.high %v3125_v48, %v3129_v49  ;;  %v3176_v24 = vld [vmem:[%s7770_s16 + $0x5b0] sm:$0xff]  ;;  %v3173_v36 = vld [vmem:[%s7770_s16 + $0x598] sm:$0xff] }
 0x837   :  { %4503 = vmatprep.subr.bf16.mxu0 %v5073_v51  ;;  %v5127_v51 = vcombine.high %v3124_v45, %v3128_v47  ;;  %v3177_v37 = vld [vmem:[%s7770_s16 + $0x5b8] sm:$0xff]  ;;  %v3184_v45 = vld [vmem:[%s7770_s16 + $0x5f0] sm:$0xff] }
 0x838   :  { %v3188_v47 = vld [vmem:[%s7770_s16 + $0x610] sm:$0x33] }
 0x839   :  { %4422 = vmatpush1.bf16.msra.mxu1 %v5070_v55  ;;  %v3133_v55 = vld [vmem:[%s7770_s16 + $0x458] sm:$0xff] }
 0x83a   :  { %4504 = vmatpush1.bf16.msra.mxu0 %v5072_v56  ;;  %4423 = vmatprep.subr.bf16.mxu1 %v5079_v46  ;;  %v3137_v56 = vld [vmem:[%s7770_s16 + $0x478] sm:$0xff]  ;;  %v5128_v46 = vcombine.low %v3125_v48, %v3129_v49 }
 0x83b   :  { %4505 = vmatprep.subr.bf16.mxu0 %v5081_v57  ;;  %v5135_v57 = vcombine.high %v3132_v53, %v3136_v6  ;;  %v5137_v61 = vcombine.high %v3133_v55, %v3137_v56  ;;  %v3181_v48 = vld [vmem:[%s7770_s16 + $0x5d8] sm:$0xff] }
 0x83c   :  { %v3185_v49 = vld [vmem:[%s7770_s16 + $0x5f8] sm:$0xff] }
 0x83d   :  { %4424 = vmatpush1.bf16.msra.mxu1 %v5078_v63  ;;  %v3145_v63 = vld [vmem:[%s7770_s16 + $0x4b8] sm:$0xff] }
 0x83e   :  { %4506 = vmatpush1.bf16.msra.mxu0 %v5080_v0  ;;  %4425 = vmatprep.subr.bf16.mxu1 %v5087_v1  ;;  %v5134_v0 = vcombine.low %v3132_v53, %v3136_v6  ;;  %v5136_v1 = vcombine.low %v3133_v55, %v3137_v56  ;;  %v5145_v4 = vcombine.high %v3141_v62, %v3145_v63 }
 0x83f   :  { %4507 = vmatprep.subr.bf16.mxu0 %v5089_v2  ;;  %v5143_v2 = vcombine.high %v3140_v58, %v3144_v59  ;;  %v5191_v53 = vcombine.high %v3188_v47, %v3188_v47  ;;  %v5185_v6 = vcombine.high %v3181_v48, %v3185_v49  ;;  %v5190_v56 = vcombine.low %v3188_v47, %v3188_v47 }
 0x841   :  { %4426 = vmatpush1.bf16.msra.mxu1 %v5086_v10  ;;  %v5144_v10 = vcombine.low %v3141_v62, %v3145_v63 }
 0x842   :  { %4508 = vmatpush1.bf16.msra.mxu0 %v5088_v12  ;;  %4427 = vmatprep.subr.bf16.mxu1 %v5095_v13  ;;  %v5153_v13 = vcombine.high %v3149_v8, %v3153_v9 }
 0x843   :  { %4509 = vmatprep.subr.bf16.mxu0 %v5097_v14  ;;  %v3156_v14 = vld [vmem:[%s7770_s16 + $0x510] sm:$0xff] }
 0x844   :  { %v5158_v27 = vcombine.low %v3156_v14, %v3160_v16 }
 0x845   :  { %4428 = vmatpush1.bf16.msra.mxu1 %v5094_v19  ;;  %v5152_v19 = vcombine.low %v3149_v8, %v3153_v9 }
 0x846   :  { %4510 = vmatpush1.bf16.msra.mxu0 %v5096_v20  ;;  %4429 = vmatprep.subr.bf16.mxu1 %v5103_v21  ;;  %v5159_v20 = vcombine.high %v3156_v14, %v3160_v16  ;;  %v5161_v21 = vcombine.high %v3157_v17, %v3161_v11 }
 0x847   :  { %4511 = vmatprep.subr.bf16.mxu0 %v5105_v22  ;;  %v3164_v22 = vld [vmem:[%s7770_s16 + $0x550] sm:$0xff] }
 0x848   :  { %v5166_v40 = vcombine.low %v3164_v22, %v3168_v23 }
 0x849   :  { %4430 = vmatpush1.bf16.msra.mxu1 %v5102_v29  ;;  %v5160_v29 = vcombine.low %v3157_v17, %v3161_v11 }
 0x84a   :  { %4512 = vmatpush1.bf16.msra.mxu0 %v5104_v39  ;;  %4431 = vmatprep.subr.bf16.mxu1 %v5111_v30  ;;  %v5167_v39 = vcombine.high %v3164_v22, %v3168_v23  ;;  %v5169_v30 = vcombine.high %v3165_v25, %v3169_v26 }
 0x84b   :  { %4513 = vmatprep.subr.bf16.mxu0 %v5113_v33  ;;  %v3172_v33 = vld [vmem:[%s7770_s16 + $0x590] sm:$0xff] }
 0x84d   :  { %4432 = vmatpush1.bf16.msra.mxu1 %v5110_v41  ;;  %v5168_v41 = vcombine.low %v3165_v25, %v3169_v26 }
 0x84e   :  { %4514 = vmatpush1.bf16.msra.mxu0 %v5112_v42  ;;  %4433 = vmatprep.subr.bf16.mxu1 %v5119_v43  ;;  %v5175_v42 = vcombine.high %v3172_v33, %v3176_v24  ;;  %v5177_v43 = vcombine.high %v3173_v36, %v3177_v37 }
 0x84f   :  { %4515 = vmatprep.subr.bf16.mxu0 %v5121_v44  ;;  %v3180_v44 = vld [vmem:[%s7770_s16 + $0x5d0] sm:$0xff] }
 0x850   :  { %v5182_v55 = vcombine.low %v3180_v44, %v3184_v45 }
 0x851   :  { %4434 = vmatpush1.bf16.msra.mxu1 %v5118_v50  ;;  %v3189_v50 = vld [vmem:[%s7770_s16 + $0x618] sm:$0x33] }
 0x852   :  { %4516 = vmatpush1.bf16.msra.mxu0 %v5120_v60  ;;  %4444 = vmatprep.subr.bf16.mxu1 %v5127_v51  ;;  %v5174_v60 = vcombine.low %v3172_v33, %v3176_v24  ;;  %v5176_v51 = vcombine.low %v3173_v36, %v3177_v37 }
 0x853   :  { %4526 = vmatprep.subr.bf16.mxu0 %v5129_v52  ;;  %v5183_v52 = vcombine.high %v3180_v44, %v3184_v45 }
 0x854   :  { %4436 = vmatmul.mubr.bf16.vlgmr.msra.gmra.mrb[28].mxu1 %v7306_v7 }
 0x855   :  { %4518 = vmatmul.mubr.bf16.vlgmr.msra.gmra.mrb[16].mxu0 %v7306_v7  ;;  %4445 = vmatpush1.bf16.msra.mxu1 %v5126_v54  ;;  %v3152_v7 = vld [vmem:[%s7770_s16 + $0x4f0] sm:$0xff]  ;;  %v5193_v54 = vcombine.high %v3189_v50, %v3189_v50  ;;  %s5883_s16 = smov [#allocation4]  }
 0x856   :  { %5196 = vmatprep.mubr.msk.bf16.mxu1 %vm2151_vm3, %v7322_v15  ;;  %4527 = vmatpush1.bf16.msra.mxu0 %v5128_v46  ;;  %v5151_v12 = vcombine.high %v3148_v5, %v3152_v7  ;;  %v5150_v18 = vcombine.low %v3148_v5, %v3152_v7  ;;  %v5184_v46 = vcombine.low %v3181_v48, %v3185_v49  ;;  %s4628_s6 = sshll.u32 %s5883_s16, 4  ;;  %s4629_s6 = int_to_ptr.vmem [resolvable:$true] %s4628_s6 }
 0x857   :  { %5197 = vmatprep.mubr.msk.bf16.mxu0 %vm2151_vm3, %v7322_v15  ;;  %4446 = vmatprep.subr.bf16.mxu1 %v5135_v57  ;;  %v5142_v15 = vcombine.low %v3140_v58, %v3144_v59  ;;  %v4231_v57 = vand.u32 %v5191_v53, %v6876_v28  ;;  %v5192_v58 = vcombine.low %v3189_v50, %v3189_v50  ;;  %s5828_s26 = scalar_lea.vmem %s4629_s6, 128  ;;  %p5833_p1 = scmp.lt.s32.totalorder %s4629_s6, %s4629_s6 }
 0x858   :  { %4528 = vmatprep.subr.bf16.mxu0 %v5137_v61  ;;  %v4237_v59 = vand.u32 %v5193_v54, %v6876_v28  ;;  %v4228_v61 = vand.u32 %v5190_v56, %v6876_v28  ;;  %p5829_p0 = scmp.ne.s32.totalorder %s4629_s6, %s5828_s26  ;;  %p5834_p2 = scmp.lt.s32.totalorder %s5828_s26, %s5828_s26 }
 0x859   :  { %4447 = vmatpush1.bf16.msra.mxu1 %v5134_v0  ;;  %v4234_v62 = vand.u32 %v5192_v58, %v6876_v28 }
 0x85a   :  { %4529 = vmatpush1.bf16.msra.mxu0 %v5136_v1  ;;  %4448 = vmatprep.subr.bf16.mxu1 %v5143_v2  ;;  %p5835_p3 = por %p5834_p2, %p5833_p1 }
 0x85b   :  { %4530 = vmatprep.subr.bf16.mxu0 %v5145_v4 }
 0x85c   :  { %p5836_p4 = pnand %p5835_p3, %p5829_p0 }
 0x85d   :  { %4449 = vmatpush1.bf16.msra.mxu1 %v5142_v15 }
 0x85e   :  { %4531 = vmatpush1.bf16.msra.mxu0 %v5144_v10  ;;  %4450 = vmatprep.subr.bf16.mxu1 %v5151_v12 }
 0x85f   :  { %4532 = vmatprep.subr.bf16.mxu0 %v5153_v13 }
 0x861   :  { %4451 = vmatpush1.bf16.msra.mxu1 %v5150_v18 }
 0x862   :  { %4533 = vmatpush1.bf16.msra.mxu0 %v5152_v19  ;;  %4452 = vmatprep.subr.bf16.mxu1 %v5159_v20 }
 0x863   :  { %4534 = vmatprep.subr.bf16.mxu0 %v5161_v21 }
 0x865   :  { %4453 = vmatpush1.bf16.msra.mxu1 %v5158_v27 }
 0x866   :  { %4535 = vmatpush1.bf16.msra.mxu0 %v5160_v29  ;;  %4454 = vmatprep.subr.bf16.mxu1 %v5167_v39 }
 0x867   :  { %4536 = vmatprep.subr.bf16.mxu0 %v5169_v30 }
 0x869   :  { %4455 = vmatpush1.bf16.msra.mxu1 %v5166_v40 }
 0x86a   :  { %4537 = vmatpush1.bf16.msra.mxu0 %v5168_v41  ;;  %4456 = vmatprep.subr.bf16.mxu1 %v5175_v42 }
 0x86b   :  { %4538 = vmatprep.subr.bf16.mxu0 %v5177_v43 }
 0x86d   :  { %4457 = vmatpush1.bf16.msra.mxu1 %v5174_v60 }
 0x86e   :  { %4539 = vmatpush1.bf16.msra.mxu0 %v5176_v51  ;;  %4458 = vmatprep.subr.bf16.mxu1 %v5183_v52 }
 0x86f   :  { %4540 = vmatprep.subr.bf16.mxu0 %v5185_v6 }
 0x871   :  { %4459 = vmatpush1.bf16.msra.mxu1 %v5182_v55 }
 0x872   :  { %4541 = vmatpush1.bf16.msra.mxu0 %v5184_v46  ;;  %4460 = vmatprep.subr.bf16.mxu1 %v4231_v57 }
 0x873   :  { %4542 = vmatprep.subr.bf16.mxu0 %v4237_v59 }
 0x875   :  { %4461 = vmatpush1.bf16.msra.mxu1 %v4228_v61 }
 0x876   :  { %4543 = vmatpush1.bf16.msra.mxu0 %v4234_v62 }
 0x878   :  { %4477 = vmatmul.mubr.bf16.vlgmr.msra.gmra.mrb[28].mxu1 %v7430_v38 }
 0x879   :  { %4559 = vmatmul.mubr.bf16.vlgmr.msra.gmra.mrb[16].mxu0 %v7430_v38 }
 0x87a   :  { %5839 = shalt.err (!%p5836_p4)
}
 0x87b   :  { %s5840_s20 = scalar_lea.hbm %s7773_s19, 128 }
 0x87c   :  { %p5841_p5 = scmp.ne.s32.totalorder %s7773_s19, %s5840_s20  ;;  %p5844_p6 = scmp.lt.u32.totalorder %s5840_s20, %s7773_s19 }
 0x87e   :  { %p5846_p7 = pnand %p5844_p6, %p5841_p5 }
 0x880   :  { %5849 = shalt.err (!%p5846_p7)
}
 0x881   :  { %4631 = dma.vmem_to_hbm [thread:$0]  %s4629_s6, 128, %s7773_s19, [#allocation5]   ;;  %v3190_v28 = vld [vmem:[%s7771_s17] sm:$0xff]  ;;  %v3222_v11 = vsub.s32 7, %v6807_v31  ;;  %vm4602_vm11 = vcmask 56324  }
 0x882   :  { %v3195_v38 = vrot.slane %v3190_v28, %v6810_v32  ;;  %v3203_v63 = vrot.slane %v3190_v28, %v6825_v3  ;;  %v3199_v0 = vrot.slane %v3190_v28, %v6816_v34  ;;  %v3207_v1 = vrot.slane %v3190_v28, %v6819_v35  ;;  %s5884_s17 = smov [#allocation2]   ;;  %vm4603_vm12 = vmor %vm4602_vm11, %vm1478_vm2 }
 0x883   :  { %v3210_v34 = vsub.s32 4, %v6807_v31  ;;  %v3218_v35 = vsub.s32 6, %v6807_v31  ;;  %v3214_v3 = vsub.s32 5, %v6807_v31  ;;  %v3223_v21 = vrot.slane %v3190_v28, %v3222_v11  ;;  %s4618_s19 = sshll.u32 %s5884_s17, 4  ;;  %s4619_s19 = int_to_ptr.vmem [resolvable:$true] %s4618_s19 }
 0x884   :  { %s5850_s12 = scalar_lea.vmem %s4619_s19, 512  ;;  %p5855_p9 = scmp.lt.s32.totalorder %s4619_s19, %s4619_s19 }
 0x885   :  { %v3211_v18 = vrot.slane %v3190_v28, %v3210_v34  ;;  %v3219_v19 = vrot.slane %v3190_v28, %v3218_v35  ;;  %v3215_v20 = vrot.slane %v3190_v28, %v3214_v3  ;;  %p5851_p8 = scmp.ne.s32.totalorder %s4619_s19, %s5850_s12  ;;  %p5856_p10 = scmp.lt.s32.totalorder %s5850_s12, %s5850_s12 }
 0x887   :  { %p5857_p11 = por %p5856_p10, %p5855_p9 }
 0x889   :  { %p5858_p12 = pnand %p5857_p11, %p5851_p8 }
 0x8e7   :  { %v4314_v2 = vpop.f32.mrb[24].mxu1  ;;  %v4396_v4 = vpop.f32.mrb[12].mxu0 }
 0x8e8   :  { %v5234_v5 = vadd.f32 %v4314_v2, %v3195_v38  ;;  %v5236_v7 = vadd.f32 %v4396_v4, %v3203_v63  ;;  %v4316_v8 = vpop.f32.mrb[25].mxu1  ;;  %v4398_v9 = vpop.f32.mrb[13].mxu0 }
 0x8e9   :  { %v5235_v15 = vadd.f32 %v4316_v8, %v3199_v0  ;;  %v5237_v10 = vadd.f32 %v4398_v9, %v3207_v1  ;;  %v4318_v12 = vpop.f32.mrb[26].mxu1  ;;  %v4400_v13 = vpop.f32.mrb[14].mxu0 }
 0x8ea   :  { %v4319_v14 = vpop.f32.mrb[27].mxu1  ;;  %v4401_v16 = vpop.f32.mrb[15].mxu0 }
 0x8eb   :  { %v5202_v17 = vpack.c.bf16 %v5235_v15, %v5234_v5  ;;  %v5203_v32 = vpack.c.bf16 %v5237_v10, %v5236_v7 }
 0x8ed   :  { %4599 = vst [vmem:[#allocation2] sm:$0xff] %v5202_v17  ;;  %4600 = vst [vmem:[#allocation2 + $0x8] sm:$0xff] %v5203_v32 }
 0x94b   :  { %v4478_v22 = vpop.f32.mrb[28].mxu1 }
 0x94c   :  { %v5238_v23 = vadd.f32 %v4478_v22, %v3211_v18  ;;  %v4560_v25 = vpop.f32.mrb[16].mxu0  ;;  %v4480_v26 = vpop.f32.mrb[29].mxu1 }
 0x94d   :  { %v5240_v27 = vadd.f32 %v4560_v25, %v3219_v19  ;;  %v5239_v29 = vadd.f32 %v4480_v26, %v3215_v20  ;;  %v4562_v39 = vpop.f32.mrb[17].mxu0  ;;  %v4482_v30 = vpop.f32.mrb[30].mxu1 }
 0x94e   :  { %v5241_v33 = vadd.f32 %v4562_v39, %v3223_v21  ;;  %v4564_v24 = vpop.f32.mrb[18].mxu0  ;;  %v4483_v36 = vpop.f32.mrb[31].mxu1 }
 0x94f   :  { %v5204_v37 = vpack.c.bf16 %v5239_v29, %v5238_v23  ;;  %v4565_v31 = vpop.f32.mrb[19].mxu0 }
 0x950   :  { %v5205_v40 = vpack.c.bf16 %v5241_v33, %v5240_v27 }
 0x951   :  { %4601 = vst [vmem:[#allocation2 + $0x10] sm:$0xff] %v5204_v37 }
 0x952   :  { %4604 = vst.msk [vmem:[#allocation2 + $0x18] sm:$0xff] %vm4603_vm12, %v5205_v40 }
 0x953   :  { %5861 = shalt.err (!%p5858_p12)
}
 0x954   :  { %s5862_s8 = scalar_lea.hbm %s7772_s18, 512 }
 0x955   :  { %p5863_p13 = scmp.ne.s32.totalorder %s7772_s18, %s5862_s8  ;;  %p5866_p0 = scmp.lt.u32.totalorder %s5862_s8, %s7772_s18 }
 0x957   :  { %p5868_p1 = pnand %p5866_p0, %p5863_p13 }
 0x959   :  { %5871 = shalt.err (!%p5868_p1)
}
 0x95a   :  { %4621 = dma.vmem_to_hbm [thread:$0]  %s4619_s19, 512, %s7772_s18, [#allocation3]  }
 0x95b   :  { %5872 = dma.done.wait [#allocation3], 512  }
 0x95c   :  { %5873 = vsyncadd [#allocation3], 4294966784 }
 0x95d   :  { %5874 = dma.done.wait [#allocation5], 128  }
 0x95e   :  { %5875 = vsyncadd [#allocation5], 4294967168 }
 0x95f   :  { %4638 = vsyncpa [#allocation3], 1 }
 0x960   :  { %4639 = vsyncpa [#allocation5], 1 }

</bundles_post_ra>
